<compile_context>
chip_gen: v5e
topology: v5e:2x2
jax: 0.10.0
libtpu: 0.0.40
codegen_flags: <defaults>
</compile_context>

<pallas_src>
import functools

import jax
import jax.numpy as jnp
from jax.experimental import pallas as pl
from jax.experimental.pallas import tpu as pltpu


def _interp_matrix(in_size, out_size):
    """(out_size, in_size) linear interpolation matrix, align_corners=True."""
    if in_size == 1:
        return jnp.ones((out_size, 1), jnp.float32)
    coords = jnp.arange(out_size, dtype=jnp.float32) * (in_size - 1) / (out_size - 1)
    lo = jnp.clip(jnp.floor(coords).astype(jnp.int32), 0, in_size - 2)
    frac = coords - lo.astype(jnp.float32)
    idx = jnp.arange(in_size, dtype=jnp.int32)[None, :]
    w_lo = (idx == lo[:, None]).astype(jnp.float32) * (1.0 - frac)[:, None]
    w_hi = (idx == (lo + 1)[:, None]).astype(jnp.float32) * frac[:, None]
    return w_lo + w_hi


def _upconv3d_relu_kernel(x_ref, w_ref, b_ref, o_ref, rolled_ref, *,
                          Cin_p, Cout, Wp, Fp, TD):
    # x_ref:      (Dp, Cin_p, Fp)   zero-padded volume for one batch element,
    #                               H/W flattened row-major (row stride Wp),
    #                               lane-padded to Fp (multiple of 128).
    # w_ref:      (3, Cout, 9*Cin_p) conv weights grouped by kd; within a group
    #                               rows are (kh, kw, c) in row-major order.
    # b_ref:      (Cout, 1)         bias (broadcast across lanes).
    # o_ref:      (Cout, TD*Fp)     TD padded output planes, lane-dense.
    # rolled_ref: (TD+2, 9*Cin_p, Fp) scratch holding the 9 lane-rolled copies
    #                               of every padded input plane touched here.
    d0 = pl.program_id(1) * TD

    # Stage 1: roll each padded depth plane once (shared by up to 3 outputs).
    for p in range(TD + 2):
        plane = x_ref[d0 + p]                                    # (Cin_p, Fp)
        for kh in range(3):
            for kw in range(3):
                off = (kh - 1) * Wp + (kw - 1)                   # static lane shift
                shifted = plane if off == 0 else pltpu.roll(
                    plane, (-off) % Fp, axis=1)
                j = kh * 3 + kw
                rolled_ref[p, j * Cin_p:(j + 1) * Cin_p, :] = shifted

    # Stage 2: per output plane, 3 fused dots (K = 9*Cin_p each) + bias + ReLU.
    w0 = w_ref[0]                                                # (Cout, 9*Cin_p)
    w1 = w_ref[1]
    w2 = w_ref[2]
    bias = b_ref[...]                                            # (Cout, 1)
    for i in range(TD):
        acc = jnp.dot(w0, rolled_ref[i], preferred_element_type=jnp.float32)
        acc = acc + jnp.dot(w1, rolled_ref[i + 1],
                            preferred_element_type=jnp.float32)
        acc = acc + jnp.dot(w2, rolled_ref[i + 2],
                            preferred_element_type=jnp.float32)
        acc = jnp.maximum(acc + bias, 0.0)
        o_ref[:, i * Fp:(i + 1) * Fp] = acc.astype(o_ref.dtype)  # 128-aligned store


def upsampling_function_forward(x_ncdhw, weight_oidhw, bias, *, stride=2):
    N, Cin, D, H, W = x_ncdhw.shape
    Cout = weight_oidhw.shape[0]
    Do, Ho, Wo = D * stride, H * stride, W * stride
    Dp, Hp, Wp = Do + 2, Ho + 2, Wo + 2
    F = Hp * Wp                              # flattened padded plane (lanes)
    Fp = ((F + 127) // 128) * 128            # lane-dense, unmasked stores
    Cin_p = ((Cin + 7) // 8) * 8             # sublane-tile aligned channels

    TD = 1                                   # output depth planes per grid step
    for cand in (8, 4, 2):
        if Do % cand == 0:
            TD = cand
            break

    hi = jax.lax.Precision.HIGHEST
    x = x_ncdhw.astype(jnp.float32)
    # Trilinear upsample (align_corners=True) as dense interpolation matmuls.
    # The depth einsum also moves C behind D, so no separate transpose pass.
    # TODO(synk): drop HIGHEST / cast to bf16 (f32 accumulate) on v6e/v7x when a
    # looser tolerance vs PyTorch is acceptable.
    x = jnp.einsum('ncdhw,Dd->nDchw', x, _interp_matrix(D, Do), precision=hi)
    x = jnp.einsum('ndchw,Hh->ndcHw', x, _interp_matrix(H, Ho), precision=hi)
    x = jnp.einsum('ndchw,Ww->ndchW', x, _interp_matrix(W, Wo), precision=hi)

    # Zero-pad D/H/W by 1 (Conv3d padding=1) and channels to Cin_p, flatten
    # (H, W) onto the lane axis and pad it to a multiple of 128.
    # TODO(synk): for production sizes, fuse the upsample/pad into the kernel and
    # stream (TD+2)-plane D-slabs with manual double-buffered DMA instead of
    # keeping the whole padded volume resident (v7x has 64 MiB VMEM per core).
    x = jnp.pad(x, ((0, 0), (1, 1), (0, Cin_p - Cin), (1, 1), (1, 1)))
    x = x.reshape(N, Dp, Cin_p, F)
    x = jnp.pad(x, ((0, 0), (0, 0), (0, 0), (0, Fp - F)))        # (N, Dp, Cin_p, Fp)

    # OIDHW -> (kd, Cout, kh, kw, Cin_p) -> (3, Cout, 9*Cin_p), rows (kh, kw, c).
    w3 = jnp.transpose(weight_oidhw.astype(jnp.float32), (2, 0, 3, 4, 1))
    w3 = jnp.pad(w3, ((0, 0), (0, 0), (0, 0), (0, 0), (0, Cin_p - Cin)))
    w3 = w3.reshape(3, Cout, 9 * Cin_p)
    b2d = bias.reshape(Cout, 1).astype(jnp.float32)

    kernel = functools.partial(_upconv3d_relu_kernel,
                               Cin_p=Cin_p, Cout=Cout, Wp=Wp, Fp=Fp, TD=TD)

    out = pl.pallas_call(
        kernel,
        out_shape=jax.ShapeDtypeStruct((N, Cout, Do * Fp), jnp.float32),
        grid_spec=pltpu.PrefetchScalarGridSpec(
            num_scalar_prefetch=0,
            grid=(N, Do // TD),
            in_specs=[
                pl.BlockSpec((pl.Squeezed(), Dp, Cin_p, Fp),
                             lambda n, dt: (n, 0, 0, 0)),
                pl.BlockSpec((3, Cout, 9 * Cin_p), lambda n, dt: (0, 0, 0)),
                pl.BlockSpec((Cout, 1), lambda n, dt: (0, 0)),
            ],
            out_specs=pl.BlockSpec((pl.Squeezed(), Cout, TD * Fp),
                                   lambda n, dt: (n, 0, dt)),
            scratch_shapes=[pltpu.VMEM((TD + 2, 9 * Cin_p, Fp), jnp.float32)],
        ),
        compiler_params=pltpu.CompilerParams(
            dimension_semantics=("parallel", "parallel")),
    )(x, w3, b2d)

    # Crop lane padding + halo ring; no transpose (kernel already channel-major).
    out = out.reshape(N, Cout, Do, Fp)[:, :, :, :F]
    out = out.reshape(N, Cout, Do, Hp, Wp)[:, :, :, 1:-1, 1:-1]
    return out


# ---------------- pure-JAX reference (independent of the kernel path) --------

def _trilinear_upsample_ref(x, scale=2):
    """x: (N, C, D, H, W); gather-based align_corners=True interpolation."""
    def up_axis(a, axis):
        in_size = a.shape[axis]
        out_size = in_size * scale
        if in_size == 1:
            return jnp.repeat(a, out_size, axis=axis)
        coords = jnp.arange(out_size, dtype=jnp.float32) * (in_size - 1) / (out_size - 1)
        lo = jnp.clip(jnp.floor(coords).astype(jnp.int32), 0, in_size - 2)
        frac = coords - lo.astype(jnp.float32)
        a_lo = jnp.take(a, lo, axis=axis)
        a_hi = jnp.take(a, lo + 1, axis=axis)
        bshape = [1] * a.ndim
        bshape[axis] = out_size
        frac = frac.reshape(bshape)
        return a_lo * (1.0 - frac) + a_hi * frac

    for ax in (2, 3, 4):
        x = up_axis(x, ax)
    return x


def _reference(x_ncdhw, weight_oidhw, bias, stride=2):
    x_up = _trilinear_upsample_ref(x_ncdhw.astype(jnp.float32), scale=stride)
    out = jax.lax.conv_general_dilated(
        x_up, weight_oidhw.astype(jnp.float32),
        window_strides=(1, 1, 1),
        padding=((1, 1), (1, 1), (1, 1)),
        dimension_numbers=('NCDHW', 'OIDHW', 'NCDHW'))
    out = out + bias.reshape(1, -1, 1, 1, 1)
    return jnp.maximum(out, 0.0)


if __name__ == "__main__":
    key = jax.random.PRNGKey(0)
    k1, k2, k3 = jax.random.split(key, 3)

    # small shapes: batch=2, n_filters_in=4, n_filters_out=8, spatial=8^3
    N, Cin, Cout, S = 2, 4, 8, 8
    x = jax.random.normal(k1, (N, Cin, S, S, S), jnp.float32)

    # PyTorch Conv3d parameter shapes: (Cout, Cin, 3, 3, 3), (Cout,)
    fan_in = Cin * 3 * 3 * 3
    bound = 1.0 / (fan_in ** 0.5)
    w = jax.random.uniform(k2, (Cout, Cin, 3, 3, 3), jnp.float32, -bound, bound)
    b = jax.random.uniform(k3, (Cout,), jnp.float32, -bound, bound)

    out = upsampling_function_forward(x, w, b, stride=2)
    out = jax.block_until_ready(out)

    ref = _reference(x, w, b, stride=2)
    assert out.shape == (N, Cout, 2 * S, 2 * S, 2 * S)
    assert jnp.allclose(out, ref, atol=1e-3, rtol=1e-3), \
        float(jnp.max(jnp.abs(out - ref)))

    print("KERNEL_OK")
</pallas_src>

<mosaic_0001>
module attributes {stable_mosaic.version = 11 : i64} {
  func.func @_upconv3d_relu_kernel(%arg0: i32, %arg1: i32, %arg2: memref<1x18x8x384xf32, #tpu.memory_space<vmem>>, %arg3: memref<3x8x72xf32, #tpu.memory_space<vmem>>, %arg4: memref<8x1xf32, #tpu.memory_space<vmem>>, %arg5: memref<1x8x3072xf32, #tpu.memory_space<vmem>>, %arg6: memref<10x72x384xf32, #tpu.memory_space<vmem>>) attributes {dimension_semantics = [#tpu.dimension_semantics<parallel>, #tpu.dimension_semantics<parallel>], iteration_bounds = array<i64: 2, 2>, scalar_prefetch = 0 : i64, scratch_operands = 1 : i64, tpu.core_type = #tpu.core_type<tc>, window_params = [{transform_indices = @transform_0, window_bounds = array<i64: 1, 18, 8, 384>}, {pipeline_mode = #tpu.pipeline_mode<synchronous>, transform_indices = @transform_1, window_bounds = array<i64: 3, 8, 72>}, {pipeline_mode = #tpu.pipeline_mode<synchronous>, transform_indices = @transform_2, window_bounds = array<i64: 8, 1>}, {transform_indices = @transform_3, window_bounds = array<i64: 1, 8, 3072>}]} {
    %c8_i32 = arith.constant 8 : i32
    %0 = arith.muli %arg1, %c8_i32 : i32
    %c0_i32 = arith.constant 0 : i32
    %1 = arith.addi %0, %c0_i32 : i32
    %c0 = arith.constant 0 : index
    %2 = arith.index_cast %1 : i32 to index
    %c0_0 = arith.constant 0 : index
    %c0_1 = arith.constant 0 : index
    %3 = vector.load %arg2[%c0, %2, %c0_0, %c0_1] : memref<1x18x8x384xf32, #tpu.memory_space<vmem>>, vector<1x1x8x384xf32>
    %4 = vector.shape_cast %3 : vector<1x1x8x384xf32> to vector<8x384xf32>
    %c19_i32 = arith.constant 19 : i32
    %5 = tpu.dynamic_rotate %4 by %c19_i32 dim 1 : vector<8x384xf32>, i32 -> vector<8x384xf32>
    %c0_2 = arith.constant 0 : index
    %c0_3 = arith.constant 0 : index
    %c0_4 = arith.constant 0 : index
    %6 = vector.load %arg6[%c0_2, %c0_3, %c0_4] : memref<10x72x384xf32, #tpu.memory_space<vmem>>, vector<1x8x384xf32>
    %7 = vector.shape_cast %6 : vector<1x8x384xf32> to vector<8x384xf32>
    %8 = vector.shape_cast %5 : vector<8x384xf32> to vector<1x8x384xf32>
    tpu.vector_store %arg6[%c0_2, %c0_3, %c0_4], %8 {strides = array<i32>} : memref<10x72x384xf32, #tpu.memory_space<vmem>>, vector<1x8x384xf32>,
    %c18_i32 = arith.constant 18 : i32
    %9 = tpu.dynamic_rotate %4 by %c18_i32 dim 1 : vector<8x384xf32>, i32 -> vector<8x384xf32>
    %c0_5 = arith.constant 0 : index
    %c8 = arith.constant 8 : index
    %c0_6 = arith.constant 0 : index
    %10 = vector.load %arg6[%c0_5, %c8, %c0_6] : memref<10x72x384xf32, #tpu.memory_space<vmem>>, vector<1x8x384xf32>
    %11 = vector.shape_cast %10 : vector<1x8x384xf32> to vector<8x384xf32>
    %12 = vector.shape_cast %9 : vector<8x384xf32> to vector<1x8x384xf32>
    tpu.vector_store %arg6[%c0_5, %c8, %c0_6], %12 {strides = array<i32>} : memref<10x72x384xf32, #tpu.memory_space<vmem>>, vector<1x8x384xf32>,
    %c17_i32 = arith.constant 17 : i32
    %13 = tpu.dynamic_rotate %4 by %c17_i32 dim 1 : vector<8x384xf32>, i32 -> vector<8x384xf32>
    %c0_7 = arith.constant 0 : index
    %c16 = arith.constant 16 : index
    %c0_8 = arith.constant 0 : index
    %14 = vector.load %arg6[%c0_7, %c16, %c0_8] : memref<10x72x384xf32, #tpu.memory_space<vmem>>, vector<1x8x384xf32>
    %15 = vector.shape_cast %14 : vector<1x8x384xf32> to vector<8x384xf32>
    %16 = vector.shape_cast %13 : vector<8x384xf32> to vector<1x8x384xf32>
    tpu.vector_store %arg6[%c0_7, %c16, %c0_8], %16 {strides = array<i32>} : memref<10x72x384xf32, #tpu.memory_space<vmem>>, vector<1x8x384xf32>,
    %c1_i32 = arith.constant 1 : i32
    %17 = tpu.dynamic_rotate %4 by %c1_i32 dim 1 : vector<8x384xf32>, i32 -> vector<8x384xf32>
    %c0_9 = arith.constant 0 : index
    %c24 = arith.constant 24 : index
    %c0_10 = arith.constant 0 : index
    %18 = vector.load %arg6[%c0_9, %c24, %c0_10] : memref<10x72x384xf32, #tpu.memory_space<vmem>>, vector<1x8x384xf32>
    %19 = vector.shape_cast %18 : vector<1x8x384xf32> to vector<8x384xf32>
    %20 = vector.shape_cast %17 : vector<8x384xf32> to vector<1x8x384xf32>
    tpu.vector_store %arg6[%c0_9, %c24, %c0_10], %20 {strides = array<i32>} : memref<10x72x384xf32, #tpu.memory_space<vmem>>, vector<1x8x384xf32>,
    %c0_11 = arith.constant 0 : index
    %c32 = arith.constant 32 : index
    %c0_12 = arith.constant 0 : index
    %21 = vector.load %arg6[%c0_11, %c32, %c0_12] : memref<10x72x384xf32, #tpu.memory_space<vmem>>, vector<1x8x384xf32>
    %22 = vector.shape_cast %21 : vector<1x8x384xf32> to vector<8x384xf32>
    %23 = vector.shape_cast %4 : vector<8x384xf32> to vector<1x8x384xf32>
    tpu.vector_store %arg6[%c0_11, %c32, %c0_12], %23 {strides = array<i32>} : memref<10x72x384xf32, #tpu.memory_space<vmem>>, vector<1x8x384xf32>,
    %c383_i32 = arith.constant 383 : i32
    %24 = tpu.dynamic_rotate %4 by %c383_i32 dim 1 : vector<8x384xf32>, i32 -> vector<8x384xf32>
    %c0_13 = arith.constant 0 : index
    %c40 = arith.constant 40 : index
    %c0_14 = arith.constant 0 : index
    %25 = vector.load %arg6[%c0_13, %c40, %c0_14] : memref<10x72x384xf32, #tpu.memory_space<vmem>>, vector<1x8x384xf32>
    %26 = vector.shape_cast %25 : vector<1x8x384xf32> to vector<8x384xf32>
    %27 = vector.shape_cast %24 : vector<8x384xf32> to vector<1x8x384xf32>
    tpu.vector_store %arg6[%c0_13, %c40, %c0_14], %27 {strides = array<i32>} : memref<10x72x384xf32, #tpu.memory_space<vmem>>, vector<1x8x384xf32>,
    %c367_i32 = arith.constant 367 : i32
    %28 = tpu.dynamic_rotate %4 by %c367_i32 dim 1 : vector<8x384xf32>, i32 -> vector<8x384xf32>
    %c0_15 = arith.constant 0 : index
    %c48 = arith.constant 48 : index
    %c0_16 = arith.constant 0 : index
    %29 = vector.load %arg6[%c0_15, %c48, %c0_16] : memref<10x72x384xf32, #tpu.memory_space<vmem>>, vector<1x8x384xf32>
    %30 = vector.shape_cast %29 : vector<1x8x384xf32> to vector<8x384xf32>
    %31 = vector.shape_cast %28 : vector<8x384xf32> to vector<1x8x384xf32>
    tpu.vector_store %arg6[%c0_15, %c48, %c0_16], %31 {strides = array<i32>} : memref<10x72x384xf32, #tpu.memory_space<vmem>>, vector<1x8x384xf32>,
    %c366_i32 = arith.constant 366 : i32
    %32 = tpu.dynamic_rotate %4 by %c366_i32 dim 1 : vector<8x384xf32>, i32 -> vector<8x384xf32>
    %c0_17 = arith.constant 0 : index
    %c56 = arith.constant 56 : index
    %c0_18 = arith.constant 0 : index
    %33 = vector.load %arg6[%c0_17, %c56, %c0_18] : memref<10x72x384xf32, #tpu.memory_space<vmem>>, vector<1x8x384xf32>
    %34 = vector.shape_cast %33 : vector<1x8x384xf32> to vector<8x384xf32>
    %35 = vector.shape_cast %32 : vector<8x384xf32> to vector<1x8x384xf32>
    tpu.vector_store %arg6[%c0_17, %c56, %c0_18], %35 {strides = array<i32>} : memref<10x72x384xf32, #tpu.memory_space<vmem>>, vector<1x8x384xf32>,
    %c365_i32 = arith.constant 365 : i32
    %36 = tpu.dynamic_rotate %4 by %c365_i32 dim 1 : vector<8x384xf32>, i32 -> vector<8x384xf32>
    %c0_19 = arith.constant 0 : index
    %c64 = arith.constant 64 : index
    %c0_20 = arith.constant 0 : index
    %37 = vector.load %arg6[%c0_19, %c64, %c0_20] : memref<10x72x384xf32, #tpu.memory_space<vmem>>, vector<1x8x384xf32>
    %38 = vector.shape_cast %37 : vector<1x8x384xf32> to vector<8x384xf32>
    %39 = vector.shape_cast %36 : vector<8x384xf32> to vector<1x8x384xf32>
    tpu.vector_store %arg6[%c0_19, %c64, %c0_20], %39 {strides = array<i32>} : memref<10x72x384xf32, #tpu.memory_space<vmem>>, vector<1x8x384xf32>,
    %c1_i32_21 = arith.constant 1 : i32
    %40 = arith.addi %0, %c1_i32_21 : i32
    %c0_22 = arith.constant 0 : index
    %41 = arith.index_cast %40 : i32 to index
    %c0_23 = arith.constant 0 : index
    %c0_24 = arith.constant 0 : index
    %42 = vector.load %arg2[%c0_22, %41, %c0_23, %c0_24] : memref<1x18x8x384xf32, #tpu.memory_space<vmem>>, vector<1x1x8x384xf32>
    %43 = vector.shape_cast %42 : vector<1x1x8x384xf32> to vector<8x384xf32>
    %c19_i32_25 = arith.constant 19 : i32
    %44 = tpu.dynamic_rotate %43 by %c19_i32_25 dim 1 : vector<8x384xf32>, i32 -> vector<8x384xf32>
    %c1 = arith.constant 1 : index
    %c0_26 = arith.constant 0 : index
    %c0_27 = arith.constant 0 : index
    %45 = vector.load %arg6[%c1, %c0_26, %c0_27] : memref<10x72x384xf32, #tpu.memory_space<vmem>>, vector<1x8x384xf32>
    %46 = vector.shape_cast %45 : vector<1x8x384xf32> to vector<8x384xf32>
    %47 = vector.shape_cast %44 : vector<8x384xf32> to vector<1x8x384xf32>
    tpu.vector_store %arg6[%c1, %c0_26, %c0_27], %47 {strides = array<i32>} : memref<10x72x384xf32, #tpu.memory_space<vmem>>, vector<1x8x384xf32>,
    %c18_i32_28 = arith.constant 18 : i32
    %48 = tpu.dynamic_rotate %43 by %c18_i32_28 dim 1 : vector<8x384xf32>, i32 -> vector<8x384xf32>
    %c1_29 = arith.constant 1 : index
    %c8_30 = arith.constant 8 : index
    %c0_31 = arith.constant 0 : index
    %49 = vector.load %arg6[%c1_29, %c8_30, %c0_31] : memref<10x72x384xf32, #tpu.memory_space<vmem>>, vector<1x8x384xf32>
    %50 = vector.shape_cast %49 : vector<1x8x384xf32> to vector<8x384xf32>
    %51 = vector.shape_cast %48 : vector<8x384xf32> to vector<1x8x384xf32>
    tpu.vector_store %arg6[%c1_29, %c8_30, %c0_31], %51 {strides = array<i32>} : memref<10x72x384xf32, #tpu.memory_space<vmem>>, vector<1x8x384xf32>,
    %c17_i32_32 = arith.constant 17 : i32
    %52 = tpu.dynamic_rotate %43 by %c17_i32_32 dim 1 : vector<8x384xf32>, i32 -> vector<8x384xf32>
    %c1_33 = arith.constant 1 : index
    %c16_34 = arith.constant 16 : index
    %c0_35 = arith.constant 0 : index
    %53 = vector.load %arg6[%c1_33, %c16_34, %c0_35] : memref<10x72x384xf32, #tpu.memory_space<vmem>>, vector<1x8x384xf32>
    %54 = vector.shape_cast %53 : vector<1x8x384xf32> to vector<8x384xf32>
    %55 = vector.shape_cast %52 : vector<8x384xf32> to vector<1x8x384xf32>
    tpu.vector_store %arg6[%c1_33, %c16_34, %c0_35], %55 {strides = array<i32>} : memref<10x72x384xf32, #tpu.memory_space<vmem>>, vector<1x8x384xf32>,
    %c1_i32_36 = arith.constant 1 : i32
    %56 = tpu.dynamic_rotate %43 by %c1_i32_36 dim 1 : vector<8x384xf32>, i32 -> vector<8x384xf32>
    %c1_37 = arith.constant 1 : index
    %c24_38 = arith.constant 24 : index
    %c0_39 = arith.constant 0 : index
    %57 = vector.load %arg6[%c1_37, %c24_38, %c0_39] : memref<10x72x384xf32, #tpu.memory_space<vmem>>, vector<1x8x384xf32>
    %58 = vector.shape_cast %57 : vector<1x8x384xf32> to vector<8x384xf32>
    %59 = vector.shape_cast %56 : vector<8x384xf32> to vector<1x8x384xf32>
    tpu.vector_store %arg6[%c1_37, %c24_38, %c0_39], %59 {strides = array<i32>} : memref<10x72x384xf32, #tpu.memory_space<vmem>>, vector<1x8x384xf32>,
    %c1_40 = arith.constant 1 : index
    %c32_41 = arith.constant 32 : index
    %c0_42 = arith.constant 0 : index
    %60 = vector.load %arg6[%c1_40, %c32_41, %c0_42] : memref<10x72x384xf32, #tpu.memory_space<vmem>>, vector<1x8x384xf32>
    %61 = vector.shape_cast %60 : vector<1x8x384xf32> to vector<8x384xf32>
    %62 = vector.shape_cast %43 : vector<8x384xf32> to vector<1x8x384xf32>
    tpu.vector_store %arg6[%c1_40, %c32_41, %c0_42], %62 {strides = array<i32>} : memref<10x72x384xf32, #tpu.memory_space<vmem>>, vector<1x8x384xf32>,
    %c383_i32_43 = arith.constant 383 : i32
    %63 = tpu.dynamic_rotate %43 by %c383_i32_43 dim 1 : vector<8x384xf32>, i32 -> vector<8x384xf32>
    %c1_44 = arith.constant 1 : index
    %c40_45 = arith.constant 40 : index
    %c0_46 = arith.constant 0 : index
    %64 = vector.load %arg6[%c1_44, %c40_45, %c0_46] : memref<10x72x384xf32, #tpu.memory_space<vmem>>, vector<1x8x384xf32>
    %65 = vector.shape_cast %64 : vector<1x8x384xf32> to vector<8x384xf32>
    %66 = vector.shape_cast %63 : vector<8x384xf32> to vector<1x8x384xf32>
    tpu.vector_store %arg6[%c1_44, %c40_45, %c0_46], %66 {strides = array<i32>} : memref<10x72x384xf32, #tpu.memory_space<vmem>>, vector<1x8x384xf32>,
    %c367_i32_47 = arith.constant 367 : i32
    %67 = tpu.dynamic_rotate %43 by %c367_i32_47 dim 1 : vector<8x384xf32>, i32 -> vector<8x384xf32>
    %c1_48 = arith.constant 1 : index
    %c48_49 = arith.constant 48 : index
    %c0_50 = arith.constant 0 : index
    %68 = vector.load %arg6[%c1_48, %c48_49, %c0_50] : memref<10x72x384xf32, #tpu.memory_space<vmem>>, vector<1x8x384xf32>
    %69 = vector.shape_cast %68 : vector<1x8x384xf32> to vector<8x384xf32>
    %70 = vector.shape_cast %67 : vector<8x384xf32> to vector<1x8x384xf32>
    tpu.vector_store %arg6[%c1_48, %c48_49, %c0_50], %70 {strides = array<i32>} : memref<10x72x384xf32, #tpu.memory_space<vmem>>, vector<1x8x384xf32>,
    %c366_i32_51 = arith.constant 366 : i32
    %71 = tpu.dynamic_rotate %43 by %c366_i32_51 dim 1 : vector<8x384xf32>, i32 -> vector<8x384xf32>
    %c1_52 = arith.constant 1 : index
    %c56_53 = arith.constant 56 : index
    %c0_54 = arith.constant 0 : index
    %72 = vector.load %arg6[%c1_52, %c56_53, %c0_54] : memref<10x72x384xf32, #tpu.memory_space<vmem>>, vector<1x8x384xf32>
    %73 = vector.shape_cast %72 : vector<1x8x384xf32> to vector<8x384xf32>
    %74 = vector.shape_cast %71 : vector<8x384xf32> to vector<1x8x384xf32>
    tpu.vector_store %arg6[%c1_52, %c56_53, %c0_54], %74 {strides = array<i32>} : memref<10x72x384xf32, #tpu.memory_space<vmem>>, vector<1x8x384xf32>,
    %c365_i32_55 = arith.constant 365 : i32
    %75 = tpu.dynamic_rotate %43 by %c365_i32_55 dim 1 : vector<8x384xf32>, i32 -> vector<8x384xf32>
    %c1_56 = arith.constant 1 : index
    %c64_57 = arith.constant 64 : index
    %c0_58 = arith.constant 0 : index
    %76 = vector.load %arg6[%c1_56, %c64_57, %c0_58] : memref<10x72x384xf32, #tpu.memory_space<vmem>>, vector<1x8x384xf32>
    %77 = vector.shape_cast %76 : vector<1x8x384xf32> to vector<8x384xf32>
    %78 = vector.shape_cast %75 : vector<8x384xf32> to vector<1x8x384xf32>
    tpu.vector_store %arg6[%c1_56, %c64_57, %c0_58], %78 {strides = array<i32>} : memref<10x72x384xf32, #tpu.memory_space<vmem>>, vector<1x8x384xf32>,
    %c2_i32 = arith.constant 2 : i32
    %79 = arith.addi %0, %c2_i32 : i32
    %c0_59 = arith.constant 0 : index
    %80 = arith.index_cast %79 : i32 to index
    %c0_60 = arith.constant 0 : index
    %c0_61 = arith.constant 0 : index
    %81 = vector.load %arg2[%c0_59, %80, %c0_60, %c0_61] : memref<1x18x8x384xf32, #tpu.memory_space<vmem>>, vector<1x1x8x384xf32>
    %82 = vector.shape_cast %81 : vector<1x1x8x384xf32> to vector<8x384xf32>
    %c19_i32_62 = arith.constant 19 : i32
    %83 = tpu.dynamic_rotate %82 by %c19_i32_62 dim 1 : vector<8x384xf32>, i32 -> vector<8x384xf32>
    %c2 = arith.constant 2 : index
    %c0_63 = arith.constant 0 : index
    %c0_64 = arith.constant 0 : index
    %84 = vector.load %arg6[%c2, %c0_63, %c0_64] : memref<10x72x384xf32, #tpu.memory_space<vmem>>, vector<1x8x384xf32>
    %85 = vector.shape_cast %84 : vector<1x8x384xf32> to vector<8x384xf32>
    %86 = vector.shape_cast %83 : vector<8x384xf32> to vector<1x8x384xf32>
    tpu.vector_store %arg6[%c2, %c0_63, %c0_64], %86 {strides = array<i32>} : memref<10x72x384xf32, #tpu.memory_space<vmem>>, vector<1x8x384xf32>,
    %c18_i32_65 = arith.constant 18 : i32
    %87 = tpu.dynamic_rotate %82 by %c18_i32_65 dim 1 : vector<8x384xf32>, i32 -> vector<8x384xf32>
    %c2_66 = arith.constant 2 : index
    %c8_67 = arith.constant 8 : index
    %c0_68 = arith.constant 0 : index
    %88 = vector.load %arg6[%c2_66, %c8_67, %c0_68] : memref<10x72x384xf32, #tpu.memory_space<vmem>>, vector<1x8x384xf32>
    %89 = vector.shape_cast %88 : vector<1x8x384xf32> to vector<8x384xf32>
    %90 = vector.shape_cast %87 : vector<8x384xf32> to vector<1x8x384xf32>
    tpu.vector_store %arg6[%c2_66, %c8_67, %c0_68], %90 {strides = array<i32>} : memref<10x72x384xf32, #tpu.memory_space<vmem>>, vector<1x8x384xf32>,
    %c17_i32_69 = arith.constant 17 : i32
    %91 = tpu.dynamic_rotate %82 by %c17_i32_69 dim 1 : vector<8x384xf32>, i32 -> vector<8x384xf32>
    %c2_70 = arith.constant 2 : index
    %c16_71 = arith.constant 16 : index
    %c0_72 = arith.constant 0 : index
    %92 = vector.load %arg6[%c2_70, %c16_71, %c0_72] : memref<10x72x384xf32, #tpu.memory_space<vmem>>, vector<1x8x384xf32>
    %93 = vector.shape_cast %92 : vector<1x8x384xf32> to vector<8x384xf32>
    %94 = vector.shape_cast %91 : vector<8x384xf32> to vector<1x8x384xf32>
    tpu.vector_store %arg6[%c2_70, %c16_71, %c0_72], %94 {strides = array<i32>} : memref<10x72x384xf32, #tpu.memory_space<vmem>>, vector<1x8x384xf32>,
    %c1_i32_73 = arith.constant 1 : i32
    %95 = tpu.dynamic_rotate %82 by %c1_i32_73 dim 1 : vector<8x384xf32>, i32 -> vector<8x384xf32>
    %c2_74 = arith.constant 2 : index
    %c24_75 = arith.constant 24 : index
    %c0_76 = arith.constant 0 : index
    %96 = vector.load %arg6[%c2_74, %c24_75, %c0_76] : memref<10x72x384xf32, #tpu.memory_space<vmem>>, vector<1x8x384xf32>
    %97 = vector.shape_cast %96 : vector<1x8x384xf32> to vector<8x384xf32>
    %98 = vector.shape_cast %95 : vector<8x384xf32> to vector<1x8x384xf32>
    tpu.vector_store %arg6[%c2_74, %c24_75, %c0_76], %98 {strides = array<i32>} : memref<10x72x384xf32, #tpu.memory_space<vmem>>, vector<1x8x384xf32>,
    %c2_77 = arith.constant 2 : index
    %c32_78 = arith.constant 32 : index
    %c0_79 = arith.constant 0 : index
    %99 = vector.load %arg6[%c2_77, %c32_78, %c0_79] : memref<10x72x384xf32, #tpu.memory_space<vmem>>, vector<1x8x384xf32>
    %100 = vector.shape_cast %99 : vector<1x8x384xf32> to vector<8x384xf32>
    %101 = vector.shape_cast %82 : vector<8x384xf32> to vector<1x8x384xf32>
    tpu.vector_store %arg6[%c2_77, %c32_78, %c0_79], %101 {strides = array<i32>} : memref<10x72x384xf32, #tpu.memory_space<vmem>>, vector<1x8x384xf32>,
    %c383_i32_80 = arith.constant 383 : i32
    %102 = tpu.dynamic_rotate %82 by %c383_i32_80 dim 1 : vector<8x384xf32>, i32 -> vector<8x384xf32>
    %c2_81 = arith.constant 2 : index
    %c40_82 = arith.constant 40 : index
    %c0_83 = arith.constant 0 : index
    %103 = vector.load %arg6[%c2_81, %c40_82, %c0_83] : memref<10x72x384xf32, #tpu.memory_space<vmem>>, vector<1x8x384xf32>
    %104 = vector.shape_cast %103 : vector<1x8x384xf32> to vector<8x384xf32>
    %105 = vector.shape_cast %102 : vector<8x384xf32> to vector<1x8x384xf32>
    tpu.vector_store %arg6[%c2_81, %c40_82, %c0_83], %105 {strides = array<i32>} : memref<10x72x384xf32, #tpu.memory_space<vmem>>, vector<1x8x384xf32>,
    %c367_i32_84 = arith.constant 367 : i32
    %106 = tpu.dynamic_rotate %82 by %c367_i32_84 dim 1 : vector<8x384xf32>, i32 -> vector<8x384xf32>
    %c2_85 = arith.constant 2 : index
    %c48_86 = arith.constant 48 : index
    %c0_87 = arith.constant 0 : index
    %107 = vector.load %arg6[%c2_85, %c48_86, %c0_87] : memref<10x72x384xf32, #tpu.memory_space<vmem>>, vector<1x8x384xf32>
    %108 = vector.shape_cast %107 : vector<1x8x384xf32> to vector<8x384xf32>
    %109 = vector.shape_cast %106 : vector<8x384xf32> to vector<1x8x384xf32>
    tpu.vector_store %arg6[%c2_85, %c48_86, %c0_87], %109 {strides = array<i32>} : memref<10x72x384xf32, #tpu.memory_space<vmem>>, vector<1x8x384xf32>,
    %c366_i32_88 = arith.constant 366 : i32
    %110 = tpu.dynamic_rotate %82 by %c366_i32_88 dim 1 : vector<8x384xf32>, i32 -> vector<8x384xf32>
    %c2_89 = arith.constant 2 : index
    %c56_90 = arith.constant 56 : index
    %c0_91 = arith.constant 0 : index
    %111 = vector.load %arg6[%c2_89, %c56_90, %c0_91] : memref<10x72x384xf32, #tpu.memory_space<vmem>>, vector<1x8x384xf32>
    %112 = vector.shape_cast %111 : vector<1x8x384xf32> to vector<8x384xf32>
    %113 = vector.shape_cast %110 : vector<8x384xf32> to vector<1x8x384xf32>
    tpu.vector_store %arg6[%c2_89, %c56_90, %c0_91], %113 {strides = array<i32>} : memref<10x72x384xf32, #tpu.memory_space<vmem>>, vector<1x8x384xf32>,
    %c365_i32_92 = arith.constant 365 : i32
    %114 = tpu.dynamic_rotate %82 by %c365_i32_92 dim 1 : vector<8x384xf32>, i32 -> vector<8x384xf32>
    %c2_93 = arith.constant 2 : index
    %c64_94 = arith.constant 64 : index
    %c0_95 = arith.constant 0 : index
    %115 = vector.load %arg6[%c2_93, %c64_94, %c0_95] : memref<10x72x384xf32, #tpu.memory_space<vmem>>, vector<1x8x384xf32>
    %116 = vector.shape_cast %115 : vector<1x8x384xf32> to vector<8x384xf32>
    %117 = vector.shape_cast %114 : vector<8x384xf32> to vector<1x8x384xf32>
    tpu.vector_store %arg6[%c2_93, %c64_94, %c0_95], %117 {strides = array<i32>} : memref<10x72x384xf32, #tpu.memory_space<vmem>>, vector<1x8x384xf32>,
    %c3_i32 = arith.constant 3 : i32
    %118 = arith.addi %0, %c3_i32 : i32
    %c0_96 = arith.constant 0 : index
    %119 = arith.index_cast %118 : i32 to index
    %c0_97 = arith.constant 0 : index
    %c0_98 = arith.constant 0 : index
    %120 = vector.load %arg2[%c0_96, %119, %c0_97, %c0_98] : memref<1x18x8x384xf32, #tpu.memory_space<vmem>>, vector<1x1x8x384xf32>
    %121 = vector.shape_cast %120 : vector<1x1x8x384xf32> to vector<8x384xf32>
    %c19_i32_99 = arith.constant 19 : i32
    %122 = tpu.dynamic_rotate %121 by %c19_i32_99 dim 1 : vector<8x384xf32>, i32 -> vector<8x384xf32>
    %c3 = arith.constant 3 : index
    %c0_100 = arith.constant 0 : index
    %c0_101 = arith.constant 0 : index
    %123 = vector.load %arg6[%c3, %c0_100, %c0_101] : memref<10x72x384xf32, #tpu.memory_space<vmem>>, vector<1x8x384xf32>
    %124 = vector.shape_cast %123 : vector<1x8x384xf32> to vector<8x384xf32>
    %125 = vector.shape_cast %122 : vector<8x384xf32> to vector<1x8x384xf32>
    tpu.vector_store %arg6[%c3, %c0_100, %c0_101], %125 {strides = array<i32>} : memref<10x72x384xf32, #tpu.memory_space<vmem>>, vector<1x8x384xf32>,
    %c18_i32_102 = arith.constant 18 : i32
    %126 = tpu.dynamic_rotate %121 by %c18_i32_102 dim 1 : vector<8x384xf32>, i32 -> vector<8x384xf32>
    %c3_103 = arith.constant 3 : index
    %c8_104 = arith.constant 8 : index
    %c0_105 = arith.constant 0 : index
    %127 = vector.load %arg6[%c3_103, %c8_104, %c0_105] : memref<10x72x384xf32, #tpu.memory_space<vmem>>, vector<1x8x384xf32>
    %128 = vector.shape_cast %127 : vector<1x8x384xf32> to vector<8x384xf32>
    %129 = vector.shape_cast %126 : vector<8x384xf32> to vector<1x8x384xf32>
    tpu.vector_store %arg6[%c3_103, %c8_104, %c0_105], %129 {strides = array<i32>} : memref<10x72x384xf32, #tpu.memory_space<vmem>>, vector<1x8x384xf32>,
    %c17_i32_106 = arith.constant 17 : i32
    %130 = tpu.dynamic_rotate %121 by %c17_i32_106 dim 1 : vector<8x384xf32>, i32 -> vector<8x384xf32>
    %c3_107 = arith.constant 3 : index
    %c16_108 = arith.constant 16 : index
    %c0_109 = arith.constant 0 : index
    %131 = vector.load %arg6[%c3_107, %c16_108, %c0_109] : memref<10x72x384xf32, #tpu.memory_space<vmem>>, vector<1x8x384xf32>
    %132 = vector.shape_cast %131 : vector<1x8x384xf32> to vector<8x384xf32>
    %133 = vector.shape_cast %130 : vector<8x384xf32> to vector<1x8x384xf32>
    tpu.vector_store %arg6[%c3_107, %c16_108, %c0_109], %133 {strides = array<i32>} : memref<10x72x384xf32, #tpu.memory_space<vmem>>, vector<1x8x384xf32>,
    %c1_i32_110 = arith.constant 1 : i32
    %134 = tpu.dynamic_rotate %121 by %c1_i32_110 dim 1 : vector<8x384xf32>, i32 -> vector<8x384xf32>
    %c3_111 = arith.constant 3 : index
    %c24_112 = arith.constant 24 : index
    %c0_113 = arith.constant 0 : index
    %135 = vector.load %arg6[%c3_111, %c24_112, %c0_113] : memref<10x72x384xf32, #tpu.memory_space<vmem>>, vector<1x8x384xf32>
    %136 = vector.shape_cast %135 : vector<1x8x384xf32> to vector<8x384xf32>
    %137 = vector.shape_cast %134 : vector<8x384xf32> to vector<1x8x384xf32>
    tpu.vector_store %arg6[%c3_111, %c24_112, %c0_113], %137 {strides = array<i32>} : memref<10x72x384xf32, #tpu.memory_space<vmem>>, vector<1x8x384xf32>,
    %c3_114 = arith.constant 3 : index
    %c32_115 = arith.constant 32 : index
    %c0_116 = arith.constant 0 : index
    %138 = vector.load %arg6[%c3_114, %c32_115, %c0_116] : memref<10x72x384xf32, #tpu.memory_space<vmem>>, vector<1x8x384xf32>
    %139 = vector.shape_cast %138 : vector<1x8x384xf32> to vector<8x384xf32>
    %140 = vector.shape_cast %121 : vector<8x384xf32> to vector<1x8x384xf32>
    tpu.vector_store %arg6[%c3_114, %c32_115, %c0_116], %140 {strides = array<i32>} : memref<10x72x384xf32, #tpu.memory_space<vmem>>, vector<1x8x384xf32>,
    %c383_i32_117 = arith.constant 383 : i32
    %141 = tpu.dynamic_rotate %121 by %c383_i32_117 dim 1 : vector<8x384xf32>, i32 -> vector<8x384xf32>
    %c3_118 = arith.constant 3 : index
    %c40_119 = arith.constant 40 : index
    %c0_120 = arith.constant 0 : index
    %142 = vector.load %arg6[%c3_118, %c40_119, %c0_120] : memref<10x72x384xf32, #tpu.memory_space<vmem>>, vector<1x8x384xf32>
    %143 = vector.shape_cast %142 : vector<1x8x384xf32> to vector<8x384xf32>
    %144 = vector.shape_cast %141 : vector<8x384xf32> to vector<1x8x384xf32>
    tpu.vector_store %arg6[%c3_118, %c40_119, %c0_120], %144 {strides = array<i32>} : memref<10x72x384xf32, #tpu.memory_space<vmem>>, vector<1x8x384xf32>,
    %c367_i32_121 = arith.constant 367 : i32
    %145 = tpu.dynamic_rotate %121 by %c367_i32_121 dim 1 : vector<8x384xf32>, i32 -> vector<8x384xf32>
    %c3_122 = arith.constant 3 : index
    %c48_123 = arith.constant 48 : index
    %c0_124 = arith.constant 0 : index
    %146 = vector.load %arg6[%c3_122, %c48_123, %c0_124] : memref<10x72x384xf32, #tpu.memory_space<vmem>>, vector<1x8x384xf32>
    %147 = vector.shape_cast %146 : vector<1x8x384xf32> to vector<8x384xf32>
    %148 = vector.shape_cast %145 : vector<8x384xf32> to vector<1x8x384xf32>
    tpu.vector_store %arg6[%c3_122, %c48_123, %c0_124], %148 {strides = array<i32>} : memref<10x72x384xf32, #tpu.memory_space<vmem>>, vector<1x8x384xf32>,
    %c366_i32_125 = arith.constant 366 : i32
    %149 = tpu.dynamic_rotate %121 by %c366_i32_125 dim 1 : vector<8x384xf32>, i32 -> vector<8x384xf32>
    %c3_126 = arith.constant 3 : index
    %c56_127 = arith.constant 56 : index
    %c0_128 = arith.constant 0 : index
    %150 = vector.load %arg6[%c3_126, %c56_127, %c0_128] : memref<10x72x384xf32, #tpu.memory_space<vmem>>, vector<1x8x384xf32>
    %151 = vector.shape_cast %150 : vector<1x8x384xf32> to vector<8x384xf32>
    %152 = vector.shape_cast %149 : vector<8x384xf32> to vector<1x8x384xf32>
    tpu.vector_store %arg6[%c3_126, %c56_127, %c0_128], %152 {strides = array<i32>} : memref<10x72x384xf32, #tpu.memory_space<vmem>>, vector<1x8x384xf32>,
    %c365_i32_129 = arith.constant 365 : i32
    %153 = tpu.dynamic_rotate %121 by %c365_i32_129 dim 1 : vector<8x384xf32>, i32 -> vector<8x384xf32>
    %c3_130 = arith.constant 3 : index
    %c64_131 = arith.constant 64 : index
    %c0_132 = arith.constant 0 : index
    %154 = vector.load %arg6[%c3_130, %c64_131, %c0_132] : memref<10x72x384xf32, #tpu.memory_space<vmem>>, vector<1x8x384xf32>
    %155 = vector.shape_cast %154 : vector<1x8x384xf32> to vector<8x384xf32>
    %156 = vector.shape_cast %153 : vector<8x384xf32> to vector<1x8x384xf32>
    tpu.vector_store %arg6[%c3_130, %c64_131, %c0_132], %156 {strides = array<i32>} : memref<10x72x384xf32, #tpu.memory_space<vmem>>, vector<1x8x384xf32>,
    %c4_i32 = arith.constant 4 : i32
    %157 = arith.addi %0, %c4_i32 : i32
    %c0_133 = arith.constant 0 : index
    %158 = arith.index_cast %157 : i32 to index
    %c0_134 = arith.constant 0 : index
    %c0_135 = arith.constant 0 : index
    %159 = vector.load %arg2[%c0_133, %158, %c0_134, %c0_135] : memref<1x18x8x384xf32, #tpu.memory_space<vmem>>, vector<1x1x8x384xf32>
    %160 = vector.shape_cast %159 : vector<1x1x8x384xf32> to vector<8x384xf32>
    %c19_i32_136 = arith.constant 19 : i32
    %161 = tpu.dynamic_rotate %160 by %c19_i32_136 dim 1 : vector<8x384xf32>, i32 -> vector<8x384xf32>
    %c4 = arith.constant 4 : index
    %c0_137 = arith.constant 0 : index
    %c0_138 = arith.constant 0 : index
    %162 = vector.load %arg6[%c4, %c0_137, %c0_138] : memref<10x72x384xf32, #tpu.memory_space<vmem>>, vector<1x8x384xf32>
    %163 = vector.shape_cast %162 : vector<1x8x384xf32> to vector<8x384xf32>
    %164 = vector.shape_cast %161 : vector<8x384xf32> to vector<1x8x384xf32>
    tpu.vector_store %arg6[%c4, %c0_137, %c0_138], %164 {strides = array<i32>} : memref<10x72x384xf32, #tpu.memory_space<vmem>>, vector<1x8x384xf32>,
    %c18_i32_139 = arith.constant 18 : i32
    %165 = tpu.dynamic_rotate %160 by %c18_i32_139 dim 1 : vector<8x384xf32>, i32 -> vector<8x384xf32>
    %c4_140 = arith.constant 4 : index
    %c8_141 = arith.constant 8 : index
    %c0_142 = arith.constant 0 : index
    %166 = vector.load %arg6[%c4_140, %c8_141, %c0_142] : memref<10x72x384xf32, #tpu.memory_space<vmem>>, vector<1x8x384xf32>
    %167 = vector.shape_cast %166 : vector<1x8x384xf32> to vector<8x384xf32>
    %168 = vector.shape_cast %165 : vector<8x384xf32> to vector<1x8x384xf32>
    tpu.vector_store %arg6[%c4_140, %c8_141, %c0_142], %168 {strides = array<i32>} : memref<10x72x384xf32, #tpu.memory_space<vmem>>, vector<1x8x384xf32>,
    %c17_i32_143 = arith.constant 17 : i32
    %169 = tpu.dynamic_rotate %160 by %c17_i32_143 dim 1 : vector<8x384xf32>, i32 -> vector<8x384xf32>
    %c4_144 = arith.constant 4 : index
    %c16_145 = arith.constant 16 : index
    %c0_146 = arith.constant 0 : index
    %170 = vector.load %arg6[%c4_144, %c16_145, %c0_146] : memref<10x72x384xf32, #tpu.memory_space<vmem>>, vector<1x8x384xf32>
    %171 = vector.shape_cast %170 : vector<1x8x384xf32> to vector<8x384xf32>
    %172 = vector.shape_cast %169 : vector<8x384xf32> to vector<1x8x384xf32>
    tpu.vector_store %arg6[%c4_144, %c16_145, %c0_146], %172 {strides = array<i32>} : memref<10x72x384xf32, #tpu.memory_space<vmem>>, vector<1x8x384xf32>,
    %c1_i32_147 = arith.constant 1 : i32
    %173 = tpu.dynamic_rotate %160 by %c1_i32_147 dim 1 : vector<8x384xf32>, i32 -> vector<8x384xf32>
    %c4_148 = arith.constant 4 : index
    %c24_149 = arith.constant 24 : index
    %c0_150 = arith.constant 0 : index
    %174 = vector.load %arg6[%c4_148, %c24_149, %c0_150] : memref<10x72x384xf32, #tpu.memory_space<vmem>>, vector<1x8x384xf32>
    %175 = vector.shape_cast %174 : vector<1x8x384xf32> to vector<8x384xf32>
    %176 = vector.shape_cast %173 : vector<8x384xf32> to vector<1x8x384xf32>
    tpu.vector_store %arg6[%c4_148, %c24_149, %c0_150], %176 {strides = array<i32>} : memref<10x72x384xf32, #tpu.memory_space<vmem>>, vector<1x8x384xf32>,
    %c4_151 = arith.constant 4 : index
    %c32_152 = arith.constant 32 : index
    %c0_153 = arith.constant 0 : index
    %177 = vector.load %arg6[%c4_151, %c32_152, %c0_153] : memref<10x72x384xf32, #tpu.memory_space<vmem>>, vector<1x8x384xf32>
    %178 = vector.shape_cast %177 : vector<1x8x384xf32> to vector<8x384xf32>
    %179 = vector.shape_cast %160 : vector<8x384xf32> to vector<1x8x384xf32>
    tpu.vector_store %arg6[%c4_151, %c32_152, %c0_153], %179 {strides = array<i32>} : memref<10x72x384xf32, #tpu.memory_space<vmem>>, vector<1x8x384xf32>,
    %c383_i32_154 = arith.constant 383 : i32
    %180 = tpu.dynamic_rotate %160 by %c383_i32_154 dim 1 : vector<8x384xf32>, i32 -> vector<8x384xf32>
    %c4_155 = arith.constant 4 : index
    %c40_156 = arith.constant 40 : index
    %c0_157 = arith.constant 0 : index
    %181 = vector.load %arg6[%c4_155, %c40_156, %c0_157] : memref<10x72x384xf32, #tpu.memory_space<vmem>>, vector<1x8x384xf32>
    %182 = vector.shape_cast %181 : vector<1x8x384xf32> to vector<8x384xf32>
    %183 = vector.shape_cast %180 : vector<8x384xf32> to vector<1x8x384xf32>
    tpu.vector_store %arg6[%c4_155, %c40_156, %c0_157], %183 {strides = array<i32>} : memref<10x72x384xf32, #tpu.memory_space<vmem>>, vector<1x8x384xf32>,
    %c367_i32_158 = arith.constant 367 : i32
    %184 = tpu.dynamic_rotate %160 by %c367_i32_158 dim 1 : vector<8x384xf32>, i32 -> vector<8x384xf32>
    %c4_159 = arith.constant 4 : index
    %c48_160 = arith.constant 48 : index
    %c0_161 = arith.constant 0 : index
    %185 = vector.load %arg6[%c4_159, %c48_160, %c0_161] : memref<10x72x384xf32, #tpu.memory_space<vmem>>, vector<1x8x384xf32>
    %186 = vector.shape_cast %185 : vector<1x8x384xf32> to vector<8x384xf32>
    %187 = vector.shape_cast %184 : vector<8x384xf32> to vector<1x8x384xf32>
    tpu.vector_store %arg6[%c4_159, %c48_160, %c0_161], %187 {strides = array<i32>} : memref<10x72x384xf32, #tpu.memory_space<vmem>>, vector<1x8x384xf32>,
    %c366_i32_162 = arith.constant 366 : i32
    %188 = tpu.dynamic_rotate %160 by %c366_i32_162 dim 1 : vector<8x384xf32>, i32 -> vector<8x384xf32>
    %c4_163 = arith.constant 4 : index
    %c56_164 = arith.constant 56 : index
    %c0_165 = arith.constant 0 : index
    %189 = vector.load %arg6[%c4_163, %c56_164, %c0_165] : memref<10x72x384xf32, #tpu.memory_space<vmem>>, vector<1x8x384xf32>
    %190 = vector.shape_cast %189 : vector<1x8x384xf32> to vector<8x384xf32>
    %191 = vector.shape_cast %188 : vector<8x384xf32> to vector<1x8x384xf32>
    tpu.vector_store %arg6[%c4_163, %c56_164, %c0_165], %191 {strides = array<i32>} : memref<10x72x384xf32, #tpu.memory_space<vmem>>, vector<1x8x384xf32>,
    %c365_i32_166 = arith.constant 365 : i32
    %192 = tpu.dynamic_rotate %160 by %c365_i32_166 dim 1 : vector<8x384xf32>, i32 -> vector<8x384xf32>
    %c4_167 = arith.constant 4 : index
    %c64_168 = arith.constant 64 : index
    %c0_169 = arith.constant 0 : index
    %193 = vector.load %arg6[%c4_167, %c64_168, %c0_169] : memref<10x72x384xf32, #tpu.memory_space<vmem>>, vector<1x8x384xf32>
    %194 = vector.shape_cast %193 : vector<1x8x384xf32> to vector<8x384xf32>
    %195 = vector.shape_cast %192 : vector<8x384xf32> to vector<1x8x384xf32>
    tpu.vector_store %arg6[%c4_167, %c64_168, %c0_169], %195 {strides = array<i32>} : memref<10x72x384xf32, #tpu.memory_space<vmem>>, vector<1x8x384xf32>,
    %c5_i32 = arith.constant 5 : i32
    %196 = arith.addi %0, %c5_i32 : i32
    %c0_170 = arith.constant 0 : index
    %197 = arith.index_cast %196 : i32 to index
    %c0_171 = arith.constant 0 : index
    %c0_172 = arith.constant 0 : index
    %198 = vector.load %arg2[%c0_170, %197, %c0_171, %c0_172] : memref<1x18x8x384xf32, #tpu.memory_space<vmem>>, vector<1x1x8x384xf32>
    %199 = vector.shape_cast %198 : vector<1x1x8x384xf32> to vector<8x384xf32>
    %c19_i32_173 = arith.constant 19 : i32
    %200 = tpu.dynamic_rotate %199 by %c19_i32_173 dim 1 : vector<8x384xf32>, i32 -> vector<8x384xf32>
    %c5 = arith.constant 5 : index
    %c0_174 = arith.constant 0 : index
    %c0_175 = arith.constant 0 : index
    %201 = vector.load %arg6[%c5, %c0_174, %c0_175] : memref<10x72x384xf32, #tpu.memory_space<vmem>>, vector<1x8x384xf32>
    %202 = vector.shape_cast %201 : vector<1x8x384xf32> to vector<8x384xf32>
    %203 = vector.shape_cast %200 : vector<8x384xf32> to vector<1x8x384xf32>
    tpu.vector_store %arg6[%c5, %c0_174, %c0_175], %203 {strides = array<i32>} : memref<10x72x384xf32, #tpu.memory_space<vmem>>, vector<1x8x384xf32>,
    %c18_i32_176 = arith.constant 18 : i32
    %204 = tpu.dynamic_rotate %199 by %c18_i32_176 dim 1 : vector<8x384xf32>, i32 -> vector<8x384xf32>
    %c5_177 = arith.constant 5 : index
    %c8_178 = arith.constant 8 : index
    %c0_179 = arith.constant 0 : index
    %205 = vector.load %arg6[%c5_177, %c8_178, %c0_179] : memref<10x72x384xf32, #tpu.memory_space<vmem>>, vector<1x8x384xf32>
    %206 = vector.shape_cast %205 : vector<1x8x384xf32> to vector<8x384xf32>
    %207 = vector.shape_cast %204 : vector<8x384xf32> to vector<1x8x384xf32>
    tpu.vector_store %arg6[%c5_177, %c8_178, %c0_179], %207 {strides = array<i32>} : memref<10x72x384xf32, #tpu.memory_space<vmem>>, vector<1x8x384xf32>,
    %c17_i32_180 = arith.constant 17 : i32
    %208 = tpu.dynamic_rotate %199 by %c17_i32_180 dim 1 : vector<8x384xf32>, i32 -> vector<8x384xf32>
    %c5_181 = arith.constant 5 : index
    %c16_182 = arith.constant 16 : index
    %c0_183 = arith.constant 0 : index
    %209 = vector.load %arg6[%c5_181, %c16_182, %c0_183] : memref<10x72x384xf32, #tpu.memory_space<vmem>>, vector<1x8x384xf32>
    %210 = vector.shape_cast %209 : vector<1x8x384xf32> to vector<8x384xf32>
    %211 = vector.shape_cast %208 : vector<8x384xf32> to vector<1x8x384xf32>
    tpu.vector_store %arg6[%c5_181, %c16_182, %c0_183], %211 {strides = array<i32>} : memref<10x72x384xf32, #tpu.memory_space<vmem>>, vector<1x8x384xf32>,
    %c1_i32_184 = arith.constant 1 : i32
    %212 = tpu.dynamic_rotate %199 by %c1_i32_184 dim 1 : vector<8x384xf32>, i32 -> vector<8x384xf32>
    %c5_185 = arith.constant 5 : index
    %c24_186 = arith.constant 24 : index
    %c0_187 = arith.constant 0 : index
    %213 = vector.load %arg6[%c5_185, %c24_186, %c0_187] : memref<10x72x384xf32, #tpu.memory_space<vmem>>, vector<1x8x384xf32>
    %214 = vector.shape_cast %213 : vector<1x8x384xf32> to vector<8x384xf32>
    %215 = vector.shape_cast %212 : vector<8x384xf32> to vector<1x8x384xf32>
    tpu.vector_store %arg6[%c5_185, %c24_186, %c0_187], %215 {strides = array<i32>} : memref<10x72x384xf32, #tpu.memory_space<vmem>>, vector<1x8x384xf32>,
    %c5_188 = arith.constant 5 : index
    %c32_189 = arith.constant 32 : index
    %c0_190 = arith.constant 0 : index
    %216 = vector.load %arg6[%c5_188, %c32_189, %c0_190] : memref<10x72x384xf32, #tpu.memory_space<vmem>>, vector<1x8x384xf32>
    %217 = vector.shape_cast %216 : vector<1x8x384xf32> to vector<8x384xf32>
    %218 = vector.shape_cast %199 : vector<8x384xf32> to vector<1x8x384xf32>
    tpu.vector_store %arg6[%c5_188, %c32_189, %c0_190], %218 {strides = array<i32>} : memref<10x72x384xf32, #tpu.memory_space<vmem>>, vector<1x8x384xf32>,
    %c383_i32_191 = arith.constant 383 : i32
    %219 = tpu.dynamic_rotate %199 by %c383_i32_191 dim 1 : vector<8x384xf32>, i32 -> vector<8x384xf32>
    %c5_192 = arith.constant 5 : index
    %c40_193 = arith.constant 40 : index
    %c0_194 = arith.constant 0 : index
    %220 = vector.load %arg6[%c5_192, %c40_193, %c0_194] : memref<10x72x384xf32, #tpu.memory_space<vmem>>, vector<1x8x384xf32>
    %221 = vector.shape_cast %220 : vector<1x8x384xf32> to vector<8x384xf32>
    %222 = vector.shape_cast %219 : vector<8x384xf32> to vector<1x8x384xf32>
    tpu.vector_store %arg6[%c5_192, %c40_193, %c0_194], %222 {strides = array<i32>} : memref<10x72x384xf32, #tpu.memory_space<vmem>>, vector<1x8x384xf32>,
    %c367_i32_195 = arith.constant 367 : i32
    %223 = tpu.dynamic_rotate %199 by %c367_i32_195 dim 1 : vector<8x384xf32>, i32 -> vector<8x384xf32>
    %c5_196 = arith.constant 5 : index
    %c48_197 = arith.constant 48 : index
    %c0_198 = arith.constant 0 : index
    %224 = vector.load %arg6[%c5_196, %c48_197, %c0_198] : memref<10x72x384xf32, #tpu.memory_space<vmem>>, vector<1x8x384xf32>
    %225 = vector.shape_cast %224 : vector<1x8x384xf32> to vector<8x384xf32>
    %226 = vector.shape_cast %223 : vector<8x384xf32> to vector<1x8x384xf32>
    tpu.vector_store %arg6[%c5_196, %c48_197, %c0_198], %226 {strides = array<i32>} : memref<10x72x384xf32, #tpu.memory_space<vmem>>, vector<1x8x384xf32>,
    %c366_i32_199 = arith.constant 366 : i32
    %227 = tpu.dynamic_rotate %199 by %c366_i32_199 dim 1 : vector<8x384xf32>, i32 -> vector<8x384xf32>
    %c5_200 = arith.constant 5 : index
    %c56_201 = arith.constant 56 : index
    %c0_202 = arith.constant 0 : index
    %228 = vector.load %arg6[%c5_200, %c56_201, %c0_202] : memref<10x72x384xf32, #tpu.memory_space<vmem>>, vector<1x8x384xf32>
    %229 = vector.shape_cast %228 : vector<1x8x384xf32> to vector<8x384xf32>
    %230 = vector.shape_cast %227 : vector<8x384xf32> to vector<1x8x384xf32>
    tpu.vector_store %arg6[%c5_200, %c56_201, %c0_202], %230 {strides = array<i32>} : memref<10x72x384xf32, #tpu.memory_space<vmem>>, vector<1x8x384xf32>,
    %c365_i32_203 = arith.constant 365 : i32
    %231 = tpu.dynamic_rotate %199 by %c365_i32_203 dim 1 : vector<8x384xf32>, i32 -> vector<8x384xf32>
    %c5_204 = arith.constant 5 : index
    %c64_205 = arith.constant 64 : index
    %c0_206 = arith.constant 0 : index
    %232 = vector.load %arg6[%c5_204, %c64_205, %c0_206] : memref<10x72x384xf32, #tpu.memory_space<vmem>>, vector<1x8x384xf32>
    %233 = vector.shape_cast %232 : vector<1x8x384xf32> to vector<8x384xf32>
    %234 = vector.shape_cast %231 : vector<8x384xf32> to vector<1x8x384xf32>
    tpu.vector_store %arg6[%c5_204, %c64_205, %c0_206], %234 {strides = array<i32>} : memref<10x72x384xf32, #tpu.memory_space<vmem>>, vector<1x8x384xf32>,
    %c6_i32 = arith.constant 6 : i32
    %235 = arith.addi %0, %c6_i32 : i32
    %c0_207 = arith.constant 0 : index
    %236 = arith.index_cast %235 : i32 to index
    %c0_208 = arith.constant 0 : index
    %c0_209 = arith.constant 0 : index
    %237 = vector.load %arg2[%c0_207, %236, %c0_208, %c0_209] : memref<1x18x8x384xf32, #tpu.memory_space<vmem>>, vector<1x1x8x384xf32>
    %238 = vector.shape_cast %237 : vector<1x1x8x384xf32> to vector<8x384xf32>
    %c19_i32_210 = arith.constant 19 : i32
    %239 = tpu.dynamic_rotate %238 by %c19_i32_210 dim 1 : vector<8x384xf32>, i32 -> vector<8x384xf32>
    %c6 = arith.constant 6 : index
    %c0_211 = arith.constant 0 : index
    %c0_212 = arith.constant 0 : index
    %240 = vector.load %arg6[%c6, %c0_211, %c0_212] : memref<10x72x384xf32, #tpu.memory_space<vmem>>, vector<1x8x384xf32>
    %241 = vector.shape_cast %240 : vector<1x8x384xf32> to vector<8x384xf32>
    %242 = vector.shape_cast %239 : vector<8x384xf32> to vector<1x8x384xf32>
    tpu.vector_store %arg6[%c6, %c0_211, %c0_212], %242 {strides = array<i32>} : memref<10x72x384xf32, #tpu.memory_space<vmem>>, vector<1x8x384xf32>,
    %c18_i32_213 = arith.constant 18 : i32
    %243 = tpu.dynamic_rotate %238 by %c18_i32_213 dim 1 : vector<8x384xf32>, i32 -> vector<8x384xf32>
    %c6_214 = arith.constant 6 : index
    %c8_215 = arith.constant 8 : index
    %c0_216 = arith.constant 0 : index
    %244 = vector.load %arg6[%c6_214, %c8_215, %c0_216] : memref<10x72x384xf32, #tpu.memory_space<vmem>>, vector<1x8x384xf32>
    %245 = vector.shape_cast %244 : vector<1x8x384xf32> to vector<8x384xf32>
    %246 = vector.shape_cast %243 : vector<8x384xf32> to vector<1x8x384xf32>
    tpu.vector_store %arg6[%c6_214, %c8_215, %c0_216], %246 {strides = array<i32>} : memref<10x72x384xf32, #tpu.memory_space<vmem>>, vector<1x8x384xf32>,
    %c17_i32_217 = arith.constant 17 : i32
    %247 = tpu.dynamic_rotate %238 by %c17_i32_217 dim 1 : vector<8x384xf32>, i32 -> vector<8x384xf32>
    %c6_218 = arith.constant 6 : index
    %c16_219 = arith.constant 16 : index
    %c0_220 = arith.constant 0 : index
    %248 = vector.load %arg6[%c6_218, %c16_219, %c0_220] : memref<10x72x384xf32, #tpu.memory_space<vmem>>, vector<1x8x384xf32>
    %249 = vector.shape_cast %248 : vector<1x8x384xf32> to vector<8x384xf32>
    %250 = vector.shape_cast %247 : vector<8x384xf32> to vector<1x8x384xf32>
    tpu.vector_store %arg6[%c6_218, %c16_219, %c0_220], %250 {strides = array<i32>} : memref<10x72x384xf32, #tpu.memory_space<vmem>>, vector<1x8x384xf32>,
    %c1_i32_221 = arith.constant 1 : i32
    %251 = tpu.dynamic_rotate %238 by %c1_i32_221 dim 1 : vector<8x384xf32>, i32 -> vector<8x384xf32>
    %c6_222 = arith.constant 6 : index
    %c24_223 = arith.constant 24 : index
    %c0_224 = arith.constant 0 : index
    %252 = vector.load %arg6[%c6_222, %c24_223, %c0_224] : memref<10x72x384xf32, #tpu.memory_space<vmem>>, vector<1x8x384xf32>
    %253 = vector.shape_cast %252 : vector<1x8x384xf32> to vector<8x384xf32>
    %254 = vector.shape_cast %251 : vector<8x384xf32> to vector<1x8x384xf32>
    tpu.vector_store %arg6[%c6_222, %c24_223, %c0_224], %254 {strides = array<i32>} : memref<10x72x384xf32, #tpu.memory_space<vmem>>, vector<1x8x384xf32>,
    %c6_225 = arith.constant 6 : index
    %c32_226 = arith.constant 32 : index
    %c0_227 = arith.constant 0 : index
    %255 = vector.load %arg6[%c6_225, %c32_226, %c0_227] : memref<10x72x384xf32, #tpu.memory_space<vmem>>, vector<1x8x384xf32>
    %256 = vector.shape_cast %255 : vector<1x8x384xf32> to vector<8x384xf32>
    %257 = vector.shape_cast %238 : vector<8x384xf32> to vector<1x8x384xf32>
    tpu.vector_store %arg6[%c6_225, %c32_226, %c0_227], %257 {strides = array<i32>} : memref<10x72x384xf32, #tpu.memory_space<vmem>>, vector<1x8x384xf32>,
    %c383_i32_228 = arith.constant 383 : i32
    %258 = tpu.dynamic_rotate %238 by %c383_i32_228 dim 1 : vector<8x384xf32>, i32 -> vector<8x384xf32>
    %c6_229 = arith.constant 6 : index
    %c40_230 = arith.constant 40 : index
    %c0_231 = arith.constant 0 : index
    %259 = vector.load %arg6[%c6_229, %c40_230, %c0_231] : memref<10x72x384xf32, #tpu.memory_space<vmem>>, vector<1x8x384xf32>
    %260 = vector.shape_cast %259 : vector<1x8x384xf32> to vector<8x384xf32>
    %261 = vector.shape_cast %258 : vector<8x384xf32> to vector<1x8x384xf32>
    tpu.vector_store %arg6[%c6_229, %c40_230, %c0_231], %261 {strides = array<i32>} : memref<10x72x384xf32, #tpu.memory_space<vmem>>, vector<1x8x384xf32>,
    %c367_i32_232 = arith.constant 367 : i32
    %262 = tpu.dynamic_rotate %238 by %c367_i32_232 dim 1 : vector<8x384xf32>, i32 -> vector<8x384xf32>
    %c6_233 = arith.constant 6 : index
    %c48_234 = arith.constant 48 : index
    %c0_235 = arith.constant 0 : index
    %263 = vector.load %arg6[%c6_233, %c48_234, %c0_235] : memref<10x72x384xf32, #tpu.memory_space<vmem>>, vector<1x8x384xf32>
    %264 = vector.shape_cast %263 : vector<1x8x384xf32> to vector<8x384xf32>
    %265 = vector.shape_cast %262 : vector<8x384xf32> to vector<1x8x384xf32>
    tpu.vector_store %arg6[%c6_233, %c48_234, %c0_235], %265 {strides = array<i32>} : memref<10x72x384xf32, #tpu.memory_space<vmem>>, vector<1x8x384xf32>,
    %c366_i32_236 = arith.constant 366 : i32
    %266 = tpu.dynamic_rotate %238 by %c366_i32_236 dim 1 : vector<8x384xf32>, i32 -> vector<8x384xf32>
    %c6_237 = arith.constant 6 : index
    %c56_238 = arith.constant 56 : index
    %c0_239 = arith.constant 0 : index
    %267 = vector.load %arg6[%c6_237, %c56_238, %c0_239] : memref<10x72x384xf32, #tpu.memory_space<vmem>>, vector<1x8x384xf32>
    %268 = vector.shape_cast %267 : vector<1x8x384xf32> to vector<8x384xf32>
    %269 = vector.shape_cast %266 : vector<8x384xf32> to vector<1x8x384xf32>
    tpu.vector_store %arg6[%c6_237, %c56_238, %c0_239], %269 {strides = array<i32>} : memref<10x72x384xf32, #tpu.memory_space<vmem>>, vector<1x8x384xf32>,
    %c365_i32_240 = arith.constant 365 : i32
    %270 = tpu.dynamic_rotate %238 by %c365_i32_240 dim 1 : vector<8x384xf32>, i32 -> vector<8x384xf32>
    %c6_241 = arith.constant 6 : index
    %c64_242 = arith.constant 64 : index
    %c0_243 = arith.constant 0 : index
    %271 = vector.load %arg6[%c6_241, %c64_242, %c0_243] : memref<10x72x384xf32, #tpu.memory_space<vmem>>, vector<1x8x384xf32>
    %272 = vector.shape_cast %271 : vector<1x8x384xf32> to vector<8x384xf32>
    %273 = vector.shape_cast %270 : vector<8x384xf32> to vector<1x8x384xf32>
    tpu.vector_store %arg6[%c6_241, %c64_242, %c0_243], %273 {strides = array<i32>} : memref<10x72x384xf32, #tpu.memory_space<vmem>>, vector<1x8x384xf32>,
    %c7_i32 = arith.constant 7 : i32
    %274 = arith.addi %0, %c7_i32 : i32
    %c0_244 = arith.constant 0 : index
    %275 = arith.index_cast %274 : i32 to index
    %c0_245 = arith.constant 0 : index
    %c0_246 = arith.constant 0 : index
    %276 = vector.load %arg2[%c0_244, %275, %c0_245, %c0_246] : memref<1x18x8x384xf32, #tpu.memory_space<vmem>>, vector<1x1x8x384xf32>
    %277 = vector.shape_cast %276 : vector<1x1x8x384xf32> to vector<8x384xf32>
    %c19_i32_247 = arith.constant 19 : i32
    %278 = tpu.dynamic_rotate %277 by %c19_i32_247 dim 1 : vector<8x384xf32>, i32 -> vector<8x384xf32>
    %c7 = arith.constant 7 : index
    %c0_248 = arith.constant 0 : index
    %c0_249 = arith.constant 0 : index
    %279 = vector.load %arg6[%c7, %c0_248, %c0_249] : memref<10x72x384xf32, #tpu.memory_space<vmem>>, vector<1x8x384xf32>
    %280 = vector.shape_cast %279 : vector<1x8x384xf32> to vector<8x384xf32>
    %281 = vector.shape_cast %278 : vector<8x384xf32> to vector<1x8x384xf32>
    tpu.vector_store %arg6[%c7, %c0_248, %c0_249], %281 {strides = array<i32>} : memref<10x72x384xf32, #tpu.memory_space<vmem>>, vector<1x8x384xf32>,
    %c18_i32_250 = arith.constant 18 : i32
    %282 = tpu.dynamic_rotate %277 by %c18_i32_250 dim 1 : vector<8x384xf32>, i32 -> vector<8x384xf32>
    %c7_251 = arith.constant 7 : index
    %c8_252 = arith.constant 8 : index
    %c0_253 = arith.constant 0 : index
    %283 = vector.load %arg6[%c7_251, %c8_252, %c0_253] : memref<10x72x384xf32, #tpu.memory_space<vmem>>, vector<1x8x384xf32>
    %284 = vector.shape_cast %283 : vector<1x8x384xf32> to vector<8x384xf32>
    %285 = vector.shape_cast %282 : vector<8x384xf32> to vector<1x8x384xf32>
    tpu.vector_store %arg6[%c7_251, %c8_252, %c0_253], %285 {strides = array<i32>} : memref<10x72x384xf32, #tpu.memory_space<vmem>>, vector<1x8x384xf32>,
    %c17_i32_254 = arith.constant 17 : i32
    %286 = tpu.dynamic_rotate %277 by %c17_i32_254 dim 1 : vector<8x384xf32>, i32 -> vector<8x384xf32>
    %c7_255 = arith.constant 7 : index
    %c16_256 = arith.constant 16 : index
    %c0_257 = arith.constant 0 : index
    %287 = vector.load %arg6[%c7_255, %c16_256, %c0_257] : memref<10x72x384xf32, #tpu.memory_space<vmem>>, vector<1x8x384xf32>
    %288 = vector.shape_cast %287 : vector<1x8x384xf32> to vector<8x384xf32>
    %289 = vector.shape_cast %286 : vector<8x384xf32> to vector<1x8x384xf32>
    tpu.vector_store %arg6[%c7_255, %c16_256, %c0_257], %289 {strides = array<i32>} : memref<10x72x384xf32, #tpu.memory_space<vmem>>, vector<1x8x384xf32>,
    %c1_i32_258 = arith.constant 1 : i32
    %290 = tpu.dynamic_rotate %277 by %c1_i32_258 dim 1 : vector<8x384xf32>, i32 -> vector<8x384xf32>
    %c7_259 = arith.constant 7 : index
    %c24_260 = arith.constant 24 : index
    %c0_261 = arith.constant 0 : index
    %291 = vector.load %arg6[%c7_259, %c24_260, %c0_261] : memref<10x72x384xf32, #tpu.memory_space<vmem>>, vector<1x8x384xf32>
    %292 = vector.shape_cast %291 : vector<1x8x384xf32> to vector<8x384xf32>
    %293 = vector.shape_cast %290 : vector<8x384xf32> to vector<1x8x384xf32>
    tpu.vector_store %arg6[%c7_259, %c24_260, %c0_261], %293 {strides = array<i32>} : memref<10x72x384xf32, #tpu.memory_space<vmem>>, vector<1x8x384xf32>,
    %c7_262 = arith.constant 7 : index
    %c32_263 = arith.constant 32 : index
    %c0_264 = arith.constant 0 : index
    %294 = vector.load %arg6[%c7_262, %c32_263, %c0_264] : memref<10x72x384xf32, #tpu.memory_space<vmem>>, vector<1x8x384xf32>
    %295 = vector.shape_cast %294 : vector<1x8x384xf32> to vector<8x384xf32>
    %296 = vector.shape_cast %277 : vector<8x384xf32> to vector<1x8x384xf32>
    tpu.vector_store %arg6[%c7_262, %c32_263, %c0_264], %296 {strides = array<i32>} : memref<10x72x384xf32, #tpu.memory_space<vmem>>, vector<1x8x384xf32>,
    %c383_i32_265 = arith.constant 383 : i32
    %297 = tpu.dynamic_rotate %277 by %c383_i32_265 dim 1 : vector<8x384xf32>, i32 -> vector<8x384xf32>
    %c7_266 = arith.constant 7 : index
    %c40_267 = arith.constant 40 : index
    %c0_268 = arith.constant 0 : index
    %298 = vector.load %arg6[%c7_266, %c40_267, %c0_268] : memref<10x72x384xf32, #tpu.memory_space<vmem>>, vector<1x8x384xf32>
    %299 = vector.shape_cast %298 : vector<1x8x384xf32> to vector<8x384xf32>
    %300 = vector.shape_cast %297 : vector<8x384xf32> to vector<1x8x384xf32>
    tpu.vector_store %arg6[%c7_266, %c40_267, %c0_268], %300 {strides = array<i32>} : memref<10x72x384xf32, #tpu.memory_space<vmem>>, vector<1x8x384xf32>,
    %c367_i32_269 = arith.constant 367 : i32
    %301 = tpu.dynamic_rotate %277 by %c367_i32_269 dim 1 : vector<8x384xf32>, i32 -> vector<8x384xf32>
    %c7_270 = arith.constant 7 : index
    %c48_271 = arith.constant 48 : index
    %c0_272 = arith.constant 0 : index
    %302 = vector.load %arg6[%c7_270, %c48_271, %c0_272] : memref<10x72x384xf32, #tpu.memory_space<vmem>>, vector<1x8x384xf32>
    %303 = vector.shape_cast %302 : vector<1x8x384xf32> to vector<8x384xf32>
    %304 = vector.shape_cast %301 : vector<8x384xf32> to vector<1x8x384xf32>
    tpu.vector_store %arg6[%c7_270, %c48_271, %c0_272], %304 {strides = array<i32>} : memref<10x72x384xf32, #tpu.memory_space<vmem>>, vector<1x8x384xf32>,
    %c366_i32_273 = arith.constant 366 : i32
    %305 = tpu.dynamic_rotate %277 by %c366_i32_273 dim 1 : vector<8x384xf32>, i32 -> vector<8x384xf32>
    %c7_274 = arith.constant 7 : index
    %c56_275 = arith.constant 56 : index
    %c0_276 = arith.constant 0 : index
    %306 = vector.load %arg6[%c7_274, %c56_275, %c0_276] : memref<10x72x384xf32, #tpu.memory_space<vmem>>, vector<1x8x384xf32>
    %307 = vector.shape_cast %306 : vector<1x8x384xf32> to vector<8x384xf32>
    %308 = vector.shape_cast %305 : vector<8x384xf32> to vector<1x8x384xf32>
    tpu.vector_store %arg6[%c7_274, %c56_275, %c0_276], %308 {strides = array<i32>} : memref<10x72x384xf32, #tpu.memory_space<vmem>>, vector<1x8x384xf32>,
    %c365_i32_277 = arith.constant 365 : i32
    %309 = tpu.dynamic_rotate %277 by %c365_i32_277 dim 1 : vector<8x384xf32>, i32 -> vector<8x384xf32>
    %c7_278 = arith.constant 7 : index
    %c64_279 = arith.constant 64 : index
    %c0_280 = arith.constant 0 : index
    %310 = vector.load %arg6[%c7_278, %c64_279, %c0_280] : memref<10x72x384xf32, #tpu.memory_space<vmem>>, vector<1x8x384xf32>
    %311 = vector.shape_cast %310 : vector<1x8x384xf32> to vector<8x384xf32>
    %312 = vector.shape_cast %309 : vector<8x384xf32> to vector<1x8x384xf32>
    tpu.vector_store %arg6[%c7_278, %c64_279, %c0_280], %312 {strides = array<i32>} : memref<10x72x384xf32, #tpu.memory_space<vmem>>, vector<1x8x384xf32>,
    %c8_i32_281 = arith.constant 8 : i32
    %313 = arith.addi %0, %c8_i32_281 : i32
    %c0_282 = arith.constant 0 : index
    %314 = arith.index_cast %313 : i32 to index
    %c0_283 = arith.constant 0 : index
    %c0_284 = arith.constant 0 : index
    %315 = vector.load %arg2[%c0_282, %314, %c0_283, %c0_284] : memref<1x18x8x384xf32, #tpu.memory_space<vmem>>, vector<1x1x8x384xf32>
    %316 = vector.shape_cast %315 : vector<1x1x8x384xf32> to vector<8x384xf32>
    %c19_i32_285 = arith.constant 19 : i32
    %317 = tpu.dynamic_rotate %316 by %c19_i32_285 dim 1 : vector<8x384xf32>, i32 -> vector<8x384xf32>
    %c8_286 = arith.constant 8 : index
    %c0_287 = arith.constant 0 : index
    %c0_288 = arith.constant 0 : index
    %318 = vector.load %arg6[%c8_286, %c0_287, %c0_288] : memref<10x72x384xf32, #tpu.memory_space<vmem>>, vector<1x8x384xf32>
    %319 = vector.shape_cast %318 : vector<1x8x384xf32> to vector<8x384xf32>
    %320 = vector.shape_cast %317 : vector<8x384xf32> to vector<1x8x384xf32>
    tpu.vector_store %arg6[%c8_286, %c0_287, %c0_288], %320 {strides = array<i32>} : memref<10x72x384xf32, #tpu.memory_space<vmem>>, vector<1x8x384xf32>,
    %c18_i32_289 = arith.constant 18 : i32
    %321 = tpu.dynamic_rotate %316 by %c18_i32_289 dim 1 : vector<8x384xf32>, i32 -> vector<8x384xf32>
    %c8_290 = arith.constant 8 : index
    %c8_291 = arith.constant 8 : index
    %c0_292 = arith.constant 0 : index
    %322 = vector.load %arg6[%c8_290, %c8_291, %c0_292] : memref<10x72x384xf32, #tpu.memory_space<vmem>>, vector<1x8x384xf32>
    %323 = vector.shape_cast %322 : vector<1x8x384xf32> to vector<8x384xf32>
    %324 = vector.shape_cast %321 : vector<8x384xf32> to vector<1x8x384xf32>
    tpu.vector_store %arg6[%c8_290, %c8_291, %c0_292], %324 {strides = array<i32>} : memref<10x72x384xf32, #tpu.memory_space<vmem>>, vector<1x8x384xf32>,
    %c17_i32_293 = arith.constant 17 : i32
    %325 = tpu.dynamic_rotate %316 by %c17_i32_293 dim 1 : vector<8x384xf32>, i32 -> vector<8x384xf32>
    %c8_294 = arith.constant 8 : index
    %c16_295 = arith.constant 16 : index
    %c0_296 = arith.constant 0 : index
    %326 = vector.load %arg6[%c8_294, %c16_295, %c0_296] : memref<10x72x384xf32, #tpu.memory_space<vmem>>, vector<1x8x384xf32>
    %327 = vector.shape_cast %326 : vector<1x8x384xf32> to vector<8x384xf32>
    %328 = vector.shape_cast %325 : vector<8x384xf32> to vector<1x8x384xf32>
    tpu.vector_store %arg6[%c8_294, %c16_295, %c0_296], %328 {strides = array<i32>} : memref<10x72x384xf32, #tpu.memory_space<vmem>>, vector<1x8x384xf32>,
    %c1_i32_297 = arith.constant 1 : i32
    %329 = tpu.dynamic_rotate %316 by %c1_i32_297 dim 1 : vector<8x384xf32>, i32 -> vector<8x384xf32>
    %c8_298 = arith.constant 8 : index
    %c24_299 = arith.constant 24 : index
    %c0_300 = arith.constant 0 : index
    %330 = vector.load %arg6[%c8_298, %c24_299, %c0_300] : memref<10x72x384xf32, #tpu.memory_space<vmem>>, vector<1x8x384xf32>
    %331 = vector.shape_cast %330 : vector<1x8x384xf32> to vector<8x384xf32>
    %332 = vector.shape_cast %329 : vector<8x384xf32> to vector<1x8x384xf32>
    tpu.vector_store %arg6[%c8_298, %c24_299, %c0_300], %332 {strides = array<i32>} : memref<10x72x384xf32, #tpu.memory_space<vmem>>, vector<1x8x384xf32>,
    %c8_301 = arith.constant 8 : index
    %c32_302 = arith.constant 32 : index
    %c0_303 = arith.constant 0 : index
    %333 = vector.load %arg6[%c8_301, %c32_302, %c0_303] : memref<10x72x384xf32, #tpu.memory_space<vmem>>, vector<1x8x384xf32>
    %334 = vector.shape_cast %333 : vector<1x8x384xf32> to vector<8x384xf32>
    %335 = vector.shape_cast %316 : vector<8x384xf32> to vector<1x8x384xf32>
    tpu.vector_store %arg6[%c8_301, %c32_302, %c0_303], %335 {strides = array<i32>} : memref<10x72x384xf32, #tpu.memory_space<vmem>>, vector<1x8x384xf32>,
    %c383_i32_304 = arith.constant 383 : i32
    %336 = tpu.dynamic_rotate %316 by %c383_i32_304 dim 1 : vector<8x384xf32>, i32 -> vector<8x384xf32>
    %c8_305 = arith.constant 8 : index
    %c40_306 = arith.constant 40 : index
    %c0_307 = arith.constant 0 : index
    %337 = vector.load %arg6[%c8_305, %c40_306, %c0_307] : memref<10x72x384xf32, #tpu.memory_space<vmem>>, vector<1x8x384xf32>
    %338 = vector.shape_cast %337 : vector<1x8x384xf32> to vector<8x384xf32>
    %339 = vector.shape_cast %336 : vector<8x384xf32> to vector<1x8x384xf32>
    tpu.vector_store %arg6[%c8_305, %c40_306, %c0_307], %339 {strides = array<i32>} : memref<10x72x384xf32, #tpu.memory_space<vmem>>, vector<1x8x384xf32>,
    %c367_i32_308 = arith.constant 367 : i32
    %340 = tpu.dynamic_rotate %316 by %c367_i32_308 dim 1 : vector<8x384xf32>, i32 -> vector<8x384xf32>
    %c8_309 = arith.constant 8 : index
    %c48_310 = arith.constant 48 : index
    %c0_311 = arith.constant 0 : index
    %341 = vector.load %arg6[%c8_309, %c48_310, %c0_311] : memref<10x72x384xf32, #tpu.memory_space<vmem>>, vector<1x8x384xf32>
    %342 = vector.shape_cast %341 : vector<1x8x384xf32> to vector<8x384xf32>
    %343 = vector.shape_cast %340 : vector<8x384xf32> to vector<1x8x384xf32>
    tpu.vector_store %arg6[%c8_309, %c48_310, %c0_311], %343 {strides = array<i32>} : memref<10x72x384xf32, #tpu.memory_space<vmem>>, vector<1x8x384xf32>,
    %c366_i32_312 = arith.constant 366 : i32
    %344 = tpu.dynamic_rotate %316 by %c366_i32_312 dim 1 : vector<8x384xf32>, i32 -> vector<8x384xf32>
    %c8_313 = arith.constant 8 : index
    %c56_314 = arith.constant 56 : index
    %c0_315 = arith.constant 0 : index
    %345 = vector.load %arg6[%c8_313, %c56_314, %c0_315] : memref<10x72x384xf32, #tpu.memory_space<vmem>>, vector<1x8x384xf32>
    %346 = vector.shape_cast %345 : vector<1x8x384xf32> to vector<8x384xf32>
    %347 = vector.shape_cast %344 : vector<8x384xf32> to vector<1x8x384xf32>
    tpu.vector_store %arg6[%c8_313, %c56_314, %c0_315], %347 {strides = array<i32>} : memref<10x72x384xf32, #tpu.memory_space<vmem>>, vector<1x8x384xf32>,
    %c365_i32_316 = arith.constant 365 : i32
    %348 = tpu.dynamic_rotate %316 by %c365_i32_316 dim 1 : vector<8x384xf32>, i32 -> vector<8x384xf32>
    %c8_317 = arith.constant 8 : index
    %c64_318 = arith.constant 64 : index
    %c0_319 = arith.constant 0 : index
    %349 = vector.load %arg6[%c8_317, %c64_318, %c0_319] : memref<10x72x384xf32, #tpu.memory_space<vmem>>, vector<1x8x384xf32>
    %350 = vector.shape_cast %349 : vector<1x8x384xf32> to vector<8x384xf32>
    %351 = vector.shape_cast %348 : vector<8x384xf32> to vector<1x8x384xf32>
    tpu.vector_store %arg6[%c8_317, %c64_318, %c0_319], %351 {strides = array<i32>} : memref<10x72x384xf32, #tpu.memory_space<vmem>>, vector<1x8x384xf32>,
    %c9_i32 = arith.constant 9 : i32
    %352 = arith.addi %0, %c9_i32 : i32
    %c0_320 = arith.constant 0 : index
    %353 = arith.index_cast %352 : i32 to index
    %c0_321 = arith.constant 0 : index
    %c0_322 = arith.constant 0 : index
    %354 = vector.load %arg2[%c0_320, %353, %c0_321, %c0_322] : memref<1x18x8x384xf32, #tpu.memory_space<vmem>>, vector<1x1x8x384xf32>
    %355 = vector.shape_cast %354 : vector<1x1x8x384xf32> to vector<8x384xf32>
    %c19_i32_323 = arith.constant 19 : i32
    %356 = tpu.dynamic_rotate %355 by %c19_i32_323 dim 1 : vector<8x384xf32>, i32 -> vector<8x384xf32>
    %c9 = arith.constant 9 : index
    %c0_324 = arith.constant 0 : index
    %c0_325 = arith.constant 0 : index
    %357 = vector.load %arg6[%c9, %c0_324, %c0_325] : memref<10x72x384xf32, #tpu.memory_space<vmem>>, vector<1x8x384xf32>
    %358 = vector.shape_cast %357 : vector<1x8x384xf32> to vector<8x384xf32>
    %359 = vector.shape_cast %356 : vector<8x384xf32> to vector<1x8x384xf32>
    tpu.vector_store %arg6[%c9, %c0_324, %c0_325], %359 {strides = array<i32>} : memref<10x72x384xf32, #tpu.memory_space<vmem>>, vector<1x8x384xf32>,
    %c18_i32_326 = arith.constant 18 : i32
    %360 = tpu.dynamic_rotate %355 by %c18_i32_326 dim 1 : vector<8x384xf32>, i32 -> vector<8x384xf32>
    %c9_327 = arith.constant 9 : index
    %c8_328 = arith.constant 8 : index
    %c0_329 = arith.constant 0 : index
    %361 = vector.load %arg6[%c9_327, %c8_328, %c0_329] : memref<10x72x384xf32, #tpu.memory_space<vmem>>, vector<1x8x384xf32>
    %362 = vector.shape_cast %361 : vector<1x8x384xf32> to vector<8x384xf32>
    %363 = vector.shape_cast %360 : vector<8x384xf32> to vector<1x8x384xf32>
    tpu.vector_store %arg6[%c9_327, %c8_328, %c0_329], %363 {strides = array<i32>} : memref<10x72x384xf32, #tpu.memory_space<vmem>>, vector<1x8x384xf32>,
    %c17_i32_330 = arith.constant 17 : i32
    %364 = tpu.dynamic_rotate %355 by %c17_i32_330 dim 1 : vector<8x384xf32>, i32 -> vector<8x384xf32>
    %c9_331 = arith.constant 9 : index
    %c16_332 = arith.constant 16 : index
    %c0_333 = arith.constant 0 : index
    %365 = vector.load %arg6[%c9_331, %c16_332, %c0_333] : memref<10x72x384xf32, #tpu.memory_space<vmem>>, vector<1x8x384xf32>
    %366 = vector.shape_cast %365 : vector<1x8x384xf32> to vector<8x384xf32>
    %367 = vector.shape_cast %364 : vector<8x384xf32> to vector<1x8x384xf32>
    tpu.vector_store %arg6[%c9_331, %c16_332, %c0_333], %367 {strides = array<i32>} : memref<10x72x384xf32, #tpu.memory_space<vmem>>, vector<1x8x384xf32>,
    %c1_i32_334 = arith.constant 1 : i32
    %368 = tpu.dynamic_rotate %355 by %c1_i32_334 dim 1 : vector<8x384xf32>, i32 -> vector<8x384xf32>
    %c9_335 = arith.constant 9 : index
    %c24_336 = arith.constant 24 : index
    %c0_337 = arith.constant 0 : index
    %369 = vector.load %arg6[%c9_335, %c24_336, %c0_337] : memref<10x72x384xf32, #tpu.memory_space<vmem>>, vector<1x8x384xf32>
    %370 = vector.shape_cast %369 : vector<1x8x384xf32> to vector<8x384xf32>
    %371 = vector.shape_cast %368 : vector<8x384xf32> to vector<1x8x384xf32>
    tpu.vector_store %arg6[%c9_335, %c24_336, %c0_337], %371 {strides = array<i32>} : memref<10x72x384xf32, #tpu.memory_space<vmem>>, vector<1x8x384xf32>,
    %c9_338 = arith.constant 9 : index
    %c32_339 = arith.constant 32 : index
    %c0_340 = arith.constant 0 : index
    %372 = vector.load %arg6[%c9_338, %c32_339, %c0_340] : memref<10x72x384xf32, #tpu.memory_space<vmem>>, vector<1x8x384xf32>
    %373 = vector.shape_cast %372 : vector<1x8x384xf32> to vector<8x384xf32>
    %374 = vector.shape_cast %355 : vector<8x384xf32> to vector<1x8x384xf32>
    tpu.vector_store %arg6[%c9_338, %c32_339, %c0_340], %374 {strides = array<i32>} : memref<10x72x384xf32, #tpu.memory_space<vmem>>, vector<1x8x384xf32>,
    %c383_i32_341 = arith.constant 383 : i32
    %375 = tpu.dynamic_rotate %355 by %c383_i32_341 dim 1 : vector<8x384xf32>, i32 -> vector<8x384xf32>
    %c9_342 = arith.constant 9 : index
    %c40_343 = arith.constant 40 : index
    %c0_344 = arith.constant 0 : index
    %376 = vector.load %arg6[%c9_342, %c40_343, %c0_344] : memref<10x72x384xf32, #tpu.memory_space<vmem>>, vector<1x8x384xf32>
    %377 = vector.shape_cast %376 : vector<1x8x384xf32> to vector<8x384xf32>
    %378 = vector.shape_cast %375 : vector<8x384xf32> to vector<1x8x384xf32>
    tpu.vector_store %arg6[%c9_342, %c40_343, %c0_344], %378 {strides = array<i32>} : memref<10x72x384xf32, #tpu.memory_space<vmem>>, vector<1x8x384xf32>,
    %c367_i32_345 = arith.constant 367 : i32
    %379 = tpu.dynamic_rotate %355 by %c367_i32_345 dim 1 : vector<8x384xf32>, i32 -> vector<8x384xf32>
    %c9_346 = arith.constant 9 : index
    %c48_347 = arith.constant 48 : index
    %c0_348 = arith.constant 0 : index
    %380 = vector.load %arg6[%c9_346, %c48_347, %c0_348] : memref<10x72x384xf32, #tpu.memory_space<vmem>>, vector<1x8x384xf32>
    %381 = vector.shape_cast %380 : vector<1x8x384xf32> to vector<8x384xf32>
    %382 = vector.shape_cast %379 : vector<8x384xf32> to vector<1x8x384xf32>
    tpu.vector_store %arg6[%c9_346, %c48_347, %c0_348], %382 {strides = array<i32>} : memref<10x72x384xf32, #tpu.memory_space<vmem>>, vector<1x8x384xf32>,
    %c366_i32_349 = arith.constant 366 : i32
    %383 = tpu.dynamic_rotate %355 by %c366_i32_349 dim 1 : vector<8x384xf32>, i32 -> vector<8x384xf32>
    %c9_350 = arith.constant 9 : index
    %c56_351 = arith.constant 56 : index
    %c0_352 = arith.constant 0 : index
    %384 = vector.load %arg6[%c9_350, %c56_351, %c0_352] : memref<10x72x384xf32, #tpu.memory_space<vmem>>, vector<1x8x384xf32>
    %385 = vector.shape_cast %384 : vector<1x8x384xf32> to vector<8x384xf32>
    %386 = vector.shape_cast %383 : vector<8x384xf32> to vector<1x8x384xf32>
    tpu.vector_store %arg6[%c9_350, %c56_351, %c0_352], %386 {strides = array<i32>} : memref<10x72x384xf32, #tpu.memory_space<vmem>>, vector<1x8x384xf32>,
    %c365_i32_353 = arith.constant 365 : i32
    %387 = tpu.dynamic_rotate %355 by %c365_i32_353 dim 1 : vector<8x384xf32>, i32 -> vector<8x384xf32>
    %c9_354 = arith.constant 9 : index
    %c64_355 = arith.constant 64 : index
    %c0_356 = arith.constant 0 : index
    %388 = vector.load %arg6[%c9_354, %c64_355, %c0_356] : memref<10x72x384xf32, #tpu.memory_space<vmem>>, vector<1x8x384xf32>
    %389 = vector.shape_cast %388 : vector<1x8x384xf32> to vector<8x384xf32>
    %390 = vector.shape_cast %387 : vector<8x384xf32> to vector<1x8x384xf32>
    tpu.vector_store %arg6[%c9_354, %c64_355, %c0_356], %390 {strides = array<i32>} : memref<10x72x384xf32, #tpu.memory_space<vmem>>, vector<1x8x384xf32>,
    %c0_357 = arith.constant 0 : index
    %c0_358 = arith.constant 0 : index
    %c0_359 = arith.constant 0 : index
    %391 = vector.load %arg3[%c0_357, %c0_358, %c0_359] : memref<3x8x72xf32, #tpu.memory_space<vmem>>, vector<1x8x72xf32>
    %392 = vector.shape_cast %391 : vector<1x8x72xf32> to vector<8x72xf32>
    %c1_360 = arith.constant 1 : index
    %c0_361 = arith.constant 0 : index
    %c0_362 = arith.constant 0 : index
    %393 = vector.load %arg3[%c1_360, %c0_361, %c0_362] : memref<3x8x72xf32, #tpu.memory_space<vmem>>, vector<1x8x72xf32>
    %394 = vector.shape_cast %393 : vector<1x8x72xf32> to vector<8x72xf32>
    %c2_363 = arith.constant 2 : index
    %c0_364 = arith.constant 0 : index
    %c0_365 = arith.constant 0 : index
    %395 = vector.load %arg3[%c2_363, %c0_364, %c0_365] : memref<3x8x72xf32, #tpu.memory_space<vmem>>, vector<1x8x72xf32>
    %396 = vector.shape_cast %395 : vector<1x8x72xf32> to vector<8x72xf32>
    %c0_366 = arith.constant 0 : index
    %c0_367 = arith.constant 0 : index
    %397 = vector.load %arg4[%c0_366, %c0_367] : memref<8x1xf32, #tpu.memory_space<vmem>>, vector<8x1xf32>
    %c0_368 = arith.constant 0 : index
    %c0_369 = arith.constant 0 : index
    %c0_370 = arith.constant 0 : index
    %398 = vector.load %arg6[%c0_368, %c0_369, %c0_370] : memref<10x72x384xf32, #tpu.memory_space<vmem>>, vector<1x72x384xf32>
    %399 = vector.shape_cast %398 : vector<1x72x384xf32> to vector<72x384xf32>
    %cst = arith.constant dense<0.000000e+00> : vector<8x384xf32>
    %400 = tpu.matmul %392, %399, %cst {dimension_numbers = #tpu.dot_dimension_numbers<[1], [0], [0], [1], [0, 0, 1, 1], [], []>} : vector<8x72xf32>, vector<72x384xf32>, vector<8x384xf32> -> vector<8x384xf32>
    %c1_371 = arith.constant 1 : index
    %c0_372 = arith.constant 0 : index
    %c0_373 = arith.constant 0 : index
    %401 = vector.load %arg6[%c1_371, %c0_372, %c0_373] : memref<10x72x384xf32, #tpu.memory_space<vmem>>, vector<1x72x384xf32>
    %402 = vector.shape_cast %401 : vector<1x72x384xf32> to vector<72x384xf32>
    %cst_374 = arith.constant dense<0.000000e+00> : vector<8x384xf32>
    %403 = tpu.matmul %394, %402, %cst_374 {dimension_numbers = #tpu.dot_dimension_numbers<[1], [0], [0], [1], [0, 0, 1, 1], [], []>} : vector<8x72xf32>, vector<72x384xf32>, vector<8x384xf32> -> vector<8x384xf32>
    %404 = arith.addf %400, %403 : vector<8x384xf32>
    %c2_375 = arith.constant 2 : index
    %c0_376 = arith.constant 0 : index
    %c0_377 = arith.constant 0 : index
    %405 = vector.load %arg6[%c2_375, %c0_376, %c0_377] : memref<10x72x384xf32, #tpu.memory_space<vmem>>, vector<1x72x384xf32>
    %406 = vector.shape_cast %405 : vector<1x72x384xf32> to vector<72x384xf32>
    %cst_378 = arith.constant dense<0.000000e+00> : vector<8x384xf32>
    %407 = tpu.matmul %396, %406, %cst_378 {dimension_numbers = #tpu.dot_dimension_numbers<[1], [0], [0], [1], [0, 0, 1, 1], [], []>} : vector<8x72xf32>, vector<72x384xf32>, vector<8x384xf32> -> vector<8x384xf32>
    %408 = arith.addf %404, %407 : vector<8x384xf32>
    %409 = vector.broadcast %397 : vector<8x1xf32> to vector<8x384xf32>
    %410 = arith.addf %408, %409 : vector<8x384xf32>
    %cst_379 = arith.constant 0.000000e+00 : f32
    %411 = vector.broadcast %cst_379 : f32 to vector<8x384xf32>
    %412 = arith.maximumf %410, %411 : vector<8x384xf32>
    %c0_380 = arith.constant 0 : index
    %c0_381 = arith.constant 0 : index
    %c0_382 = arith.constant 0 : index
    %413 = vector.load %arg5[%c0_380, %c0_381, %c0_382] : memref<1x8x3072xf32, #tpu.memory_space<vmem>>, vector<1x8x384xf32>
    %414 = vector.shape_cast %413 : vector<1x8x384xf32> to vector<8x384xf32>
    %415 = vector.shape_cast %412 : vector<8x384xf32> to vector<1x8x384xf32>
    tpu.vector_store %arg5[%c0_380, %c0_381, %c0_382], %415 {strides = array<i32>} : memref<1x8x3072xf32, #tpu.memory_space<vmem>>, vector<1x8x384xf32>,
    %c1_383 = arith.constant 1 : index
    %c0_384 = arith.constant 0 : index
    %c0_385 = arith.constant 0 : index
    %416 = vector.load %arg6[%c1_383, %c0_384, %c0_385] : memref<10x72x384xf32, #tpu.memory_space<vmem>>, vector<1x72x384xf32>
    %417 = vector.shape_cast %416 : vector<1x72x384xf32> to vector<72x384xf32>
    %cst_386 = arith.constant dense<0.000000e+00> : vector<8x384xf32>
    %418 = tpu.matmul %392, %417, %cst_386 {dimension_numbers = #tpu.dot_dimension_numbers<[1], [0], [0], [1], [0, 0, 1, 1], [], []>} : vector<8x72xf32>, vector<72x384xf32>, vector<8x384xf32> -> vector<8x384xf32>
    %c2_387 = arith.constant 2 : index
    %c0_388 = arith.constant 0 : index
    %c0_389 = arith.constant 0 : index
    %419 = vector.load %arg6[%c2_387, %c0_388, %c0_389] : memref<10x72x384xf32, #tpu.memory_space<vmem>>, vector<1x72x384xf32>
    %420 = vector.shape_cast %419 : vector<1x72x384xf32> to vector<72x384xf32>
    %cst_390 = arith.constant dense<0.000000e+00> : vector<8x384xf32>
    %421 = tpu.matmul %394, %420, %cst_390 {dimension_numbers = #tpu.dot_dimension_numbers<[1], [0], [0], [1], [0, 0, 1, 1], [], []>} : vector<8x72xf32>, vector<72x384xf32>, vector<8x384xf32> -> vector<8x384xf32>
    %422 = arith.addf %418, %421 : vector<8x384xf32>
    %c3_391 = arith.constant 3 : index
    %c0_392 = arith.constant 0 : index
    %c0_393 = arith.constant 0 : index
    %423 = vector.load %arg6[%c3_391, %c0_392, %c0_393] : memref<10x72x384xf32, #tpu.memory_space<vmem>>, vector<1x72x384xf32>
    %424 = vector.shape_cast %423 : vector<1x72x384xf32> to vector<72x384xf32>
    %cst_394 = arith.constant dense<0.000000e+00> : vector<8x384xf32>
    %425 = tpu.matmul %396, %424, %cst_394 {dimension_numbers = #tpu.dot_dimension_numbers<[1], [0], [0], [1], [0, 0, 1, 1], [], []>} : vector<8x72xf32>, vector<72x384xf32>, vector<8x384xf32> -> vector<8x384xf32>
    %426 = arith.addf %422, %425 : vector<8x384xf32>
    %427 = vector.broadcast %397 : vector<8x1xf32> to vector<8x384xf32>
    %428 = arith.addf %426, %427 : vector<8x384xf32>
    %cst_395 = arith.constant 0.000000e+00 : f32
    %429 = vector.broadcast %cst_395 : f32 to vector<8x384xf32>
    %430 = arith.maximumf %428, %429 : vector<8x384xf32>
    %c0_396 = arith.constant 0 : index
    %c0_397 = arith.constant 0 : index
    %c384 = arith.constant 384 : index
    %431 = vector.load %arg5[%c0_396, %c0_397, %c384] : memref<1x8x3072xf32, #tpu.memory_space<vmem>>, vector<1x8x384xf32>
    %432 = vector.shape_cast %431 : vector<1x8x384xf32> to vector<8x384xf32>
    %433 = vector.shape_cast %430 : vector<8x384xf32> to vector<1x8x384xf32>
    tpu.vector_store %arg5[%c0_396, %c0_397, %c384], %433 {strides = array<i32>} : memref<1x8x3072xf32, #tpu.memory_space<vmem>>, vector<1x8x384xf32>,
    %c2_398 = arith.constant 2 : index
    %c0_399 = arith.constant 0 : index
    %c0_400 = arith.constant 0 : index
    %434 = vector.load %arg6[%c2_398, %c0_399, %c0_400] : memref<10x72x384xf32, #tpu.memory_space<vmem>>, vector<1x72x384xf32>
    %435 = vector.shape_cast %434 : vector<1x72x384xf32> to vector<72x384xf32>
    %cst_401 = arith.constant dense<0.000000e+00> : vector<8x384xf32>
    %436 = tpu.matmul %392, %435, %cst_401 {dimension_numbers = #tpu.dot_dimension_numbers<[1], [0], [0], [1], [0, 0, 1, 1], [], []>} : vector<8x72xf32>, vector<72x384xf32>, vector<8x384xf32> -> vector<8x384xf32>
    %c3_402 = arith.constant 3 : index
    %c0_403 = arith.constant 0 : index
    %c0_404 = arith.constant 0 : index
    %437 = vector.load %arg6[%c3_402, %c0_403, %c0_404] : memref<10x72x384xf32, #tpu.memory_space<vmem>>, vector<1x72x384xf32>
    %438 = vector.shape_cast %437 : vector<1x72x384xf32> to vector<72x384xf32>
    %cst_405 = arith.constant dense<0.000000e+00> : vector<8x384xf32>
    %439 = tpu.matmul %394, %438, %cst_405 {dimension_numbers = #tpu.dot_dimension_numbers<[1], [0], [0], [1], [0, 0, 1, 1], [], []>} : vector<8x72xf32>, vector<72x384xf32>, vector<8x384xf32> -> vector<8x384xf32>
    %440 = arith.addf %436, %439 : vector<8x384xf32>
    %c4_406 = arith.constant 4 : index
    %c0_407 = arith.constant 0 : index
    %c0_408 = arith.constant 0 : index
    %441 = vector.load %arg6[%c4_406, %c0_407, %c0_408] : memref<10x72x384xf32, #tpu.memory_space<vmem>>, vector<1x72x384xf32>
    %442 = vector.shape_cast %441 : vector<1x72x384xf32> to vector<72x384xf32>
    %cst_409 = arith.constant dense<0.000000e+00> : vector<8x384xf32>
    %443 = tpu.matmul %396, %442, %cst_409 {dimension_numbers = #tpu.dot_dimension_numbers<[1], [0], [0], [1], [0, 0, 1, 1], [], []>} : vector<8x72xf32>, vector<72x384xf32>, vector<8x384xf32> -> vector<8x384xf32>
    %444 = arith.addf %440, %443 : vector<8x384xf32>
    %445 = vector.broadcast %397 : vector<8x1xf32> to vector<8x384xf32>
    %446 = arith.addf %444, %445 : vector<8x384xf32>
    %cst_410 = arith.constant 0.000000e+00 : f32
    %447 = vector.broadcast %cst_410 : f32 to vector<8x384xf32>
    %448 = arith.maximumf %446, %447 : vector<8x384xf32>
    %c0_411 = arith.constant 0 : index
    %c0_412 = arith.constant 0 : index
    %c768 = arith.constant 768 : index
    %449 = vector.load %arg5[%c0_411, %c0_412, %c768] : memref<1x8x3072xf32, #tpu.memory_space<vmem>>, vector<1x8x384xf32>
    %450 = vector.shape_cast %449 : vector<1x8x384xf32> to vector<8x384xf32>
    %451 = vector.shape_cast %448 : vector<8x384xf32> to vector<1x8x384xf32>
    tpu.vector_store %arg5[%c0_411, %c0_412, %c768], %451 {strides = array<i32>} : memref<1x8x3072xf32, #tpu.memory_space<vmem>>, vector<1x8x384xf32>,
    %c3_413 = arith.constant 3 : index
    %c0_414 = arith.constant 0 : index
    %c0_415 = arith.constant 0 : index
    %452 = vector.load %arg6[%c3_413, %c0_414, %c0_415] : memref<10x72x384xf32, #tpu.memory_space<vmem>>, vector<1x72x384xf32>
    %453 = vector.shape_cast %452 : vector<1x72x384xf32> to vector<72x384xf32>
    %cst_416 = arith.constant dense<0.000000e+00> : vector<8x384xf32>
    %454 = tpu.matmul %392, %453, %cst_416 {dimension_numbers = #tpu.dot_dimension_numbers<[1], [0], [0], [1], [0, 0, 1, 1], [], []>} : vector<8x72xf32>, vector<72x384xf32>, vector<8x384xf32> -> vector<8x384xf32>
    %c4_417 = arith.constant 4 : index
    %c0_418 = arith.constant 0 : index
    %c0_419 = arith.constant 0 : index
    %455 = vector.load %arg6[%c4_417, %c0_418, %c0_419] : memref<10x72x384xf32, #tpu.memory_space<vmem>>, vector<1x72x384xf32>
    %456 = vector.shape_cast %455 : vector<1x72x384xf32> to vector<72x384xf32>
    %cst_420 = arith.constant dense<0.000000e+00> : vector<8x384xf32>
    %457 = tpu.matmul %394, %456, %cst_420 {dimension_numbers = #tpu.dot_dimension_numbers<[1], [0], [0], [1], [0, 0, 1, 1], [], []>} : vector<8x72xf32>, vector<72x384xf32>, vector<8x384xf32> -> vector<8x384xf32>
    %458 = arith.addf %454, %457 : vector<8x384xf32>
    %c5_421 = arith.constant 5 : index
    %c0_422 = arith.constant 0 : index
    %c0_423 = arith.constant 0 : index
    %459 = vector.load %arg6[%c5_421, %c0_422, %c0_423] : memref<10x72x384xf32, #tpu.memory_space<vmem>>, vector<1x72x384xf32>
    %460 = vector.shape_cast %459 : vector<1x72x384xf32> to vector<72x384xf32>
    %cst_424 = arith.constant dense<0.000000e+00> : vector<8x384xf32>
    %461 = tpu.matmul %396, %460, %cst_424 {dimension_numbers = #tpu.dot_dimension_numbers<[1], [0], [0], [1], [0, 0, 1, 1], [], []>} : vector<8x72xf32>, vector<72x384xf32>, vector<8x384xf32> -> vector<8x384xf32>
    %462 = arith.addf %458, %461 : vector<8x384xf32>
    %463 = vector.broadcast %397 : vector<8x1xf32> to vector<8x384xf32>
    %464 = arith.addf %462, %463 : vector<8x384xf32>
    %cst_425 = arith.constant 0.000000e+00 : f32
    %465 = vector.broadcast %cst_425 : f32 to vector<8x384xf32>
    %466 = arith.maximumf %464, %465 : vector<8x384xf32>
    %c0_426 = arith.constant 0 : index
    %c0_427 = arith.constant 0 : index
    %c1152 = arith.constant 1152 : index
    %467 = vector.load %arg5[%c0_426, %c0_427, %c1152] : memref<1x8x3072xf32, #tpu.memory_space<vmem>>, vector<1x8x384xf32>
    %468 = vector.shape_cast %467 : vector<1x8x384xf32> to vector<8x384xf32>
    %469 = vector.shape_cast %466 : vector<8x384xf32> to vector<1x8x384xf32>
    tpu.vector_store %arg5[%c0_426, %c0_427, %c1152], %469 {strides = array<i32>} : memref<1x8x3072xf32, #tpu.memory_space<vmem>>, vector<1x8x384xf32>,
    %c4_428 = arith.constant 4 : index
    %c0_429 = arith.constant 0 : index
    %c0_430 = arith.constant 0 : index
    %470 = vector.load %arg6[%c4_428, %c0_429, %c0_430] : memref<10x72x384xf32, #tpu.memory_space<vmem>>, vector<1x72x384xf32>
    %471 = vector.shape_cast %470 : vector<1x72x384xf32> to vector<72x384xf32>
    %cst_431 = arith.constant dense<0.000000e+00> : vector<8x384xf32>
    %472 = tpu.matmul %392, %471, %cst_431 {dimension_numbers = #tpu.dot_dimension_numbers<[1], [0], [0], [1], [0, 0, 1, 1], [], []>} : vector<8x72xf32>, vector<72x384xf32>, vector<8x384xf32> -> vector<8x384xf32>
    %c5_432 = arith.constant 5 : index
    %c0_433 = arith.constant 0 : index
    %c0_434 = arith.constant 0 : index
    %473 = vector.load %arg6[%c5_432, %c0_433, %c0_434] : memref<10x72x384xf32, #tpu.memory_space<vmem>>, vector<1x72x384xf32>
    %474 = vector.shape_cast %473 : vector<1x72x384xf32> to vector<72x384xf32>
    %cst_435 = arith.constant dense<0.000000e+00> : vector<8x384xf32>
    %475 = tpu.matmul %394, %474, %cst_435 {dimension_numbers = #tpu.dot_dimension_numbers<[1], [0], [0], [1], [0, 0, 1, 1], [], []>} : vector<8x72xf32>, vector<72x384xf32>, vector<8x384xf32> -> vector<8x384xf32>
    %476 = arith.addf %472, %475 : vector<8x384xf32>
    %c6_436 = arith.constant 6 : index
    %c0_437 = arith.constant 0 : index
    %c0_438 = arith.constant 0 : index
    %477 = vector.load %arg6[%c6_436, %c0_437, %c0_438] : memref<10x72x384xf32, #tpu.memory_space<vmem>>, vector<1x72x384xf32>
    %478 = vector.shape_cast %477 : vector<1x72x384xf32> to vector<72x384xf32>
    %cst_439 = arith.constant dense<0.000000e+00> : vector<8x384xf32>
    %479 = tpu.matmul %396, %478, %cst_439 {dimension_numbers = #tpu.dot_dimension_numbers<[1], [0], [0], [1], [0, 0, 1, 1], [], []>} : vector<8x72xf32>, vector<72x384xf32>, vector<8x384xf32> -> vector<8x384xf32>
    %480 = arith.addf %476, %479 : vector<8x384xf32>
    %481 = vector.broadcast %397 : vector<8x1xf32> to vector<8x384xf32>
    %482 = arith.addf %480, %481 : vector<8x384xf32>
    %cst_440 = arith.constant 0.000000e+00 : f32
    %483 = vector.broadcast %cst_440 : f32 to vector<8x384xf32>
    %484 = arith.maximumf %482, %483 : vector<8x384xf32>
    %c0_441 = arith.constant 0 : index
    %c0_442 = arith.constant 0 : index
    %c1536 = arith.constant 1536 : index
    %485 = vector.load %arg5[%c0_441, %c0_442, %c1536] : memref<1x8x3072xf32, #tpu.memory_space<vmem>>, vector<1x8x384xf32>
    %486 = vector.shape_cast %485 : vector<1x8x384xf32> to vector<8x384xf32>
    %487 = vector.shape_cast %484 : vector<8x384xf32> to vector<1x8x384xf32>
    tpu.vector_store %arg5[%c0_441, %c0_442, %c1536], %487 {strides = array<i32>} : memref<1x8x3072xf32, #tpu.memory_space<vmem>>, vector<1x8x384xf32>,
    %c5_443 = arith.constant 5 : index
    %c0_444 = arith.constant 0 : index
    %c0_445 = arith.constant 0 : index
    %488 = vector.load %arg6[%c5_443, %c0_444, %c0_445] : memref<10x72x384xf32, #tpu.memory_space<vmem>>, vector<1x72x384xf32>
    %489 = vector.shape_cast %488 : vector<1x72x384xf32> to vector<72x384xf32>
    %cst_446 = arith.constant dense<0.000000e+00> : vector<8x384xf32>
    %490 = tpu.matmul %392, %489, %cst_446 {dimension_numbers = #tpu.dot_dimension_numbers<[1], [0], [0], [1], [0, 0, 1, 1], [], []>} : vector<8x72xf32>, vector<72x384xf32>, vector<8x384xf32> -> vector<8x384xf32>
    %c6_447 = arith.constant 6 : index
    %c0_448 = arith.constant 0 : index
    %c0_449 = arith.constant 0 : index
    %491 = vector.load %arg6[%c6_447, %c0_448, %c0_449] : memref<10x72x384xf32, #tpu.memory_space<vmem>>, vector<1x72x384xf32>
    %492 = vector.shape_cast %491 : vector<1x72x384xf32> to vector<72x384xf32>
    %cst_450 = arith.constant dense<0.000000e+00> : vector<8x384xf32>
    %493 = tpu.matmul %394, %492, %cst_450 {dimension_numbers = #tpu.dot_dimension_numbers<[1], [0], [0], [1], [0, 0, 1, 1], [], []>} : vector<8x72xf32>, vector<72x384xf32>, vector<8x384xf32> -> vector<8x384xf32>
    %494 = arith.addf %490, %493 : vector<8x384xf32>
    %c7_451 = arith.constant 7 : index
    %c0_452 = arith.constant 0 : index
    %c0_453 = arith.constant 0 : index
    %495 = vector.load %arg6[%c7_451, %c0_452, %c0_453] : memref<10x72x384xf32, #tpu.memory_space<vmem>>, vector<1x72x384xf32>
    %496 = vector.shape_cast %495 : vector<1x72x384xf32> to vector<72x384xf32>
    %cst_454 = arith.constant dense<0.000000e+00> : vector<8x384xf32>
    %497 = tpu.matmul %396, %496, %cst_454 {dimension_numbers = #tpu.dot_dimension_numbers<[1], [0], [0], [1], [0, 0, 1, 1], [], []>} : vector<8x72xf32>, vector<72x384xf32>, vector<8x384xf32> -> vector<8x384xf32>
    %498 = arith.addf %494, %497 : vector<8x384xf32>
    %499 = vector.broadcast %397 : vector<8x1xf32> to vector<8x384xf32>
    %500 = arith.addf %498, %499 : vector<8x384xf32>
    %cst_455 = arith.constant 0.000000e+00 : f32
    %501 = vector.broadcast %cst_455 : f32 to vector<8x384xf32>
    %502 = arith.maximumf %500, %501 : vector<8x384xf32>
    %c0_456 = arith.constant 0 : index
    %c0_457 = arith.constant 0 : index
    %c1920 = arith.constant 1920 : index
    %503 = vector.load %arg5[%c0_456, %c0_457, %c1920] : memref<1x8x3072xf32, #tpu.memory_space<vmem>>, vector<1x8x384xf32>
    %504 = vector.shape_cast %503 : vector<1x8x384xf32> to vector<8x384xf32>
    %505 = vector.shape_cast %502 : vector<8x384xf32> to vector<1x8x384xf32>
    tpu.vector_store %arg5[%c0_456, %c0_457, %c1920], %505 {strides = array<i32>} : memref<1x8x3072xf32, #tpu.memory_space<vmem>>, vector<1x8x384xf32>,
    %c6_458 = arith.constant 6 : index
    %c0_459 = arith.constant 0 : index
    %c0_460 = arith.constant 0 : index
    %506 = vector.load %arg6[%c6_458, %c0_459, %c0_460] : memref<10x72x384xf32, #tpu.memory_space<vmem>>, vector<1x72x384xf32>
    %507 = vector.shape_cast %506 : vector<1x72x384xf32> to vector<72x384xf32>
    %cst_461 = arith.constant dense<0.000000e+00> : vector<8x384xf32>
    %508 = tpu.matmul %392, %507, %cst_461 {dimension_numbers = #tpu.dot_dimension_numbers<[1], [0], [0], [1], [0, 0, 1, 1], [], []>} : vector<8x72xf32>, vector<72x384xf32>, vector<8x384xf32> -> vector<8x384xf32>
    %c7_462 = arith.constant 7 : index
    %c0_463 = arith.constant 0 : index
    %c0_464 = arith.constant 0 : index
    %509 = vector.load %arg6[%c7_462, %c0_463, %c0_464] : memref<10x72x384xf32, #tpu.memory_space<vmem>>, vector<1x72x384xf32>
    %510 = vector.shape_cast %509 : vector<1x72x384xf32> to vector<72x384xf32>
    %cst_465 = arith.constant dense<0.000000e+00> : vector<8x384xf32>
    %511 = tpu.matmul %394, %510, %cst_465 {dimension_numbers = #tpu.dot_dimension_numbers<[1], [0], [0], [1], [0, 0, 1, 1], [], []>} : vector<8x72xf32>, vector<72x384xf32>, vector<8x384xf32> -> vector<8x384xf32>
    %512 = arith.addf %508, %511 : vector<8x384xf32>
    %c8_466 = arith.constant 8 : index
    %c0_467 = arith.constant 0 : index
    %c0_468 = arith.constant 0 : index
    %513 = vector.load %arg6[%c8_466, %c0_467, %c0_468] : memref<10x72x384xf32, #tpu.memory_space<vmem>>, vector<1x72x384xf32>
    %514 = vector.shape_cast %513 : vector<1x72x384xf32> to vector<72x384xf32>
    %cst_469 = arith.constant dense<0.000000e+00> : vector<8x384xf32>
    %515 = tpu.matmul %396, %514, %cst_469 {dimension_numbers = #tpu.dot_dimension_numbers<[1], [0], [0], [1], [0, 0, 1, 1], [], []>} : vector<8x72xf32>, vector<72x384xf32>, vector<8x384xf32> -> vector<8x384xf32>
    %516 = arith.addf %512, %515 : vector<8x384xf32>
    %517 = vector.broadcast %397 : vector<8x1xf32> to vector<8x384xf32>
    %518 = arith.addf %516, %517 : vector<8x384xf32>
    %cst_470 = arith.constant 0.000000e+00 : f32
    %519 = vector.broadcast %cst_470 : f32 to vector<8x384xf32>
    %520 = arith.maximumf %518, %519 : vector<8x384xf32>
    %c0_471 = arith.constant 0 : index
    %c0_472 = arith.constant 0 : index
    %c2304 = arith.constant 2304 : index
    %521 = vector.load %arg5[%c0_471, %c0_472, %c2304] : memref<1x8x3072xf32, #tpu.memory_space<vmem>>, vector<1x8x384xf32>
    %522 = vector.shape_cast %521 : vector<1x8x384xf32> to vector<8x384xf32>
    %523 = vector.shape_cast %520 : vector<8x384xf32> to vector<1x8x384xf32>
    tpu.vector_store %arg5[%c0_471, %c0_472, %c2304], %523 {strides = array<i32>} : memref<1x8x3072xf32, #tpu.memory_space<vmem>>, vector<1x8x384xf32>,
    %c7_473 = arith.constant 7 : index
    %c0_474 = arith.constant 0 : index
    %c0_475 = arith.constant 0 : index
    %524 = vector.load %arg6[%c7_473, %c0_474, %c0_475] : memref<10x72x384xf32, #tpu.memory_space<vmem>>, vector<1x72x384xf32>
    %525 = vector.shape_cast %524 : vector<1x72x384xf32> to vector<72x384xf32>
    %cst_476 = arith.constant dense<0.000000e+00> : vector<8x384xf32>
    %526 = tpu.matmul %392, %525, %cst_476 {dimension_numbers = #tpu.dot_dimension_numbers<[1], [0], [0], [1], [0, 0, 1, 1], [], []>} : vector<8x72xf32>, vector<72x384xf32>, vector<8x384xf32> -> vector<8x384xf32>
    %c8_477 = arith.constant 8 : index
    %c0_478 = arith.constant 0 : index
    %c0_479 = arith.constant 0 : index
    %527 = vector.load %arg6[%c8_477, %c0_478, %c0_479] : memref<10x72x384xf32, #tpu.memory_space<vmem>>, vector<1x72x384xf32>
    %528 = vector.shape_cast %527 : vector<1x72x384xf32> to vector<72x384xf32>
    %cst_480 = arith.constant dense<0.000000e+00> : vector<8x384xf32>
    %529 = tpu.matmul %394, %528, %cst_480 {dimension_numbers = #tpu.dot_dimension_numbers<[1], [0], [0], [1], [0, 0, 1, 1], [], []>} : vector<8x72xf32>, vector<72x384xf32>, vector<8x384xf32> -> vector<8x384xf32>
    %530 = arith.addf %526, %529 : vector<8x384xf32>
    %c9_481 = arith.constant 9 : index
    %c0_482 = arith.constant 0 : index
    %c0_483 = arith.constant 0 : index
    %531 = vector.load %arg6[%c9_481, %c0_482, %c0_483] : memref<10x72x384xf32, #tpu.memory_space<vmem>>, vector<1x72x384xf32>
    %532 = vector.shape_cast %531 : vector<1x72x384xf32> to vector<72x384xf32>
    %cst_484 = arith.constant dense<0.000000e+00> : vector<8x384xf32>
    %533 = tpu.matmul %396, %532, %cst_484 {dimension_numbers = #tpu.dot_dimension_numbers<[1], [0], [0], [1], [0, 0, 1, 1], [], []>} : vector<8x72xf32>, vector<72x384xf32>, vector<8x384xf32> -> vector<8x384xf32>
    %534 = arith.addf %530, %533 : vector<8x384xf32>
    %535 = vector.broadcast %397 : vector<8x1xf32> to vector<8x384xf32>
    %536 = arith.addf %534, %535 : vector<8x384xf32>
    %cst_485 = arith.constant 0.000000e+00 : f32
    %537 = vector.broadcast %cst_485 : f32 to vector<8x384xf32>
    %538 = arith.maximumf %536, %537 : vector<8x384xf32>
    %c0_486 = arith.constant 0 : index
    %c0_487 = arith.constant 0 : index
    %c2688 = arith.constant 2688 : index
    %539 = vector.load %arg5[%c0_486, %c0_487, %c2688] : memref<1x8x3072xf32, #tpu.memory_space<vmem>>, vector<1x8x384xf32>
    %540 = vector.shape_cast %539 : vector<1x8x384xf32> to vector<8x384xf32>
    %541 = vector.shape_cast %538 : vector<8x384xf32> to vector<1x8x384xf32>
    tpu.vector_store %arg5[%c0_486, %c0_487, %c2688], %541 {strides = array<i32>} : memref<1x8x3072xf32, #tpu.memory_space<vmem>>, vector<1x8x384xf32>,
    return
  }
  func.func @transform_0(%arg0: i32, %arg1: i32) -> (i32, i32, i32, i32) {
    %c0_i32 = arith.constant 0 : i32
    %c0_i32_0 = arith.constant 0 : i32
    %c0_i32_1 = arith.constant 0 : i32
    %c0_i32_2 = arith.constant 0 : i32
    return %arg0, %c0_i32, %c0_i32_0, %c0_i32_1 : i32, i32, i32, i32
  }
  func.func @transform_1(%arg0: i32, %arg1: i32) -> (i32, i32, i32) {
    %c0_i32 = arith.constant 0 : i32
    %c0_i32_0 = arith.constant 0 : i32
    %c0_i32_1 = arith.constant 0 : i32
    %c0_i32_2 = arith.constant 0 : i32
    return %c0_i32, %c0_i32_0, %c0_i32_1 : i32, i32, i32
  }
  func.func @transform_2(%arg0: i32, %arg1: i32) -> (i32, i32) {
    %c0_i32 = arith.constant 0 : i32
    %c0_i32_0 = arith.constant 0 : i32
    %c0_i32_1 = arith.constant 0 : i32
    return %c0_i32, %c0_i32_0 : i32, i32
  }
  func.func @transform_3(%arg0: i32, %arg1: i32) -> (i32, i32, i32) {
    %c0_i32 = arith.constant 0 : i32
    %c0_i32_0 = arith.constant 0 : i32
    return %arg0, %c0_i32, %arg1 : i32, i32, i32
  }
}

</mosaic_0001>

<bundles_post_ra>
// kernel: tpu_custom_call.1
= control target key start
LH: loop header
LB: loop body
LE: loop exit
PB: predicated region body
PF: predicated region fallthrough
CT: control target
= control target key end

     0   :  { %s7825_s0 = inlined_call_operand.hbm [shape: f32[2,18,8,384], index: 0, kind: input, shape index: {}]   ;;  %s7826_s1 = inlined_call_operand.hbm [shape: f32[3,8,72], index: 1, kind: input, shape index: {}]   ;;  %s7827_s2 = inlined_call_operand.vmem [shape: f32[8,1], index: 2, kind: input, shape index: {}]   ;;  %s7828_s3 = inlined_call_operand.hbm [shape: f32[2,8,6144], index: 3, kind: output, shape index: {}]  }
   0x1   :  { %7996 = sst [smem:[#allocation59_spill]] %s7826_s1 }
   0x2   :  { %7997 = sst [smem:[#allocation60_spill]] %s7828_s3 }
   0x3   :  { %8 = vsyncpa [#allocation4], 0 }
   0x4   :  { %10 = vsyncpa [#allocation4 + $0x1], 0 }
   0x5   :  { %11 = vsyncpa [#allocation7], 0 }
   0x6   :  { %12 = vsyncpa [#allocation5], 0 }
   0x7   :  { %14 = vsyncpa [#allocation5 + $0x1], 0  ;;  %s4767_s12 = smov 0   ;;  %s4769_s13 = smov 0  }
   0x8   :  { %s4771_s14 = smov 0   ;;  %s4773_s15 = smov 0  }
   0x9   :  { %s4775_s16 = smov 0   ;;  %s4777_s17 = smov 0  }
   0xa   :  { %s4779_s18 = smov 0   ;;  %s4781_s19 = smov 0  }
   0xb   :  { %s4783_s20 = smov 0   ;;  %s4785_s21 = smov 0  }
   0xc   :  { %s4787_s22 = smov 0  }
   0xd LB: > { %7998 = sst [smem:[#allocation12_spill]] %s4691_s12  ;;  %s3658_s23 = sadd.s32 4294967295, %s4731_s22   ;;  %s4731_s22 = sphi %s4787_s22, %s20_s22   ;;  %s4727_s21 = sphi %s4785_s21, %s8363_s21   ;;  %s4723_s20 = sphi %s4783_s20, %s8362_s20   ;;  %s4719_s19 = sphi %s4781_s19, %s8361_s19   ;;  %s4715_s18 = sphi %s4779_s18, %s8360_s18   ;;  %s4711_s17 = sphi %s4777_s17, %s8369_s17   ;;  %s4707_s16 = sphi %s4775_s16, %s8368_s16   ;;  %s4703_s15 = sphi %s4773_s15, %s8367_s15   ;;  %s4699_s14 = sphi %s4771_s14, %s8366_s14   ;;  %s4695_s13 = sphi %s4769_s13, %s8365_s13   ;;  %s4691_s12 = sphi %s4767_s12, %s8364_s12  }
   0xe   : > { %7999 = sst [smem:[#allocation13_spill]] %s4723_s20  ;;  %s3659_s24 = sadd.s32 4294967294, %s4731_s22  }
   0xf   : > { %8000 = sst [smem:[#allocation14_spill]] %s4727_s21  ;;  %p52_p0 = scmp.ne.s32.totalorder %s4707_s16, %s4703_s15 }
  0x10   : > { %p4823_p1 = scmp.eq.s32.totalorder %s3658_s23, 0  ;;  %p119_p2 = scmp.ne.s32.totalorder %s4699_s14, %s4695_s13 }
  0x11   : > { %p120_p3 = scmp.eq.s32.totalorder %s3658_s23, 3  ;;  %p125_p5 = scmp.ne.s32.totalorder %s4695_s13, %s4691_s12 }
  0x12   : > { %p4831_p4 = por %p4823_p1, %p52_p0  ;;  %p126_p7 = scmp.eq.s32.totalorder %s3659_s24, 3 }
  0x13   : > { %p4837_p6 = por %p120_p3, %p119_p2  ;;  %p3660_p8 = scmp.ge.s32.totalorder %s4731_s22, 1 }
  0x14   : > { %p133_p9 = scmp.lt.s32.totalorder %s4731_s22, 5  ;;  %p4843_p10 = por %p126_p7, %p125_p5 }
  0x15   : > { %s8003_s27 = scalar_select %p4837_p6, 1, 0 }
  0x16   : > { %s8005_s28 = scalar_select %p4843_p10, 1, 0 }
  0x17   : > { %8004 = sst [smem:[#allocation15_spill]] %s8003_s27  ;;  %p4847_p11 = pnand %p3660_p8, %p133_p9 }
  0x18   : > { %8006 = sst [smem:[#allocation16_spill]] %s8005_s28  ;;  %s4733_s6 = smov [#allocation6]  }
  0x19   : > { %s8008_s1 = sld [smem:[#allocation59_spill]]  ;;  %p3803_p12 = pneg %p4847_p11 }
  0x1a   : > { %s146_s7 = sshll.u32 %s4733_s6, 4  ;;  %s4734_s8 = smov 128   ;;  %s147_s7 = int_to_ptr.vmem [resolvable:$true] %s146_s7 }
  0x1b   : > { %p3804_p13 = pnand %p3803_p12, %p4823_p1  ;;  %s4735_s9 = smov 8  }
  0x1c   : > { %s29_s10 = sadd.s32 1, %s4723_s20  ;;  %s32_s11 = sadd.s32 1, %s4727_s21 }
  0x1d   : > { %p30_p0 = scmp.ge.s32.totalorder %s29_s10, 2  ;;  %s39_s15 = sadd.s32 1, %s4711_s17 }
  0x1e   : > { %p46_p2 = scmp.ne.s32.totalorder %s4711_s17, %s4707_s16  ;;  %p47_p3 = scmp.eq.s32.totalorder %s4731_s22, 0 }
  0x1f   : > { %s144_s5 = sshll.u32 %s8008_s1, 4  ;;  %s8371_s10 = smov (%p30_p0, %s29_s10), 0  ;;  %s145_s5 = int_to_ptr.hbm [resolvable:$true] %s144_s5 }
  0x20   : > { %3806 = dma.hbm_to_vmem [thread:$0]  (!%p3804_p13), %s145_s5, 384, %s147_s7, [#allocation7], %s4734_s8, %s4734_s8, %s4735_s9  }
  0x21   : > { %8009 = sst [smem:[#allocation17_spill]] %s8371_s10  ;;  %s8373_s11 = smov (!%p30_p0, %s32_s11), %s4727_s21 }
  0x22   : > { %p4867_p5 = por %p47_p3, %p46_p2  ;;  %s105_s24 = ssub.s32 %s4723_s20, %s8371_s10 }
  0x23   : > { %p34_p7 = scmp.ge.s32.totalorder %s8373_s11, 2  ;;  %s109_s30 = sadd.s32 1, %s4699_s14 }
  0x24   : > { %p3816_p8 = scmp.lt.s32.totalorder %s4731_s22, 4  ;;  %s163_s4 = sand.u32 1, %s4711_s17  }
  0x25   : > { %s8375_s11 = smov (%p34_p7, %s8373_s11), 0  ;;  %s3790_s5 = smul.u32 432, %s163_s4 }
  0x26   : > { %8011 = sst [smem:[#allocation18_spill]] %s8375_s11  ;;  %s36_s6 = ssub.s32 %s4727_s21, %s8375_s11 }
  0x27   : > { %s3791_s7 = smul.u32 432, %s4727_s21  ;;  %p37_p9 = scmp.eq.s32.totalorder %s36_s6, 0 }
  0x28   : > { %s106_s8 = sor.u32 %s105_s24, %s36_s6  ;;  %s167_s12 = scalar_lea.vmem [#allocation3], %s3790_s5 }
  0x29   : > { %p107_p12 = scmp.eq.s32.totalorder %s106_s8, 0  ;;  %s172_s28 = scalar_lea.hbm %s7825_s0, %s3791_s7 }
  0x2a   : > { %s4882_s9 = scalar_select %p37_p9, %s4711_s17, %s39_s15  }
  0x2b   : > { %s4885_s1 = scalar_select %p107_p12, %s4699_s14, %s109_s30  }
  0x2c   : > { %s175_s27 = sshll.u32 %s167_s12, 4  ;;  %s173_s3 = sshll.u32 %s172_s28, 4  ;;  %s176_s27 = int_to_ptr.vmem [resolvable:$true] %s175_s27  ;;  %s174_s3 = int_to_ptr.hbm [resolvable:$true] %s173_s3 }
  0x2d   : > { %p3808_p13 = pnand %p3816_p8, %p4867_p5  ;;  %s164_s11 = scalar_lea.sflag [#allocation4], %s163_s4 }
  0x2e   : > { %s4736_s21 = smov 384   ;;  %s4737_s24 = smov 24  }
  0x2f   : > { %3810 = dma.hbm_to_vmem [thread:$0]  (!%p3808_p13), %s174_s3, 6912, %s176_s27, %s164_s11, %s4736_s21, %s4736_s21, %s4737_s24  }
  0x30   : > { %187 = sbr.rel (%p4847_p11) target bundleno = 784 (0x310), region = 32 }
  0x35   : > { %s189_s15 = sand.u32 1, %s4707_s16  }
  0x36   : > { %s3792_s20 = smul.u32 432, %s189_s15  ;;  %s190_s10 = scalar_lea.sflag [#allocation4], %s189_s15 }
  0x38   : > { %s193_s30 = scalar_lea.vmem [#allocation3], %s3792_s20 }
  0x39   : > { %4678 = dma.done.wait (%p4831_p4), %s190_s10, 6912  }
  0x3a   : > { %4680 = vsyncadd (%p4831_p4), %s190_s10, 4294960384 }
  0x3b   : > { %4682 = dma.done.wait (%p4823_p1), [#allocation7], 384  }
  0x3c   : > { %4684 = vsyncadd (%p4823_p1), [#allocation7], 4294966912  ;;  %s3789_s3 = smul.u32 192, %s4715_s18  ;;  %s4738_s21 = smov 17   ;;  %v236_v24 = vlaneseq  ;;  %vm1362_vm8 = vcmask 588800  }
  0x3d   : > { %s4739_s25 = smov 18   ;;  %s4740_s26 = smov 19  }
  0x3e   : > { %s4906_s12 = scalar_lea.vmem %s193_s30, %s3789_s3 [#allocation3]  ;;  %s4741_s27 = smov 127   ;;  %v5010_v26 = vand.u32 127, %v236_v24 }
  0x3f   : > { %v4909_v0 = vld [vmem:[%s4906_s12] sm:$0xff]  ;;  %v4912_v1 = vld [vmem:[%s4906_s12 + $0x8] sm:$0xff]  ;;  %v4920_v3 = vld [vmem:[%s4906_s12 + $0x10] sm:$0xff]  ;;  %s4742_s28 = smov 1   ;;  %s4743_s29 = smov 111  }
  0x40   : > { %v3941_v2 = vpack.i.bf16 %v4912_v1, %v4909_v0  ;;  %v4923_v4 = vld [vmem:[%s4906_s12 + $0x18] sm:$0xff]  ;;  %s4744_s11 = smov 109   ;;  %s4745_s23 = smov 110   ;;  %v4940_v6 = vld [vmem:[%s4906_s12 + $0x20] sm:$0xff]  ;;  %v4943_v7 = vld [vmem:[%s4906_s12 + $0x28] sm:$0xff]  ;;  %vm332_vm0 = vcmp.lt.s32.totalorder %v5010_v26, 109 }
  0x41   : > { %v3946_v5 = vpack.i.bf16 %v4923_v4, %v4920_v3  ;;  %v4006_v8 = vpack.i.bf16 %v4943_v7, %v4940_v6  ;;  %v4956_v9 = vld [vmem:[%s4906_s12 + $0x30] sm:$0xff]  ;;  %v4960_v10 = vld [vmem:[%s4906_s12 + $0x38] sm:$0xff]  ;;  %v4963_v11 = vld [vmem:[%s4906_s12 + $0x40] sm:$0xff]  ;;  %vm319_vm1 = vcmp.lt.s32.totalorder %v5010_v26, 110  ;;  %vm306_vm2 = vcmp.lt.s32.totalorder %v5010_v26, 111  ;;  %s219_s6 = sand.u32 1, %s4695_s13  }
  0x42   : > { %3942 = vrot.lane.b32.xlu2 %v3941_v2, %s4738_s21  ;;  %3932 = vrot.lane.b32.xlu1 %v3941_v2, %s4739_s25  ;;  %v3681_v12 = vld [vmem:[%s4906_s12 + $0x48] sm:$0xff]  ;;  %v4051_v13 = vpack.i.bf16 %v4960_v10, %v4956_v9  ;;  %v3682_v16 = vld [vmem:[%s4906_s12 + $0x50] sm:$0xff]  ;;  %vm293_vm3 = vcmp.lt.s32.totalorder %v5010_v26, 127  ;;  %vm277_vm4 = vcmp.lt.s32.totalorder %v5010_v26, 1  ;;  %vm264_vm5 = vcmp.lt.s32.totalorder %v5010_v26, 17  ;;  %s7063_s7 = smul.u32 192, %s219_s6 }
  0x43   : > { %3922 = vrot.lane.b32.xlu0 %v3941_v2, %s4740_s26  ;;  %v4046_v14 = vpack.i.bf16 %v3681_v12, %v4963_v11  ;;  %v4988_v17 = vld [vmem:[%s4906_s12 + $0x58] sm:$0xff]  ;;  %v3686_v25 = vld [vmem:[%s4906_s12 + $0x60] sm:$0xff]  ;;  %v3687_v27 = vld [vmem:[%s4906_s12 + $0x68] sm:$0xff]  ;;  %vm251_vm6 = vcmp.lt.s32.totalorder %v5010_v26, 18  ;;  %vm238_vm7 = vcmp.lt.s32.totalorder %v5010_v26, 19  ;;  %s3515_s24 = smul.u32 24, %s4715_s18 }
  0x44   : > { %8012 = vst [vmem:[#allocation19_spill] sm:$0xff] %v4988_v17  ;;  %v4126_v19 = vpack.i.bf16 %v4988_v17, %v3682_v16  ;;  %v3688_v28 = vld [vmem:[%s4906_s12 + $0x70] sm:$0xff]  ;;  %v3691_v29 = vld [vmem:[%s4906_s12 + $0x78] sm:$0xff]  ;;  %v5025_v35 = vpack.i.bf16 %v3687_v27, %v3686_v25  ;;  %v3692_v25 = vld [vmem:[%s4906_s12 + $0x80] sm:$0xff]  ;;  %s7098_s8 = scalar_lea.vmem [#allocation8], %s7063_s7  ;;  %s3794_s15 = smul.u32 48, %s4719_s19 }
  0x45   : > { %v5027_v36 = vpack.i.bf16 %v3691_v29, %v3688_v28  ;;  %v3693_v27 = vld [vmem:[%s4906_s12 + $0x88] sm:$0xff]  ;;  %s3523_s18 = sshll.u32 %s7098_s8, 4  ;;  %s3524_s18 = int_to_ptr.vmem [resolvable:$true] %s3523_s18 }
  0x46   : > { %s3519_s20 = sadd.s32 %s3794_s15, %s3515_s24 }
  0x47   : > { %s3786_s10 = sshll.u32 %s3519_s20, 3 }
  0x4a   : > { %3947 = vrot.lane.b32.xlu2 %v3946_v5, %s4738_s21  ;;  %3937 = vrot.lane.b32.xlu1 %v3946_v5, %s4739_s25 }
  0x4b   : > { %3927 = vrot.lane.b32.xlu0 %v3946_v5, %s4740_s26 }
  0x52   : > { %3962 = vrot.lane.b32.xlu2 %v3941_v2, %s4741_s27  ;;  %3957 = vrot.lane.b32.xlu1 %v3946_v5, %s4742_s28 }
  0x53   : > { %3952 = vrot.lane.b32.xlu0 %v3941_v2, %s4742_s28 }
  0x5a   : > { %3977 = vrot.lane.b32.xlu2 %v3946_v5, %s4743_s29  ;;  %3972 = vrot.lane.b32.xlu1 %v3941_v2, %s4743_s29 }
  0x5b   : > { %3967 = vrot.lane.b32.xlu0 %v3946_v5, %s4741_s27 }
  0x62   : > { %3992 = vrot.lane.b32.xlu2 %v3941_v2, %s4744_s11  ;;  %3987 = vrot.lane.b32.xlu1 %v3946_v5, %s4745_s23 }
  0x63   : > { %3982 = vrot.lane.b32.xlu0 %v3941_v2, %s4745_s23 }
  0x6a   : > { %4007 = vrot.lane.b32.xlu2 %v4006_v8, %s4739_s25  ;;  %4002 = vrot.lane.b32.xlu1 %v4006_v8, %s4740_s26 }
  0x6b   : > { %3997 = vrot.lane.b32.xlu0 %v3946_v5, %s4744_s11 }
  0x72   : > { %4022 = vrot.lane.b32.xlu2 %v4006_v8, %s4741_s27  ;;  %4017 = vrot.lane.b32.xlu1 %v4006_v8, %s4742_s28 }
  0x73   : > { %4012 = vrot.lane.b32.xlu0 %v4006_v8, %s4738_s21 }
  0x7a   : > { %4037 = vrot.lane.b32.xlu2 %v4006_v8, %s4744_s11  ;;  %4032 = vrot.lane.b32.xlu1 %v4006_v8, %s4745_s23 }
  0x7b   : > { %4027 = vrot.lane.b32.xlu0 %v4006_v8, %s4743_s29 }
  0x82   : > { %4052 = vrot.lane.b32.xlu2 %v4051_v13, %s4739_s25  ;;  %4047 = vrot.lane.b32.xlu1 %v4046_v14, %s4740_s26 }
  0x83   : > { %4042 = vrot.lane.b32.xlu0 %v4051_v13, %s4740_s26 }
  0x8a   : > { %4067 = vrot.lane.b32.xlu2 %v4046_v14, %s4738_s21  ;;  %4062 = vrot.lane.b32.xlu1 %v4051_v13, %s4738_s21 }
  0x8b   : > { %4057 = vrot.lane.b32.xlu0 %v4046_v14, %s4739_s25 }
  0x92   : > { %4082 = vrot.lane.b32.xlu2 %v4051_v13, %s4741_s27  ;;  %4077 = vrot.lane.b32.xlu1 %v4046_v14, %s4742_s28 }
  0x93   : > { %4072 = vrot.lane.b32.xlu0 %v4051_v13, %s4742_s28 }
  0x9a   : > { %4097 = vrot.lane.b32.xlu2 %v4046_v14, %s4743_s29  ;;  %4092 = vrot.lane.b32.xlu1 %v4051_v13, %s4743_s29 }
  0x9b   : > { %4087 = vrot.lane.b32.xlu0 %v4046_v14, %s4741_s27 }
  0x9c   : > { %v4981_v15 = vpop.permute.xlu2 %3942 }
  0x9d   : > { %v7843_v5 = vunpack.i.l.bf16 %v4981_v15 }
  0xa2   : > { %4112 = vrot.lane.b32.xlu2 %v4051_v13, %s4744_s11  ;;  %4107 = vrot.lane.b32.xlu1 %v4046_v14, %s4745_s23 }
  0xa3   : > { %4102 = vrot.lane.b32.xlu0 %v4051_v13, %s4745_s23 }
  0xa4   : > { %v4990_v18 = vpop.permute.xlu2 %3947 }
  0xa5   : > { %v7842_v8 = vunpack.i.l.bf16 %v4990_v18 }
  0xa7   : > { %v267_v24 = vsel %vm264_vm5, %v7842_v8, %v7843_v5 }
  0xaa   : > { %4127 = vrot.lane.b32.xlu2 %v4126_v19, %s4739_s25  ;;  %4122 = vrot.lane.b32.xlu1 %v4126_v19, %s4740_s26 }
  0xab   : > { %4117 = vrot.lane.b32.xlu0 %v4046_v14, %s4744_s11 }
  0xac   : > { %v4996_v20 = vpop.permute.xlu2 %3962 }
  0xad   : > { %v7847_v54 = vunpack.i.h.bf16 %v4996_v20  ;;  %v7846_v55 = vunpack.i.l.bf16 %v4996_v20 }
  0xaf   : > { %v295_v60 = vsel %vm293_vm3, %v7846_v55, %v7847_v54 }
  0xb2   : > { %4142 = vrot.lane.b32.xlu2 %v4126_v19, %s4741_s27  ;;  %4137 = vrot.lane.b32.xlu1 %v4126_v19, %s4742_s28 }
  0xb3   : > { %4132 = vrot.lane.b32.xlu0 %v4126_v19, %s4738_s21 }
  0xb4   : > { %v5001_v21 = vpop.permute.xlu2 %3977  ;;  %v5003_v22 = vpop.permute.xlu1 %3932 }
  0xb5   : > { %v5005_v23 = vpop.permute.xlu0 %3922  ;;  %v7841_v14 = vunpack.i.l.bf16 %v5003_v22 }
  0xba   : > { %4157 = vrot.lane.b32.xlu2 %v4126_v19, %s4744_s11  ;;  %4152 = vrot.lane.b32.xlu1 %v4126_v19, %s4745_s23 }
  0xbb   : > { %4147 = vrot.lane.b32.xlu0 %v4126_v19, %s4743_s29 }
  0xbc   : > { %v5016_v30 = vpop.permute.xlu2 %3992  ;;  %v5018_v31 = vpop.permute.xlu1 %3937 }
  0xbd   : > { %v7853_v32 = vunpack.i.h.bf16 %v5016_v30  ;;  %v7852_v33 = vunpack.i.l.bf16 %v5016_v30  ;;  %v5023_v34 = vpop.permute.xlu0 %3927  ;;  %v7840_v16 = vunpack.i.l.bf16 %v5018_v31 }
  0xbe   : > { %v7838_v19 = vunpack.i.l.bf16 %v5023_v34 }
  0xbf   : > { %v334_v37 = vsel %vm332_vm0, %v7852_v33, %v7853_v32  ;;  %v3701_v33 = vld [vmem:[%s4906_s12 + $0xa8] sm:$0xff] }
  0xc0   : > { %1436 = vmatpush.msra.mxu3 %v334_v37  ;;  %v7839_v37 = vunpack.i.l.bf16 %v5005_v23 }
  0xc2   : > { %4172 = vrot.lane.b32.xlu2 %v5025_v35, %s4739_s25  ;;  %4167 = vrot.lane.b32.xlu1 %v5027_v36, %s4740_s26 }
  0xc3   : > { %4162 = vrot.lane.b32.xlu0 %v5025_v35, %s4740_s26 }
  0xc4   : > { %v5041_v38 = vpop.permute.xlu2 %4007  ;;  %v5043_v39 = vpop.permute.xlu1 %3957 }
  0xc5   : > { %v5045_v40 = vpop.permute.xlu0 %3952  ;;  %v7844_v61 = vunpack.i.l.bf16 %v5043_v39 }
  0xc6   : > { %v7845_v62 = vunpack.i.l.bf16 %v5045_v40 }
  0xca   : > { %4187 = vrot.lane.b32.xlu2 %v5027_v36, %s4738_s21  ;;  %4182 = vrot.lane.b32.xlu1 %v5025_v35, %s4738_s21 }
  0xcb   : > { %4177 = vrot.lane.b32.xlu0 %v5027_v36, %s4739_s25 }
  0xcc   : > { %v5053_v41 = vpop.permute.xlu2 %4022  ;;  %v5055_v42 = vpop.permute.xlu1 %3972 }
  0xcd   : > { %v5057_v43 = vpop.permute.xlu0 %3967  ;;  %v7849_v49 = vunpack.i.h.bf16 %v5055_v42  ;;  %v7848_v50 = vunpack.i.l.bf16 %v5055_v42 }
  0xcf   : > { %v308_v57 = vsel %vm306_vm2, %v7848_v50, %v7849_v49 }
  0xd2   : > { %4202 = vrot.lane.b32.xlu2 %v5025_v35, %s4741_s27  ;;  %4197 = vrot.lane.b32.xlu1 %v5027_v36, %s4742_s28 }
  0xd3   : > { %4192 = vrot.lane.b32.xlu0 %v5025_v35, %s4742_s28 }
  0xd4   : > { %v4038_v44 = vpop.permute.xlu2 %4037  ;;  %v5065_v45 = vpop.permute.xlu1 %3987 }
  0xd5   : > { %v4040_v46 = vunpack.i.h.bf16 %v4038_v44  ;;  %v4039_v47 = vunpack.i.l.bf16 %v4038_v44  ;;  %v5068_v48 = vpop.permute.xlu0 %3982 }
  0xd6   : > { %v7851_v51 = vunpack.i.h.bf16 %v5068_v48  ;;  %v7850_v52 = vunpack.i.l.bf16 %v5068_v48 }
  0xd7   : > { %v5077_v53 = vsel %vm332_vm0, %v4039_v47, %v4040_v46 }
  0xd8   : > { %v321_v56 = vsel %vm319_vm1, %v7850_v52, %v7851_v51  ;;  %1393 = vmatpush.msra.mxu1 %v5077_v53  ;;  %v3697_v52 = vld [vmem:[%s4906_s12 + $0x98] sm:$0xff]  ;;  %v3698_v51 = vld [vmem:[%s4906_s12 + $0xa0] sm:$0xff] }
  0xd9   : > { %1437 = vmatpush.msra.mxu3 %v321_v56 }
  0xda   : > { %4217 = vrot.lane.b32.xlu2 %v5027_v36, %s4743_s29  ;;  %4212 = vrot.lane.b32.xlu1 %v5025_v35, %s4743_s29 }
  0xdb   : > { %4207 = vrot.lane.b32.xlu0 %v5027_v36, %s4741_s27  ;;  %1438 = vmatpush.msra.mxu3 %v308_v57 }
  0xdc   : > { %v5101_v58 = vpop.permute.xlu2 %4052  ;;  %v5103_v59 = vpop.permute.xlu1 %4002 }
  0xdd   : > { %v5113_v63 = vpop.permute.xlu0 %3997  ;;  %1439 = vmatpush.msra.mxu3 %v295_v60  ;;  %v3980_v60 = vunpack.i.h.bf16 %v5001_v21  ;;  %v4005_v54 = vunpack.i.h.bf16 %v5103_v59 }
  0xde   : > { %v4000_v2 = vunpack.i.h.bf16 %v5113_v63  ;;  %v3999_v32 = vunpack.i.l.bf16 %v5113_v63 }
  0xdf   : > { %1440 = vmatpush.msra.mxu3 %v4909_v0  ;;  %v280_v0 = vsel %vm277_vm4, %v7844_v61, %v7845_v62  ;;  %v3960_v61 = vunpack.i.h.bf16 %v5043_v39  ;;  %v3950_v62 = vunpack.i.h.bf16 %v4990_v18 }
  0xe0   : > { %v5122_v12 = vsel %vm332_vm0, %v4000_v2, %v4039_v47  ;;  %v5126_v13 = vsel %vm332_vm0, %v4040_v46, %v4000_v2  ;;  %v5169_v46 = vpack.i.bf16 %v3693_v27, %v3692_v25  ;;  %v241_v47 = vsel %vm238_vm7, %v7838_v19, %v7839_v37 }
  0xe1   : > { %1373 = vmatpush.msra.mxu0 %v5122_v12  ;;  %1413 = vmatpush.msra.mxu2 %v5126_v13  ;;  %v3990_v2 = vunpack.i.h.bf16 %v5065_v45  ;;  %v4024_v37 = vunpack.i.l.bf16 %v5053_v41 }
  0xe2   : > { %1441 = vmatpush.msra.mxu3 %v280_v0  ;;  %4232 = vrot.lane.b32.xlu2 %v5025_v35, %s4744_s11 }
  0xe3   : > { %4227 = vrot.lane.b32.xlu1 %v5027_v36, %s4745_s23  ;;  %4222 = vrot.lane.b32.xlu0 %v5025_v35, %s4745_s23  ;;  %v254_v35 = vsel %vm251_vm6, %v7840_v16, %v7841_v14  ;;  %v3970_v16 = vunpack.i.h.bf16 %v5057_v43 }
  0xe4   : > { %1442 = vmatpush.msra.mxu3 %v267_v24  ;;  %v5155_v28 = vpop.permute.xlu2 %4067  ;;  %v5157_v29 = vpop.permute.xlu1 %4017 }
  0xe5   : > { %v5160_v44 = vpop.permute.xlu0 %4012  ;;  %v5233_v8 = vsel %vm293_vm3, %v3970_v16, %v4024_v37 }
  0xe6   : > { %1443 = vmatpush.msra.mxu3 %v254_v35  ;;  %v4014_v55 = vunpack.i.l.bf16 %v5160_v44 }
  0xe8   : > { %1444 = vmatpush.msra.mxu3 %v241_v47 }
  0xea   : > { %4247 = vrot.lane.b32.xlu2 %v5169_v46, %s4739_s25 }
  0xeb   : > { %4242 = vrot.lane.b32.xlu1 %v5169_v46, %s4740_s26  ;;  %4237 = vrot.lane.b32.xlu0 %v5027_v36, %s4744_s11 }
  0xec   : > { %v5183_v56 = vpop.permute.xlu2 %4082  ;;  %v4033_v57 = vpop.permute.xlu1 %4032 }
  0xed   : > { %v4035_v0 = vunpack.i.h.bf16 %v4033_v57  ;;  %v4034_v24 = vunpack.i.l.bf16 %v4033_v57  ;;  %v4028_v25 = vpop.permute.xlu0 %4027  ;;  %v4025_v57 = vunpack.i.h.bf16 %v5053_v41 }
  0xee   : > { %v4029_v27 = vunpack.i.l.bf16 %v4028_v25  ;;  %v4030_v35 = vunpack.i.h.bf16 %v4028_v25 }
  0xef   : > { %v5189_v47 = vsel %vm319_vm1, %v3990_v2, %v4034_v24  ;;  %v5193_v19 = vsel %vm319_vm1, %v4034_v24, %v4035_v0  ;;  %v5197_v36 = vsel %vm319_vm1, %v4035_v0, %v3990_v2  ;;  %v4020_v0 = vunpack.i.h.bf16 %v5157_v29 }
  0xf0   : > { %1374 = vmatpush.msra.mxu0 %v5189_v47  ;;  %1394 = vmatpush.msra.mxu1 %v5193_v19  ;;  %v5207_v24 = vsel %vm306_vm2, %v3980_v60, %v4029_v27  ;;  %v5218_v41 = vsel %vm306_vm2, %v4029_v27, %v4030_v35  ;;  %v5222_v2 = vsel %vm306_vm2, %v4030_v35, %v3980_v60  ;;  %v4019_v27 = vunpack.i.l.bf16 %v5157_v29 }
  0xf1   : > { %1414 = vmatpush.msra.mxu2 %v5197_v36  ;;  %v5241_v60 = vsel %vm293_vm3, %v4024_v37, %v4025_v57  ;;  %v5245_v35 = vsel %vm293_vm3, %v4025_v57, %v3970_v16  ;;  %v4015_v29 = vunpack.i.h.bf16 %v5160_v44  ;;  %v5258_v16 = vsel %vm277_vm4, %v4020_v0, %v3960_v61 }
  0xf2   : > { %4262 = vrot.lane.b32.xlu2 %v5169_v46, %s4741_s27  ;;  %1375 = vmatpush.msra.mxu0 %v5207_v24  ;;  %8013 = vst [vmem:[#allocation20_spill] sm:$0xff] %v5245_v35  ;;  %v3940_v37 = vunpack.i.h.bf16 %v5018_v31  ;;  %v4010_v57 = vunpack.i.h.bf16 %v5041_v38  ;;  %v5269_v44 = vsel %vm277_vm4, %v4019_v27, %v4020_v0  ;;  %v3696_v0 = vld [vmem:[%s4906_s12 + $0x90] sm:$0xff] }
  0xf3   : > { %4257 = vrot.lane.b32.xlu1 %v5169_v46, %s4742_s28  ;;  %4252 = vrot.lane.b32.xlu0 %v5169_v46, %s4738_s21  ;;  %8014 = vst [vmem:[#allocation21_spill] sm:$0xff] %v5269_v44  ;;  %v5294_v50 = vsel %vm264_vm5, %v4014_v55, %v4015_v29  ;;  %v5329_v17 = vpack.i.bf16 %v3697_v52, %v3696_v0  ;;  %v8018_v52 = vunpack.i.l.bf16 %v5016_v30 }
  0xf4   : > { %1395 = vmatpush.msra.mxu1 %v5218_v41  ;;  %1415 = vmatpush.msra.mxu2 %v5222_v2  ;;  %v5227_v25 = vpop.permute.xlu2 %4097  ;;  %v5229_v14 = vpop.permute.xlu1 %4047  ;;  %8015 = vst [vmem:[#allocation22_spill] sm:$0xff] %v5294_v50 }
  0xf5   : > { %v5236_v5 = vpop.permute.xlu0 %4042  ;;  %1376 = vmatpush.msra.mxu0 %v5233_v8  ;;  %v335_v0 = vsel %vm332_vm0, %v3999_v32, %v8018_v52 }
  0xf6   : > { %1396 = vmatpush.msra.mxu1 %v5241_v60  ;;  %1416 = vmatpush.msra.mxu2 %v5245_v35  ;;  %v8020_v35 = vunpack.i.l.bf16 %v5068_v48 }
  0xf7   : > { %1377 = vmatpush.msra.mxu0 %v4923_v4  ;;  %v5265_v4 = vsel %vm277_vm4, %v3960_v61, %v4019_v27  ;;  %v5281_v61 = vsel %vm264_vm5, %v4015_v29, %v3950_v62  ;;  %v5290_v27 = vsel %vm264_vm5, %v3950_v62, %v4014_v55  ;;  %v5309_v62 = vsel %vm251_vm6, %v4010_v57, %v3940_v37 }
  0xf8   : > { %1397 = vmatpush.msra.mxu1 %v4940_v6  ;;  %1417 = vmatpush.msra.mxu2 %v4943_v7  ;;  %v4009_v7 = vunpack.i.l.bf16 %v5041_v38  ;;  %v4004_v38 = vunpack.i.l.bf16 %v5103_v59  ;;  %v3930_v59 = vunpack.i.h.bf16 %v5023_v34  ;;  %8016 = vst [vmem:[#allocation23_spill] sm:$0xff] %v5309_v62 }
  0xf9   : > { %1378 = vmatpush.msra.mxu0 %v5258_v16 }
  0xfa   : > { %1398 = vmatpush.msra.mxu1 %v5265_v4  ;;  %1418 = vmatpush.msra.mxu2 %v5269_v44  ;;  %v5316_v29 = vsel %vm251_vm6, %v3940_v37, %v4009_v7  ;;  %v5320_v63 = vsel %vm251_vm6, %v4009_v7, %v4010_v57  ;;  %v5327_v44 = vsel %vm238_vm7, %v4005_v54, %v3930_v59  ;;  %v3979_v7 = vunpack.i.l.bf16 %v5001_v21 }
  0xfb   : > { %4277 = vrot.lane.b32.xlu2 %v5169_v46, %s4744_s11  ;;  %4272 = vrot.lane.b32.xlu1 %v5169_v46, %s4745_s23  ;;  %v5342_v57 = vsel %vm238_vm7, %v4004_v38, %v4005_v54  ;;  %v5356_v54 = vld [vmem:[#allocation6 + $0x8] sm:$0xff]  ;;  %v8019_v21 = vunpack.i.h.bf16 %v5068_v48 }
  0xfc   : > { %4267 = vrot.lane.b32.xlu0 %v5169_v46, %s4743_s29  ;;  %1379 = vmatpush.msra.mxu0 %v5281_v61  ;;  %v5296_v49 = vpop.permute.xlu2 %4112  ;;  %v5311_v55 = vpop.permute.xlu1 %4062 }
  0xfd   : > { %1399 = vmatpush.msra.mxu1 %v5290_v27  ;;  %1419 = vmatpush.msra.mxu2 %v5294_v50  ;;  %v5305_v46 = vpop.permute.xlu0 %4057  ;;  %v3989_v50 = vunpack.i.l.bf16 %v5065_v45  ;;  %v4115_v37 = vunpack.i.h.bf16 %v5296_v49  ;;  %v5338_v45 = vsel %vm238_vm7, %v3930_v59, %v4004_v38  ;;  %v3969_v59 = vunpack.i.l.bf16 %v5057_v43 }
  0xfe   : > { %1380 = vmatpush.msra.mxu0 %v5309_v62  ;;  %v5331_v62 = vpack.i.bf16 %v3701_v33, %v3698_v51  ;;  %v8017_v33 = vunpack.i.h.bf16 %v5016_v30  ;;  %v8021_v43 = vunpack.i.l.bf16 %v5296_v49 }
  0xff   : > { %1400 = vmatpush.msra.mxu1 %v5316_v29  ;;  %1420 = vmatpush.msra.mxu2 %v5320_v63  ;;  %v320_v38 = vsel %vm319_vm1, %v8019_v21, %v3989_v50  ;;  %v322_v30 = vsel %vm319_vm1, %v3989_v50, %v8020_v35  ;;  %v8022_v50 = vunpack.i.h.bf16 %v5055_v42 }
 0x100   : > { %1381 = vmatpush.msra.mxu0 %v5327_v44  ;;  %v333_v51 = vsel %vm332_vm0, %v8017_v33, %v3999_v32  ;;  %v5378_v48 = vsel %vm332_vm0, %v8021_v43, %v4115_v37  ;;  %v8023_v33 = vunpack.i.l.bf16 %v5055_v42  ;;  %v3945_v43 = vunpack.i.h.bf16 %v4981_v15 }
 0x101   : > { %1401 = vmatpush.msra.mxu1 %v5338_v45  ;;  %1421 = vmatpush.msra.mxu2 %v5342_v57  ;;  %v307_v35 = vsel %vm306_vm2, %v8022_v50, %v3979_v7 }
 0x102   : > { %1456 = vmatpush.msrb.mxu0 %v333_v51  ;;  %v309_v51 = vsel %vm306_vm2, %v3979_v7, %v8023_v33  ;;  %3715 = vmatmul.msk.f32.vlgmr.msra.gmra.mxu1 %vm1362_vm8, %v5356_v54 }
 0x103   : > { %1476 = vmatpush.msrb.mxu1 %v335_v0  ;;  %4292 = vrot.lane.b32.xlu2 %v5329_v17, %s4739_s25  ;;  %v8024_v0 = vunpack.i.h.bf16 %v4996_v20 }
 0x104   : > { %4287 = vrot.lane.b32.xlu1 %v5331_v62, %s4740_s26  ;;  %1457 = vmatpush.msrb.mxu0 %v320_v38  ;;  %v5370_v32 = vpop.permute.xlu2 %4127  ;;  %v3955_v38 = vunpack.i.h.bf16 %v5045_v40  ;;  %v5406_v7 = vpop.permute.xlu1 %4077 }
 0x105   : > { %1477 = vmatpush.msrb.mxu1 %v322_v30  ;;  %4282 = vrot.lane.b32.xlu0 %v5329_v17, %s4740_s26  ;;  %v5390_v52 = vpop.permute.xlu0 %4072  ;;  %v294_v21 = vsel %vm293_vm3, %v8024_v0, %v3969_v59  ;;  %v8025_v30 = vunpack.i.l.bf16 %v4996_v20  ;;  %v3935_v20 = vunpack.i.h.bf16 %v5003_v22  ;;  %v8029_v0 = vunpack.i.l.bf16 %v4990_v18 }
 0x106   : > { %1458 = vmatpush.msrb.mxu0 %v307_v35  ;;  %1526 = vmatpush.msrb.mxu2 %v5378_v48  ;;  %v8027_v35 = vunpack.i.l.bf16 %v5043_v39  ;;  %v8028_v39 = vunpack.i.l.bf16 %v4981_v15 }
 0x107   : > { %1478 = vmatpush.msrb.mxu1 %v309_v51  ;;  %v296_v42 = vsel %vm293_vm3, %v3969_v59, %v8025_v30  ;;  %3714 = vmatmul.msk.f32.vlgmr.msra.gmra.mxu0 %vm1362_vm8, %v5356_v54  ;;  %v8026_v59 = vunpack.i.l.bf16 %v5045_v40  ;;  %v3925_v40 = vunpack.i.h.bf16 %v5005_v23  ;;  %v8030_v30 = vunpack.i.l.bf16 %v5003_v22 }
 0x108   : > { %1459 = vmatpush.msrb.mxu0 %v294_v21  ;;  %3716 = vmatmul.msk.f32.vlgmr.msra.gmra.mxu2 %vm1362_vm8, %v5356_v54  ;;  %v278_v33 = vsel %vm277_vm4, %v3955_v38, %v8027_v35  ;;  %v266_v51 = vsel %vm264_vm5, %v8028_v39, %v3945_v43  ;;  %v265_v21 = vsel %vm264_vm5, %v3945_v43, %v8029_v0  ;;  %v8032_v43 = vunpack.i.l.bf16 %v5005_v23 }
 0x109   : > { %1479 = vmatpush.msrb.mxu1 %v296_v42  ;;  %v279_v50 = vsel %vm277_vm4, %v8026_v59, %v3955_v38  ;;  %v253_v15 = vsel %vm251_vm6, %v8030_v30, %v3935_v20  ;;  %v8031_v42 = vunpack.i.l.bf16 %v5018_v31  ;;  %v4084_v0 = vunpack.i.l.bf16 %v5183_v56 }
 0x10a   : > { %1460 = vmatpush.msrb.mxu0 %v4912_v1  ;;  %v240_v59 = vsel %vm238_vm7, %v8032_v43, %v3925_v40 }
 0x10b   : > { %1480 = vmatpush.msrb.mxu1 %v4920_v3  ;;  %4307 = vrot.lane.b32.xlu2 %v5331_v62, %s4738_s21  ;;  %v5428_v3 = vld [vmem:[#allocation6] sm:$0xff]  ;;  %v252_v18 = vsel %vm251_vm6, %v3935_v20, %v8031_v42 }
 0x10c   : > { %4302 = vrot.lane.b32.xlu1 %v5329_v17, %s4738_s21  ;;  %1461 = vmatpush.msrb.mxu0 %v279_v50  ;;  %v5426_v1 = vpop.permute.xlu2 %4142  ;;  %v8033_v50 = vunpack.i.l.bf16 %v5023_v34  ;;  %v5461_v35 = vpop.permute.xlu1 %4092 }
 0x10d   : > { %1481 = vmatpush.msrb.mxu1 %v278_v33  ;;  %4297 = vrot.lane.b32.xlu0 %v5331_v62, %s4739_s25  ;;  %v5441_v38 = vpop.permute.xlu0 %4087  ;;  %v4095_v33 = vunpack.i.h.bf16 %v5461_v35 }
 0x10e   : > { %3717 = vmatmul.msk.f32.vlgmr.msra.gmra.mxu3 %vm1362_vm8, %v5428_v3  ;;  %1462 = vmatpush.msrb.mxu0 %v266_v51  ;;  %v239_v22 = vsel %vm238_vm7, %v3925_v40, %v8033_v50  ;;  %v4094_v40 = vunpack.i.l.bf16 %v5461_v35  ;;  %v4085_v51 = vunpack.i.h.bf16 %v5183_v56 }
 0x10f   : > { %1482 = vmatpush.msrb.mxu1 %v265_v21 }
 0x110   : > { %1463 = vmatpush.msrb.mxu0 %v253_v15  ;;  %v5488_v21 = vsel %vm306_vm2, %v4094_v40, %v4095_v33  ;;  %v5508_v43 = vsel %vm293_vm3, %v4084_v0, %v4085_v51 }
 0x111   : > { %1483 = vmatpush.msrb.mxu1 %v252_v18  ;;  %8034 = vst [vmem:[#allocation24_spill] sm:$0xff] %v5488_v21 }
 0x112   : > { %1464 = vmatpush.msrb.mxu0 %v240_v59  ;;  %8036 = vst [vmem:[#allocation26_spill] sm:$0xff] %v5508_v43  ;;  %v8038_v59 = vunpack.i.l.bf16 %v5296_v49  ;;  %v4099_v49 = vunpack.i.l.bf16 %v5227_v25 }
 0x113   : > { %1484 = vmatpush.msrb.mxu1 %v239_v22  ;;  %4322 = vrot.lane.b32.xlu2 %v5329_v17, %s4744_s11 }
 0x114   : > { %4317 = vrot.lane.b32.xlu1 %v5331_v62, %s4742_s28  ;;  %v5467_v31 = vpop.permute.xlu2 %4157  ;;  %3718 = vmatmul.msk.f32.vlgmr.msrb.gmra.mxu0 %vm1362_vm8, %v5428_v3  ;;  %v5494_v30 = vpop.permute.xlu1 %4107 }
 0x115   : > { %1657 = vmatpush.msra.mxu1 %v5378_v48  ;;  %4312 = vrot.lane.b32.xlu0 %v5329_v17, %s4742_s28  ;;  %v4103_v23 = vpop.permute.xlu0 %4102  ;;  %v4109_v35 = vunpack.i.l.bf16 %v5494_v30 }
 0x116   : > { %3719 = vmatmul.msk.f32.vlgmr.msrb.gmra.mxu1 %vm1362_vm8, %v5428_v3  ;;  %v4105_v34 = vunpack.i.h.bf16 %v4103_v23  ;;  %v4104_v20 = vunpack.i.l.bf16 %v4103_v23 }
 0x118   : > { %v5480_v39 = vsel %vm319_vm1, %v4104_v20, %v4105_v34  ;;  %v5568_v42 = vsel %vm319_vm1, %v4109_v35, %v4104_v20  ;;  %v5589_v20 = vsel %vm306_vm2, %v4095_v33, %v4099_v49 }
 0x119   : > { %1527 = vmatpush.msrb.mxu2 %v5480_v39  ;;  %1658 = vmatpush.msra.mxu1 %v5480_v39 }
 0x11b   : > { %4337 = vrot.lane.b32.xlu2 %v5331_v62, %s4745_s23  ;;  %1528 = vmatpush.msrb.mxu2 %v5488_v21 }
 0x11c   : > { %4332 = vrot.lane.b32.xlu1 %v5329_v17, %s4745_s23  ;;  %1659 = vmatpush.msra.mxu1 %v5488_v21  ;;  %v5498_v56 = vpop.permute.xlu2 %4172  ;;  %v5597_v21 = vpop.permute.xlu1 %4122 }
 0x11d   : > { %8035 = vst [vmem:[#allocation25_spill] sm:$0xff] %v5498_v56  ;;  %4327 = vrot.lane.b32.xlu0 %v5331_v62, %s4744_s11  ;;  %v5504_v18 = vpop.permute.xlu0 %4117  ;;  %1529 = vmatpush.msrb.mxu2 %v5508_v43  ;;  %v8039_v56 = vunpack.i.l.bf16 %v5390_v52 }
 0x11e   : > { %v4119_v50 = vunpack.i.l.bf16 %v5504_v18  ;;  %1660 = vmatpush.msra.mxu1 %v5508_v43 }
 0x11f   : > { %1530 = vmatpush.msrb.mxu2 %v4956_v9 }
 0x120   : > { %1661 = vmatpush.msra.mxu1 %v4956_v9  ;;  %v5522_v23 = vsel %vm332_vm0, %v4115_v37, %v4119_v50  ;;  %v5528_v15 = vsel %vm332_vm0, %v4119_v50, %v8038_v59  ;;  %v8040_v9 = vunpack.i.l.bf16 %v5406_v7  ;;  %v8043_v50 = vunpack.i.l.bf16 %v5155_v28 }
 0x121   : > { %8037 = vst [vmem:[#allocation27_spill] sm:$0xff] %v5522_v23  ;;  %1546 = vmatpush.msrb.mxu3 %v5522_v23  ;;  %1566 = vmatpush.msra.mxu0 %v5528_v15  ;;  %v5561_v37 = vsel %vm319_vm1, %v4105_v34, %v4109_v35  ;;  %v4089_v59 = vunpack.i.l.bf16 %v5441_v38  ;;  %v8047_v34 = vunpack.i.l.bf16 %v5101_v58  ;;  %v3702_v35 = vld [vmem:[%s4906_s12 + $0xb0] sm:$0xff] }
 0x122   : > { %v5538_v43 = vsel %vm277_vm4, %v8040_v9, %v8039_v56  ;;  %v8042_v56 = vunpack.i.l.bf16 %v5311_v55  ;;  %8045 = vst [vmem:[#allocation30_spill] sm:$0xff] %v5561_v37 }
 0x123   : > { %8041 = vst [vmem:[#allocation28_spill] sm:$0xff] %v5538_v43  ;;  %1531 = vmatpush.msrb.mxu2 %v5538_v43  ;;  %1662 = vmatpush.msra.mxu1 %v5538_v43 }
 0x124   : > { %4352 = vrot.lane.b32.xlu2 %v5329_v17, %s4741_s27  ;;  %4347 = vrot.lane.b32.xlu1 %v5331_v62, %s4743_s29  ;;  %v5557_v9 = vsel %vm264_vm5, %v8043_v50, %v8042_v56  ;;  %v5570_v22 = vpop.permute.xlu2 %4187  ;;  %v8048_v50 = vunpack.i.l.bf16 %v5305_v46 }
 0x125   : > { %8044 = vst [vmem:[#allocation29_spill] sm:$0xff] %v5557_v9  ;;  %1532 = vmatpush.msrb.mxu2 %v5557_v9  ;;  %1547 = vmatpush.msrb.mxu3 %v5561_v37  ;;  %v5575_v56 = vpop.permute.xlu0 %4132 }
 0x126   : > { %8046 = vst [vmem:[#allocation31_spill] sm:$0xff] %v5570_v22  ;;  %4342 = vrot.lane.b32.xlu0 %v5329_v17, %s4743_s29  ;;  %1567 = vmatpush.msra.mxu0 %v5568_v42  ;;  %v5583_v43 = vsel %vm251_vm6, %v8048_v50, %v8047_v34  ;;  %v5593_v17 = vsel %vm306_vm2, %v4099_v49, %v4094_v40  ;;  %v3703_v22 = vld [vmem:[%s4906_s12 + $0xb8] sm:$0xff]  ;;  %v8049_v34 = vunpack.i.l.bf16 %v5236_v5  ;;  %v8050_v50 = vunpack.i.l.bf16 %v5229_v14 }
 0x127   : > { %1663 = vmatpush.msra.mxu1 %v5557_v9  ;;  %1533 = vmatpush.msrb.mxu2 %v5583_v43  ;;  %v5613_v40 = vsel %vm293_vm3, %v4085_v51, %v4089_v59  ;;  %v5617_v49 = vsel %vm293_vm3, %v4089_v59, %v4084_v0  ;;  %v4366_v9 = vpack.i.bf16 %v3703_v22, %v3702_v35  ;;  %v4065_v51 = vunpack.i.h.bf16 %v5311_v55 }
 0x128   : > { %1548 = vmatpush.msrb.mxu3 %v5589_v20  ;;  %1568 = vmatpush.msra.mxu0 %v5593_v17  ;;  %v5607_v33 = vsel %vm238_vm7, %v8050_v50, %v8049_v34  ;;  %8051 = vst [vmem:[#allocation32_spill] sm:$0xff] %v5613_v40  ;;  %v4075_v34 = vunpack.i.h.bf16 %v5390_v52  ;;  %v4055_v50 = vunpack.i.h.bf16 %v5101_v58 }
 0x129   : > { %1664 = vmatpush.msra.mxu1 %v5583_v43  ;;  %1534 = vmatpush.msrb.mxu2 %v5607_v33 }
 0x12a   : > { %1549 = vmatpush.msrb.mxu3 %v5613_v40  ;;  %1569 = vmatpush.msra.mxu0 %v5617_v49 }
 0x12b   : > { %1665 = vmatpush.msra.mxu1 %v5607_v33  ;;  %1677 = vmatpush.msra.mxu2 %v5522_v23  ;;  %v4045_v23 = vunpack.i.h.bf16 %v5236_v5 }
 0x12c   : > { %1550 = vmatpush.msrb.mxu3 %v4960_v10  ;;  %1570 = vmatpush.msra.mxu0 %v4963_v11  ;;  %v5629_v0 = vpop.permute.xlu2 %4202 }
 0x12d   : > { %1737 = vmatpush.msrb.mxu1 %v5077_v53  ;;  %1678 = vmatpush.msra.mxu2 %v5561_v37  ;;  %8052 = vst [vmem:[#allocation33_spill] sm:$0xff] %v5629_v0  ;;  %v5633_v59 = vpop.permute.xlu0 %4147  ;;  %v8053_v53 = vunpack.i.l.bf16 %v5390_v52  ;;  %v8054_v0 = vunpack.i.l.bf16 %v5406_v7 }
 0x12e   : > { %4367 = vrot.lane.b32.xlu2 %v4366_v9, %s4745_s23  ;;  %4362 = vrot.lane.b32.xlu1 %v4366_v9, %s4744_s11 }
 0x12f   : > { %1738 = vmatpush.msrb.mxu1 %v5193_v19  ;;  %4357 = vrot.lane.b32.xlu0 %v5331_v62, %s4741_s27  ;;  %v5643_v37 = vsel %vm277_vm4, %v8053_v53, %v4075_v34  ;;  %v5649_v19 = vsel %vm277_vm4, %v4075_v34, %v8054_v0  ;;  %v8055_v62 = vunpack.i.l.bf16 %v5311_v55  ;;  %v8056_v53 = vunpack.i.l.bf16 %v5155_v28  ;;  %v5668_v0 = vpop.permute.xlu1 %4137 }
 0x130   : > { %1551 = vmatpush.msrb.mxu3 %v5643_v37  ;;  %1571 = vmatpush.msra.mxu0 %v5649_v19 }
 0x131   : > { %1679 = vmatpush.msra.mxu2 %v5589_v20  ;;  %1739 = vmatpush.msrb.mxu1 %v5218_v41  ;;  %v5660_v52 = vsel %vm264_vm5, %v8055_v62, %v4065_v51  ;;  %v5666_v34 = vsel %vm264_vm5, %v4065_v51, %v8056_v53  ;;  %v8057_v41 = vunpack.i.l.bf16 %v5101_v58  ;;  %v8058_v62 = vunpack.i.l.bf16 %v5305_v46  ;;  %v5688_v53 = vld [vmem:[#allocation6 + $0x10] sm:$0xff] }
 0x132   : > { %1552 = vmatpush.msrb.mxu3 %v5660_v52  ;;  %1572 = vmatpush.msra.mxu0 %v5666_v34  ;;  %v8060_v58 = vunpack.i.l.bf16 %v5236_v5 }
 0x133   : > { %1680 = vmatpush.msra.mxu2 %v5613_v40  ;;  %1740 = vmatpush.msrb.mxu1 %v5241_v60  ;;  %v5678_v55 = vsel %vm251_vm6, %v8057_v41, %v4055_v50  ;;  %v5684_v51 = vsel %vm251_vm6, %v4055_v50, %v8058_v62  ;;  %v8061_v41 = vunpack.i.l.bf16 %v5229_v14  ;;  %v4381_v62 = vpack.i.bf16 %v3702_v35, %v3703_v22  ;;  %v3706_v35 = vld [vmem:[%s4906_s12 + $0xc0] sm:$0xff] }
 0x134   : > { %8059 = vst [vmem:[#allocation34_spill] sm:$0xff] %v5684_v51  ;;  %1553 = vmatpush.msrb.mxu3 %v5678_v55  ;;  %1573 = vmatpush.msra.mxu0 %v5684_v51  ;;  %v5696_v60 = vsel %vm238_vm7, %v8060_v58, %v4045_v23  ;;  %v5704_v40 = vpop.permute.xlu2 %4217  ;;  %v7871_v22 = vunpack.i.h.bf16 %v5441_v38  ;;  %v3707_v58 = vld [vmem:[%s4906_s12 + $0xc8] sm:$0xff] }
 0x135   : > { %1681 = vmatpush.msra.mxu2 %v4960_v10  ;;  %1741 = vmatpush.msrb.mxu1 %v4940_v6  ;;  %v5702_v50 = vsel %vm238_vm7, %v4045_v23, %v8061_v41  ;;  %v5713_v6 = vpop.permute.xlu0 %4162  ;;  %v8066_v41 = vld [vmem:[#allocation20_spill] sm:$0xff] }
 0x136   : > { %8062 = vst [vmem:[#allocation35_spill] sm:$0xff] %v5702_v50  ;;  %1554 = vmatpush.msrb.mxu3 %v5696_v60  ;;  %1574 = vmatpush.msra.mxu0 %v5702_v50 }
 0x137   : > { %3720 = vmatmul.msk.f32.vlgmr.msrb.gmra.mxu2 %vm1362_vm8, %v5688_v53  ;;  %1742 = vmatpush.msrb.mxu1 %v5265_v4  ;;  %v5722_v10 = vpop.permute.xlu1 %4152  ;;  %v4120_v4 = vunpack.i.h.bf16 %v5504_v18  ;;  %v7870_v18 = vunpack.i.h.bf16 %v5426_v1 }
 0x138   : > { %1697 = vmatpush.msra.mxu3 %v5528_v15  ;;  %1682 = vmatpush.msra.mxu2 %v5643_v37 }
 0x139   : > { %1717 = vmatpush.msrb.mxu0 %v5122_v12  ;;  %4382 = vrot.lane.b32.xlu2 %v4381_v62, %s4742_s28  ;;  %v4160_v12 = vunpack.i.h.bf16 %v5467_v31 }
 0x13a   : > { %4377 = vrot.lane.b32.xlu1 %v4366_v9, %s4741_s27  ;;  %4372 = vrot.lane.b32.xlu0 %v4366_v9, %s4743_s29 }
 0x13b   : > { %3721 = vmatmul.msk.f32.vlgmr.msrb.gmra.mxu3 %vm1362_vm8, %v5688_v53  ;;  %1683 = vmatpush.msra.mxu2 %v5660_v52 }
 0x13c   : > { %1698 = vmatpush.msra.mxu3 %v5568_v42  ;;  %1718 = vmatpush.msrb.mxu0 %v5189_v47  ;;  %v5728_v5 = vpop.permute.xlu2 %4232  ;;  %v4155_v47 = vunpack.i.h.bf16 %v5722_v10 }
 0x13d   : > { %1743 = vmatpush.msrb.mxu1 %v5290_v27  ;;  %1684 = vmatpush.msra.mxu2 %v5678_v55  ;;  %v5749_v27 = vpop.permute.xlu0 %4177 }
 0x13e   : > { %1699 = vmatpush.msra.mxu3 %v5593_v17  ;;  %1719 = vmatpush.msrb.mxu0 %v5207_v24  ;;  %v5745_v24 = vsel %vm332_vm0, %v4160_v12, %v4120_v4 }
 0x13f   : > { %1744 = vmatpush.msrb.mxu1 %v5316_v29  ;;  %1685 = vmatpush.msra.mxu2 %v5696_v60  ;;  %v4150_v29 = vunpack.i.h.bf16 %v5633_v59  ;;  %v5768_v23 = vpop.permute.xlu1 %4167 }
 0x140   : > { %1700 = vmatpush.msra.mxu3 %v5617_v49  ;;  %1720 = vmatpush.msrb.mxu0 %v5233_v8  ;;  %v4110_v8 = vunpack.i.h.bf16 %v5494_v30  ;;  %8064 = vst [vmem:[#allocation37_spill] sm:$0xff] %v5768_v23  ;;  %v8089_v23 = vunpack.i.l.bf16 %v5668_v0 }
 0x141   : > { %1745 = vmatpush.msrb.mxu1 %v5338_v45  ;;  %1757 = vmatpush.msrb.mxu2 %v5126_v13  ;;  %v4513_v13 = vld [vmem:[%s4906_s12 + $0x18] sm:$0xff]  ;;  %v7869_v45 = vunpack.i.h.bf16 %v5227_v25 }
 0x142   : > { %3723 = vmatmul.msk.f32.vlgmr.msra.gmra.mxu1 %vm1362_vm8, %v5356_v54  ;;  %3722 = vmatmul.msk.f32.vlgmr.msra.gmra.mxu0 %vm1362_vm8, %v5688_v53  ;;  %v5764_v30 = vsel %vm319_vm1, %v4155_v47, %v4110_v8 }
 0x143   : > { %1844 = vmatpush.msra.mxu1 %v5745_v24  ;;  %1701 = vmatpush.msra.mxu3 %v4963_v11  ;;  %v5778_v9 = vsel %vm306_vm2, %v4150_v29, %v7869_v45  ;;  %v8068_v45 = vld [vmem:[#allocation19_spill] sm:$0xff] }
 0x144   : > { %1721 = vmatpush.msrb.mxu0 %v4513_v13  ;;  %4397 = vrot.lane.b32.xlu2 %v4381_v62, %s4740_s26  ;;  %v5766_v11 = vpop.permute.xlu2 %4247  ;;  %v4514_v13 = vld [vmem:[%s4906_s12 + $0x28] sm:$0xff] }
 0x145   : > { %4392 = vrot.lane.b32.xlu1 %v4381_v62, %s4739_s25  ;;  %4387 = vrot.lane.b32.xlu0 %v4381_v62, %s4738_s21  ;;  %8063 = vst [vmem:[#allocation36_spill] sm:$0xff] %v5766_v11  ;;  %v8067_v62 = vld [vmem:[#allocation23_spill] sm:$0xff] }
 0x146   : > { %1758 = vmatpush.msrb.mxu2 %v5197_v36  ;;  %1845 = vmatpush.msra.mxu1 %v5764_v30  ;;  %v5792_v36 = vsel %vm293_vm3, %v7870_v18, %v7871_v22 }
 0x147   : > { %1702 = vmatpush.msra.mxu3 %v5649_v19  ;;  %1722 = vmatpush.msrb.mxu0 %v5258_v16  ;;  %8065 = vst [vmem:[#allocation38_spill] sm:$0xff] %v5792_v36  ;;  %v4159_v16 = vunpack.i.l.bf16 %v5467_v31  ;;  %v5808_v31 = vpop.permute.xlu0 %4192 }
 0x148   : > { %1759 = vmatpush.msrb.mxu2 %v5222_v2  ;;  %1846 = vmatpush.msra.mxu1 %v5778_v9  ;;  %v5797_v2 = vpack.i.bf16 %v3707_v58, %v3706_v35  ;;  %v7872_v35 = vunpack.i.l.bf16 %v5668_v0 }
 0x149   : > { %1703 = vmatpush.msra.mxu3 %v5666_v34  ;;  %1723 = vmatpush.msrb.mxu0 %v5281_v61  ;;  %v4154_v61 = vunpack.i.l.bf16 %v5722_v10  ;;  %v5806_v18 = vsel %vm332_vm0, %v4159_v16, %v4160_v12  ;;  %v4149_v10 = vunpack.i.l.bf16 %v5633_v59  ;;  %v5822_v12 = vsel %vm332_vm0, %v4120_v4, %v4159_v16  ;;  %v8072_v16 = vld [vmem:[#allocation22_spill] sm:$0xff] }
 0x14a   : > { %1760 = vmatpush.msrb.mxu2 %v8066_v41  ;;  %1847 = vmatpush.msra.mxu1 %v5792_v36  ;;  %v7873_v41 = vunpack.i.h.bf16 %v5668_v0  ;;  %8070 = vst [vmem:[#allocation20_spill] sm:$0xff] %v5822_v12  ;;  %v4144_v4 = vunpack.i.l.bf16 %v5426_v1 }
 0x14b   : > { %1704 = vmatpush.msra.mxu3 %v5684_v51  ;;  %1724 = vmatpush.msrb.mxu0 %v8067_v62  ;;  %v5826_v62 = vsel %vm319_vm1, %v4154_v61, %v4155_v47  ;;  %v5841_v47 = vpop.permute.xlu1 %4182  ;;  %v5851_v22 = vsel %vm306_vm2, %v4149_v10, %v4150_v29  ;;  %v5869_v29 = vld [vmem:[%s4906_s12 + $0xd8] sm:$0xff]  ;;  %v4124_v51 = vunpack.i.l.bf16 %v5597_v21 }
 0x14c   : > { %1761 = vmatpush.msrb.mxu2 %v4514_v13  ;;  %1848 = vmatpush.msra.mxu1 %v8068_v45  ;;  %v5814_v58 = vpop.permute.xlu2 %4262  ;;  %v8069_v45 = vld [vmem:[#allocation21_spill] sm:$0xff]  ;;  %v7876_v13 = vunpack.i.h.bf16 %v5575_v56  ;;  %v5838_v59 = vsel %vm277_vm4, %v7872_v35, %v7873_v41  ;;  %8076 = vst [vmem:[#allocation22_spill] sm:$0xff] %v5869_v29  ;;  %v8077_v41 = vunpack.i.h.bf16 %v5227_v25  ;;  %v8080_v25 = vunpack.i.h.bf16 %v5441_v38 }
 0x14d   : > { %1705 = vmatpush.msra.mxu3 %v5702_v50  ;;  %1725 = vmatpush.msrb.mxu0 %v5327_v44  ;;  %8071 = vst [vmem:[#allocation23_spill] sm:$0xff] %v5838_v59  ;;  %v4130_v44 = vunpack.i.h.bf16 %v5370_v32  ;;  %v4125_v50 = vunpack.i.h.bf16 %v5597_v21  ;;  %v8081_v21 = vunpack.i.h.bf16 %v5426_v1 }
 0x14e   : > { %4412 = vrot.lane.b32.xlu2 %v5797_v2, %s4745_s23  ;;  %1762 = vmatpush.msrb.mxu2 %v8069_v45  ;;  %v5847_v45 = vsel %vm319_vm1, %v4110_v8, %v4154_v61  ;;  %v5866_v61 = vld [vmem:[%s4906_s12 + $0xd0] sm:$0xff]  ;;  %v5877_v35 = vsel %vm306_vm2, %v8077_v41, %v4149_v10 }
 0x14f   : > { %1804 = vmatpush.msrb.mxu3 %v5822_v12  ;;  %1824 = vmatpush.msra.mxu0 %v5806_v18  ;;  %8075 = vst [vmem:[#allocation21_spill] sm:$0xff] %v5866_v61  ;;  %v5901_v41 = vsel %vm293_vm3, %v4144_v4, %v8081_v21  ;;  %v5905_v10 = vpack.i.bf16 %v5869_v29, %v5866_v61  ;;  %v5918_v38 = vpop.permute.xlu0 %4207  ;;  %v4080_v21 = vunpack.i.h.bf16 %v5406_v7  ;;  %v5935_v29 = vld [vmem:[%s4906_s12 + $0x50] sm:$0xff]  ;;  %v4070_v7 = vunpack.i.h.bf16 %v5155_v28 }
 0x150   : > { %1849 = vmatpush.msra.mxu1 %v5838_v59  ;;  %1763 = vmatpush.msrb.mxu2 %v8072_v16  ;;  %v8073_v16 = vunpack.i.l.bf16 %v5575_v56  ;;  %8082 = vst [vmem:[#allocation40_spill] sm:$0xff] %v5901_v41  ;;  %v5913_v1 = vsel %vm238_vm7, %v4124_v51, %v4125_v50  ;;  %v8091_v28 = vunpack.i.l.bf16 %v5766_v11 }
 0x151   : > { %1805 = vmatpush.msrb.mxu3 %v5847_v45  ;;  %1825 = vmatpush.msra.mxu0 %v5826_v62  ;;  %8083 = vst [vmem:[#allocation41_spill] sm:$0xff] %v5913_v1 }
 0x152   : > { %v5863_v8 = vsel %vm264_vm5, %v8073_v16, %v7876_v13  ;;  %1764 = vmatpush.msrb.mxu2 %v5320_v63  ;;  %v8078_v16 = vunpack.i.l.bf16 %v5370_v32  ;;  %v5895_v63 = vsel %vm293_vm3, %v8080_v25, %v4144_v4  ;;  %3727 = vmatmul.msk.f32.vlgmr.msrb.gmra.mxu1 %vm1362_vm8, %v5428_v3  ;;  %8085 = vst [vmem:[#allocation43_spill] sm:$0xff] %v5935_v29  ;;  %v8086_v25 = vunpack.i.h.bf16 %v5766_v11 }
 0x153   : > { %8074 = vst [vmem:[#allocation19_spill] sm:$0xff] %v5863_v8  ;;  %1850 = vmatpush.msra.mxu1 %v5863_v8  ;;  %1806 = vmatpush.msrb.mxu3 %v5877_v35 }
 0x154   : > { %1826 = vmatpush.msra.mxu0 %v5851_v22  ;;  %v5887_v13 = vsel %vm251_vm6, %v8078_v16, %v4130_v44  ;;  %1765 = vmatpush.msrb.mxu2 %v5342_v57  ;;  %v4180_v16 = vunpack.i.h.bf16 %v5749_v27  ;;  %v5931_v57 = vld [vmem:[%s4906_s12 + $0x48] sm:$0xff] }
 0x155   : > { %8079 = vst [vmem:[#allocation39_spill] sm:$0xff] %v5887_v13  ;;  %1851 = vmatpush.msra.mxu1 %v5887_v13  ;;  %1807 = vmatpush.msrb.mxu3 %v5895_v63  ;;  %v5920_v4 = vpop.permute.xlu2 %4277 }
 0x156   : > { %1827 = vmatpush.msra.mxu0 %v5901_v41  ;;  %3724 = vmatmul.msk.f32.vlgmr.msra.gmra.mxu2 %vm1362_vm8, %v5356_v54  ;;  %8084 = vst [vmem:[#allocation42_spill] sm:$0xff] %v5920_v4  ;;  %v5942_v61 = vsel %vm251_vm6, %v8086_v25, %v4180_v16  ;;  %v8088_v4 = vunpack.i.h.bf16 %v5668_v0  ;;  %v5959_v25 = vsel %vm277_vm4, %v4080_v21, %v8089_v23  ;;  %v8093_v0 = vunpack.i.h.bf16 %v5575_v56 }
 0x157   : > { %1852 = vmatpush.msra.mxu1 %v5913_v1  ;;  %1930 = vmatpush.msra.mxu2 %v5822_v12  ;;  %8087 = vst [vmem:[#allocation44_spill] sm:$0xff] %v5942_v61  ;;  %v4060_v61 = vunpack.i.h.bf16 %v5305_v46 }
 0x158   : > { %4427 = vrot.lane.b32.xlu2 %v5905_v10, %s4743_s29  ;;  %1808 = vmatpush.msrb.mxu3 %v5931_v57  ;;  %v5953_v12 = vsel %vm277_vm4, %v8088_v4, %v4080_v21  ;;  %8090 = vst [vmem:[#allocation45_spill] sm:$0xff] %v5959_v25  ;;  %v5977_v23 = vsel %vm264_vm5, %v8093_v0, %v4070_v7  ;;  %v8094_v4 = vld [vmem:[#allocation24_spill] sm:$0xff]  ;;  %v4050_v0 = vunpack.i.h.bf16 %v5229_v14 }
 0x159   : > { %1990 = vmatpush.msrb.mxu1 %v5378_v48  ;;  %1828 = vmatpush.msra.mxu0 %v5935_v29  ;;  %v5945_v48 = vpop.permute.xlu1 %4197  ;;  %v5991_v21 = vsel %vm251_vm6, %v4130_v44, %v4060_v61  ;;  %v6006_v44 = vpop.permute.xlu0 %4222 }
 0x15a   : > { %1931 = vmatpush.msra.mxu2 %v5847_v45  ;;  %1809 = vmatpush.msrb.mxu3 %v5953_v12  ;;  %v6013_v14 = vsel %vm238_vm7, %v4125_v50, %v4050_v0 }
 0x15b   : > { %1991 = vmatpush.msrb.mxu1 %v5480_v39  ;;  %1829 = vmatpush.msra.mxu0 %v5959_v25  ;;  %v5967_v39 = vsel %vm251_vm6, %v4180_v16, %v8091_v28  ;;  %v8095_v16 = vunpack.i.l.bf16 %v5575_v56  ;;  %v8099_v56 = vunpack.i.l.bf16 %v5370_v32  ;;  %v6017_v32 = vsel %vm238_vm7, %v4050_v0, %v4124_v51  ;;  %v8102_v51 = vld [vmem:[#allocation28_spill] sm:$0xff] }
 0x15c   : > { %8092 = vst [vmem:[#allocation46_spill] sm:$0xff] %v5967_v39  ;;  %3725 = vmatmul.msk.f32.vlgmr.msra.gmra.mxu3 %vm1362_vm8, %v5356_v54  ;;  %1932 = vmatpush.msra.mxu2 %v5877_v35  ;;  %v7886_v0 = vunpack.i.h.bf16 %v5814_v58  ;;  %v8110_v39 = vld [vmem:[#allocation33_spill] sm:$0xff] }
 0x15d   : > { %1992 = vmatpush.msrb.mxu1 %v8094_v4  ;;  %1810 = vmatpush.msrb.mxu3 %v5977_v23  ;;  %v5985_v46 = vsel %vm264_vm5, %v4070_v7, %v8095_v16  ;;  %v5993_v28 = vpop.permute.xlu2 %4292  ;;  %v8098_v4 = vld [vmem:[#allocation26_spill] sm:$0xff]  ;;  %v6002_v7 = vsel %vm251_vm6, %v4060_v61, %v8099_v56  ;;  %8101 = vst [vmem:[#allocation48_spill] sm:$0xff] %v6017_v32  ;;  %v8104_v56 = vld [vmem:[#allocation29_spill] sm:$0xff] }
 0x15e   : > { %8096 = vst [vmem:[#allocation24_spill] sm:$0xff] %v5985_v46  ;;  %1830 = vmatpush.msra.mxu0 %v5985_v46  ;;  %1933 = vmatpush.msra.mxu2 %v5895_v63  ;;  %v4517_v16 = vld [vmem:[%s4906_s12 + $0x30] sm:$0xff] }
 0x15f   : > { %8097 = vst [vmem:[#allocation47_spill] sm:$0xff] %v5993_v28  ;;  %1993 = vmatpush.msrb.mxu1 %v8098_v4  ;;  %1811 = vmatpush.msrb.mxu3 %v5991_v21  ;;  %v7887_v4 = vunpack.i.h.bf16 %v5918_v38 }
 0x160   : > { %8100 = vst [vmem:[#allocation26_spill] sm:$0xff] %v6002_v7  ;;  %1831 = vmatpush.msra.mxu0 %v6002_v7  ;;  %1934 = vmatpush.msra.mxu2 %v5931_v57 }
 0x161   : > { %1994 = vmatpush.msrb.mxu1 %v4517_v16  ;;  %4442 = vrot.lane.b32.xlu2 %v5797_v2, %s4742_s28  ;;  %v6025_v61 = vpop.permute.xlu1 %4212  ;;  %v6046_v16 = vpop.permute.xlu0 %4237 }
 0x162   : > { %1812 = vmatpush.msrb.mxu3 %v6013_v14  ;;  %1832 = vmatpush.msra.mxu0 %v6017_v32  ;;  %v7894_v28 = vunpack.i.l.bf16 %v6046_v16 }
 0x163   : > { %3726 = vmatmul.msk.f32.vlgmr.msrb.gmra.mxu0 %vm1362_vm8, %v5428_v3  ;;  %3728 = vmatmul.msk.f32.vlgmr.msrb.gmra.mxu2 %vm1362_vm8, %v5428_v3 }
 0x164   : > { %1935 = vmatpush.msra.mxu2 %v5953_v12  ;;  %1950 = vmatpush.msra.mxu3 %v5806_v18 }
 0x165   : > { %1970 = vmatpush.msrb.mxu0 %v5745_v24  ;;  %1995 = vmatpush.msrb.mxu1 %v8102_v51  ;;  %v6034_v50 = vpop.permute.xlu2 %4307  ;;  %v6056_v51 = vsel %vm293_vm3, %v7886_v0, %v7887_v4  ;;  %v4225_v0 = vunpack.i.h.bf16 %v6006_v44  ;;  %v6074_v4 = vld [vmem:[%s4906_s12 + $0x58] sm:$0xff] }
 0x166   : > { %3729 = vmatmul.msk.f32.vlgmr.msrb.gmra.mxu3 %vm1362_vm8, %v5688_v53  ;;  %1936 = vmatpush.msra.mxu2 %v5977_v23  ;;  %8103 = vst [vmem:[#allocation28_spill] sm:$0xff] %v6034_v50 }
 0x167   : > { %1951 = vmatpush.msra.mxu3 %v5826_v62  ;;  %1971 = vmatpush.msrb.mxu0 %v5764_v30  ;;  %8105 = vst [vmem:[#allocation29_spill] sm:$0xff] %v6056_v51  ;;  %v4215_v51 = vunpack.i.h.bf16 %v6025_v61 }
 0x168   : > { %1996 = vmatpush.msrb.mxu1 %v8104_v56  ;;  %1937 = vmatpush.msra.mxu2 %v5991_v21  ;;  %v8106_v56 = vld [vmem:[#allocation27_spill] sm:$0xff] }
 0x169   : > { %1952 = vmatpush.msra.mxu3 %v5851_v22  ;;  %1972 = vmatpush.msrb.mxu0 %v5778_v9  ;;  %v6066_v50 = vpop.permute.xlu1 %4227  ;;  %8107 = vst [vmem:[#allocation27_spill] sm:$0xff] %v6074_v4 }
 0x16a   : > { %1997 = vmatpush.msrb.mxu1 %v5583_v43  ;;  %1938 = vmatpush.msra.mxu2 %v6013_v14  ;;  %v4235_v43 = vunpack.i.h.bf16 %v5728_v5 }
 0x16b   : > { %1953 = vmatpush.msra.mxu3 %v5901_v41  ;;  %1973 = vmatpush.msrb.mxu0 %v5792_v36  ;;  %v6223_v36 = vld [vmem:[%s4906_s12 + $0x60] sm:$0xff]  ;;  %v8132_v41 = vunpack.i.l.bf16 %v5918_v38 }
 0x16c   : > { %1998 = vmatpush.msrb.mxu1 %v5607_v33  ;;  %4457 = vrot.lane.b32.xlu2 %v5905_v10, %s4738_s21  ;;  %v6089_v33 = vsel %vm332_vm0, %v4235_v43, %v7894_v28  ;;  %v8111_v28 = vld [vmem:[#allocation32_spill] sm:$0xff] }
 0x16d   : > { %2010 = vmatpush.msrb.mxu2 %v8106_v56  ;;  %3730 = vmatmul.msk.f32.vlgmr.msra.gmra.mxu0 %vm1362_vm8, %v5688_v53  ;;  %v8108_v56 = vld [vmem:[#allocation30_spill] sm:$0xff]  ;;  %v6078_v11 = vpop.permute.xlu2 %4322 }
 0x16e   : > { %3731 = vmatmul.msk.f32.vlgmr.msra.gmra.mxu1 %vm1362_vm8, %v5688_v53  ;;  %1954 = vmatpush.msra.mxu3 %v5935_v29  ;;  %8109 = vst [vmem:[#allocation30_spill] sm:$0xff] %v6078_v11  ;;  %v4234_v11 = vunpack.i.l.bf16 %v5728_v5  ;;  %v4164_v29 = vunpack.i.l.bf16 %v5713_v6 }
 0x16f   : > { %1974 = vmatpush.msrb.mxu0 %v6074_v4  ;;  %2011 = vmatpush.msrb.mxu2 %v8108_v56  ;;  %v4224_v56 = vunpack.i.l.bf16 %v6006_v44  ;;  %v8113_v44 = vunpack.i.l.bf16 %v5704_v40  ;;  %v8128_v4 = vunpack.i.l.bf16 %v5704_v40 }
 0x170   : > { %1955 = vmatpush.msra.mxu3 %v5959_v25  ;;  %4407 = vrot.lane.b32.xlu1 %v5905_v10, %s4744_s11  ;;  %v8112_v25 = vunpack.i.l.bf16 %v6066_v50 }
 0x171   : > { %1975 = vmatpush.msrb.mxu0 %v5838_v59  ;;  %2012 = vmatpush.msrb.mxu2 %v5589_v20  ;;  %v4205_v20 = vunpack.i.h.bf16 %v8110_v39  ;;  %v6123_v59 = vsel %vm306_vm2, %v4215_v51, %v8113_v44  ;;  %v6141_v44 = vld [vmem:[%s4906_s12 + $0xe0] sm:$0xff] }
 0x172   : > { %1956 = vmatpush.msra.mxu3 %v5985_v46  ;;  %4402 = vrot.lane.b32.xlu0 %v5797_v2, %s4744_s11  ;;  %v6105_v5 = vsel %vm319_vm1, %v4225_v0, %v8112_v25  ;;  %v6117_v25 = vsel %vm332_vm0, %v4234_v11, %v4235_v43  ;;  %v6138_v43 = vsel %vm319_vm1, %v4224_v56, %v4225_v0 }
 0x173   : > { %1976 = vmatpush.msrb.mxu0 %v5863_v8  ;;  %2013 = vmatpush.msrb.mxu2 %v8111_v28  ;;  %v4519_v28 = vld [vmem:[%s4906_s12 + $0x38] sm:$0xff]  ;;  %8115 = vst [vmem:[#allocation33_spill] sm:$0xff] %v6141_v44 }
 0x174   : > { %2097 = vmatpush.msra.mxu1 %v6089_v33  ;;  %1957 = vmatpush.msra.mxu3 %v6002_v7  ;;  %v4214_v7 = vunpack.i.l.bf16 %v6025_v61  ;;  %v6144_v61 = vld [vmem:[%s4906_s12 + $0xe8] sm:$0xff]  ;;  %v8124_v8 = vld [vmem:[#allocation31_spill] sm:$0xff] }
 0x175   : > { %1977 = vmatpush.msrb.mxu0 %v5887_v13  ;;  %4467 = vrot.lane.b32.xlu2 %v5797_v2, %s4740_s26  ;;  %8116 = vst [vmem:[#allocation32_spill] sm:$0xff] %v6144_v61  ;;  %v6161_v0 = vpack.i.bf16 %v6144_v61, %v6141_v44  ;;  %v4189_v46 = vunpack.i.l.bf16 %v8124_v8 }
 0x176   : > { %2014 = vmatpush.msrb.mxu2 %v4519_v28  ;;  %2098 = vmatpush.msra.mxu1 %v6105_v5  ;;  %v8114_v28 = vunpack.i.l.bf16 %v5918_v38 }
 0x177   : > { %1958 = vmatpush.msra.mxu3 %v6017_v32  ;;  %1978 = vmatpush.msrb.mxu0 %v5913_v1  ;;  %v6148_v1 = vpop.permute.xlu2 %4337  ;;  %v4199_v32 = vunpack.i.l.bf16 %v5945_v48 }
 0x178   : > { %v6132_v13 = vsel %vm293_vm3, %v4205_v20, %v8114_v28  ;;  %2015 = vmatpush.msrb.mxu2 %v5643_v37  ;;  %2099 = vmatpush.msra.mxu1 %v6123_v59  ;;  %8117 = vst [vmem:[#allocation49_spill] sm:$0xff] %v6148_v1  ;;  %v6157_v37 = vsel %vm306_vm2, %v4214_v7, %v4215_v51  ;;  %v7908_v51 = vunpack.i.h.bf16 %v5841_v47  ;;  %v4184_v1 = vunpack.i.l.bf16 %v5841_v47 }
 0x179   : > { %2030 = vmatpush.msrb.mxu3 %v5528_v15  ;;  %2077 = vmatpush.msra.mxu0 %v6117_v25  ;;  %v4204_v15 = vunpack.i.l.bf16 %v8110_v39  ;;  %v8118_v39 = vld [vmem:[#allocation25_spill] sm:$0xff] }
 0x17a   : > { %2016 = vmatpush.msrb.mxu2 %v5660_v52  ;;  %2100 = vmatpush.msra.mxu1 %v6132_v13  ;;  %v4194_v52 = vunpack.i.l.bf16 %v5808_v31  ;;  %v4174_v28 = vunpack.i.l.bf16 %v8118_v39 }
 0x17b   : > { %2031 = vmatpush.msrb.mxu3 %v5568_v42  ;;  %2078 = vmatpush.msra.mxu0 %v6138_v43  ;;  %v6173_v42 = vld [vmem:[%s4906_s12 + $0x68] sm:$0xff] }
 0x17c   : > { %4422 = vrot.lane.b32.xlu1 %v5797_v2, %s4743_s29  ;;  %4417 = vrot.lane.b32.xlu0 %v5905_v10, %s4745_s23 }
 0x17d   : > { %2017 = vmatpush.msrb.mxu2 %v5678_v55  ;;  %2032 = vmatpush.msrb.mxu3 %v5593_v17  ;;  %v6183_v55 = vsel %vm293_vm3, %v4204_v15, %v4205_v20  ;;  %v8119_v17 = vunpack.i.l.bf16 %v6046_v16 }
 0x17e   : > { %2079 = vmatpush.msra.mxu0 %v6157_v37  ;;  %2101 = vmatpush.msra.mxu1 %v6173_v42 }
 0x17f   : > { %4477 = vrot.lane.b32.xlu2 %v6161_v0, %s4745_s23  ;;  %2018 = vmatpush.msrb.mxu2 %v5696_v60  ;;  %v6189_v44 = vsel %vm332_vm0, %v8119_v17, %v4234_v11  ;;  %v8121_v60 = vunpack.i.h.bf16 %v5808_v31  ;;  %v8122_v11 = vunpack.i.l.bf16 %v6066_v50 }
 0x180   : > { %8120 = vst [vmem:[#allocation25_spill] sm:$0xff] %v6189_v44  ;;  %2033 = vmatpush.msrb.mxu3 %v5617_v49  ;;  %2080 = vmatpush.msra.mxu0 %v6183_v55  ;;  %v4521_v49 = vld [vmem:[%s4906_s12 + $0x40] sm:$0xff] }
 0x181   : > { %v6200_v20 = vsel %vm277_vm4, %v4194_v52, %v8121_v60  ;;  %3732 = vmatmul.msk.f32.vlgmr.msra.gmra.mxu2 %vm1362_vm8, %v5356_v54  ;;  %v6209_v17 = vsel %vm319_vm1, %v8122_v11, %v4224_v56  ;;  %v6217_v60 = vsel %vm264_vm5, %v4184_v1, %v7908_v51  ;;  %v6227_v56 = vpop.permute.xlu2 %4352  ;;  %v6233_v11 = vsel %vm277_vm4, %v4199_v32, %v4194_v52 }
 0x182   : > { %2102 = vmatpush.msra.mxu1 %v6200_v20  ;;  %8123 = vst [vmem:[#allocation50_spill] sm:$0xff] %v6209_v17  ;;  %2117 = vmatpush.msra.mxu2 %v6189_v44  ;;  %v6258_v52 = vsel %vm264_vm5, %v4189_v46, %v4184_v1 }
 0x183   : > { %2034 = vmatpush.msrb.mxu3 %v4521_v49  ;;  %2081 = vmatpush.msra.mxu0 %v6223_v36  ;;  %8125 = vst [vmem:[#allocation31_spill] sm:$0xff] %v6227_v56  ;;  %v8126_v49 = vunpack.i.h.bf16 %v8118_v39  ;;  %v6247_v56 = vsel %vm306_vm2, %v8128_v4, %v4214_v7  ;;  %v8129_v7 = vunpack.i.h.bf16 %v5713_v6  ;;  %v8131_v4 = vld [vmem:[#allocation37_spill] sm:$0xff] }
 0x184   : > { %2103 = vmatpush.msra.mxu1 %v6217_v60  ;;  %2118 = vmatpush.msra.mxu2 %v6209_v17 }
 0x185   : > { %2035 = vmatpush.msrb.mxu3 %v5649_v19  ;;  %v6239_v51 = vsel %vm251_vm6, %v4174_v28, %v8126_v49  ;;  %2082 = vmatpush.msra.mxu0 %v6233_v11  ;;  %v4179_v19 = vunpack.i.l.bf16 %v5749_v27  ;;  %v6264_v27 = vsel %vm238_vm7, %v4164_v29, %v8129_v7  ;;  %v4169_v49 = vunpack.i.l.bf16 %v8131_v4  ;;  %v6285_v7 = vpop.permute.xlu1 %4242  ;;  %v8133_v4 = vld [vmem:[#allocation34_spill] sm:$0xff] }
 0x186   : > { %8127 = vst [vmem:[#allocation51_spill] sm:$0xff] %v6239_v51  ;;  %2104 = vmatpush.msra.mxu1 %v6239_v51  ;;  %2119 = vmatpush.msra.mxu2 %v6247_v56 }
 0x187   : > { %4437 = vrot.lane.b32.xlu1 %v5905_v10, %s4741_s27  ;;  %4432 = vrot.lane.b32.xlu0 %v5797_v2, %s4741_s27  ;;  %8130 = vst [vmem:[#allocation52_spill] sm:$0xff] %v6264_v27  ;;  %v6283_v1 = vsel %vm251_vm6, %v4179_v19, %v4174_v28 }
 0x188   : > { %2036 = vmatpush.msrb.mxu3 %v5666_v34  ;;  %2083 = vmatpush.msra.mxu0 %v6258_v52  ;;  %v6273_v34 = vsel %vm293_vm3, %v8132_v41, %v4204_v15  ;;  %v6290_v41 = vld [vmem:[%s4906_s12 + $0x70] sm:$0xff]  ;;  %v6296_v15 = vsel %vm238_vm7, %v4169_v49, %v4164_v29  ;;  %v8137_v29 = vunpack.i.h.bf16 %v5808_v31 }
 0x189   : > { %2105 = vmatpush.msra.mxu1 %v6264_v27  ;;  %2120 = vmatpush.msra.mxu2 %v6273_v34  ;;  %8134 = vst [vmem:[#allocation34_spill] sm:$0xff] %v6296_v15  ;;  %v6300_v28 = vpop.permute.xlu2 %4367 }
 0x18a   : > { %3735 = vmatmul.msk.f32.vlgmr.msrb.gmra.mxu1 %vm1362_vm8, %v5428_v3  ;;  %4492 = vrot.lane.b32.xlu2 %v6161_v0, %s4742_s28 }
 0x18b   : > { %2243 = vmatpush.msrb.mxu1 %v6189_v44  ;;  %2037 = vmatpush.msrb.mxu3 %v8133_v4  ;;  %v8135_v44 = vld [vmem:[#allocation35_spill] sm:$0xff]  ;;  %v6304_v4 = vld [vmem:[#allocation6 + $0x8] sm:$0xff] }
 0x18c   : > { %2084 = vmatpush.msra.mxu0 %v6283_v1  ;;  %2121 = vmatpush.msra.mxu2 %v6290_v41  ;;  %8136 = vst [vmem:[#allocation35_spill] sm:$0xff] %v6300_v28 }
 0x18d   : > { %2244 = vmatpush.msrb.mxu1 %v6209_v17  ;;  %2038 = vmatpush.msrb.mxu3 %v8135_v44  ;;  %v6314_v44 = vsel %vm277_vm4, %v8137_v29, %v4199_v32  ;;  %v8140_v32 = vunpack.i.h.bf16 %v5713_v6  ;;  %v8144_v6 = vld [vmem:[#allocation42_spill] sm:$0xff] }
 0x18e   : > { %2085 = vmatpush.msra.mxu0 %v6296_v15  ;;  %3733 = vmatmul.msk.f32.vlgmr.msra.gmra.mxu3 %vm1362_vm8, %v5356_v54  ;;  %v8138_v54 = vunpack.i.h.bf16 %v5841_v47  ;;  %v6341_v47 = vpop.permute.xlu1 %4257 }
 0x18f   : > { %3734 = vmatmul.msk.f32.vlgmr.msrb.gmra.mxu0 %vm1362_vm8, %v6304_v4  ;;  %3736 = vmatmul.msk.f32.vlgmr.msrb.gmra.mxu2 %vm1362_vm8, %v5428_v3  ;;  %v8139_v3 = vunpack.i.h.bf16 %v8118_v39 }
 0x190   : > { %2203 = vmatpush.msra.mxu3 %v6117_v25  ;;  %2122 = vmatpush.msra.mxu2 %v6314_v44  ;;  %v6324_v17 = vsel %vm264_vm5, %v8138_v54, %v4189_v46  ;;  %v6345_v46 = vpop.permute.xlu0 %4252  ;;  %v8145_v54 = vld [vmem:[#allocation21_spill] sm:$0xff] }
 0x191   : > { %2223 = vmatpush.msrb.mxu0 %v6089_v33  ;;  %2245 = vmatpush.msrb.mxu1 %v6247_v56  ;;  %v6336_v31 = vsel %vm251_vm6, %v8139_v3, %v4179_v19  ;;  %v8143_v19 = vld [vmem:[#allocation20_spill] sm:$0xff] }
 0x192   : > { %2204 = vmatpush.msra.mxu3 %v6138_v43  ;;  %2123 = vmatpush.msra.mxu2 %v6324_v17 }
 0x193   : > { %2224 = vmatpush.msrb.mxu0 %v6105_v5  ;;  %2246 = vmatpush.msrb.mxu1 %v6273_v34  ;;  %v6358_v39 = vpop.permute.xlu2 %4382 }
 0x194   : > { %4452 = vrot.lane.b32.xlu1 %v5797_v2, %s4738_s21  ;;  %4447 = vrot.lane.b32.xlu0 %v5905_v10, %s4742_s28  ;;  %v6354_v10 = vsel %vm238_vm7, %v8140_v32, %v4169_v49  ;;  %8142 = vst [vmem:[#allocation54_spill] sm:$0xff] %v6358_v39  ;;  %v4279_v49 = vunpack.i.l.bf16 %v8144_v6  ;;  %v7914_v32 = vmov 0  }
 0x195   : > { %2124 = vmatpush.msra.mxu2 %v6336_v31  ;;  %2205 = vmatpush.msra.mxu3 %v6157_v37  ;;  %8141 = vst [vmem:[#allocation53_spill] sm:$0xff] %v6354_v10 }
 0x196   : > { %2225 = vmatpush.msrb.mxu0 %v6123_v59  ;;  %2247 = vmatpush.msrb.mxu1 %v6290_v41  ;;  %v6383_v3 = vpop.permute.xlu1 %4272 }
 0x197   : > { %1219 = vrot.lane.b32.xlu2 %v6144_v61, %s4739_s25  ;;  %2125 = vmatpush.msra.mxu2 %v6354_v10  ;;  %v4274_v29 = vunpack.i.l.bf16 %v6383_v3 }
 0x198   : > { %2206 = vmatpush.msra.mxu3 %v6183_v55  ;;  %2226 = vmatpush.msrb.mxu0 %v6132_v13  ;;  %v6389_v61 = vpop.permute.xlu0 %4267 }
 0x199   : > { %2248 = vmatpush.msrb.mxu1 %v6314_v44  ;;  %2263 = vmatpush.msrb.mxu2 %v8143_v19  ;;  %v4269_v19 = vunpack.i.l.bf16 %v6389_v61 }
 0x19a   : > { %3738 = vmatmul.msk.f32.vlgmr.msra.gmra.mxu0 %vm1362_vm8, %v5688_v53  ;;  %3739 = vmatmul.msk.f32.vlgmr.msra.gmra.mxu1 %vm1362_vm8, %v5688_v53 }
 0x19b   : > { %2207 = vmatpush.msra.mxu3 %v6223_v36  ;;  %2227 = vmatpush.msrb.mxu0 %v6173_v42 }
 0x19c   : > { %2249 = vmatpush.msrb.mxu1 %v6324_v17  ;;  %2264 = vmatpush.msrb.mxu2 %v5847_v45  ;;  %v1307_v45 = vld [vmem:[%s7827_s2] sm:$0xff] }
 0x19d   : > { %2208 = vmatpush.msra.mxu3 %v6233_v11  ;;  %2228 = vmatpush.msrb.mxu0 %v6200_v20 }
 0x19e   : > { %2250 = vmatpush.msrb.mxu1 %v6336_v31  ;;  %1112 = vrot.lane.b32.xlu1 %v8145_v54, %s4739_s25 }
 0x19f   : > { %4462 = vrot.lane.b32.xlu0 %v5797_v2, %s4739_s25  ;;  %2265 = vmatpush.msrb.mxu2 %v5877_v35  ;;  %v8146_v2 = vunpack.i.h.bf16 %v6046_v16 }
 0x1a0   : > { %4511 = vset.pattern.permute.xlu2 %v7914_v32  ;;  %2209 = vmatpush.msra.mxu3 %v6258_v52  ;;  %v6400_v32 = vpop.permute.xlu2 %4397 }
 0x1a1   : > { %2229 = vmatpush.msrb.mxu0 %v6217_v60  ;;  %2251 = vmatpush.msrb.mxu1 %v6354_v10  ;;  %v6398_v35 = vsel %vm332_vm0, %v8146_v2, %v4279_v49  ;;  %8147 = vst [vmem:[#allocation20_spill] sm:$0xff] %v6400_v32  ;;  %v6407_v10 = vld [vmem:[#allocation6] sm:$0xff]  ;;  %v7917_v2 = vunpack.i.h.bf16 %v5704_v40 }
 0x1a2   : > { %1584 = vperm.xlu2 %4511, %v1307_v45   ;;  %2266 = vmatpush.msrb.mxu2 %v5895_v63  ;;  %v8148_v45 = vunpack.i.h.bf16 %v6066_v50 }
 0x1a3   : > { %2350 = vmatpush.msra.mxu1 %v6398_v35  ;;  %2210 = vmatpush.msra.mxu3 %v6283_v1 }
 0x1a4   : > { %2230 = vmatpush.msrb.mxu0 %v6239_v51  ;;  %3737 = vmatmul.msk.f32.vlgmr.msrb.gmra.mxu3 %vm1362_vm8, %v6407_v10  ;;  %v6416_v63 = vsel %vm319_vm1, %v8148_v45, %v4274_v29  ;;  %v4264_v51 = vunpack.i.l.bf16 %v5814_v58 }
 0x1a5   : > { %2267 = vmatpush.msrb.mxu2 %v5931_v57  ;;  %2351 = vmatpush.msra.mxu1 %v6416_v63  ;;  %v6431_v57 = vsel %vm306_vm2, %v7917_v2, %v4269_v19  ;;  %v7919_v2 = vunpack.i.h.bf16 %v8144_v6 }
 0x1a6   : > { %2211 = vmatpush.msra.mxu3 %v6296_v15  ;;  %2231 = vmatpush.msrb.mxu0 %v6264_v27  ;;  %v8172_v15 = vunpack.i.h.bf16 %v5814_v58  ;;  %v8175_v58 = vld [vmem:[#allocation39_spill] sm:$0xff] }
 0x1a7   : > { %3740 = vmatmul.msk.f32.vlgmr.msra.gmra.mxu2 %vm1362_vm8, %v5688_v53  ;;  %2352 = vmatpush.msra.mxu1 %v6431_v57  ;;  %v7918_v53 = vunpack.i.h.bf16 %v5945_v48 }
 0x1a8   : > { %2268 = vmatpush.msrb.mxu2 %v5953_v12  ;;  %2283 = vmatpush.msrb.mxu3 %v5806_v18  ;;  %v6441_v12 = vpop.permute.xlu1 %4287  ;;  %v8155_v18 = vld [vmem:[#allocation38_spill] sm:$0xff] }
 0x1a9   : > { %2303 = vmatpush.msra.mxu0 %v5745_v24  ;;  %4472 = vrot.lane.b32.xlu1 %v6161_v0, %s4744_s11  ;;  %8149 = vst [vmem:[#allocation42_spill] sm:$0xff] %v6441_v12  ;;  %v8150_v24 = vunpack.i.h.bf16 %v5918_v38  ;;  %v6462_v38 = vld [vmem:[%s4906_s12 + $0x78] sm:$0xff] }
 0x1aa   : > { %1099 = vrot.lane.b32.xlu0 %v8145_v54, %s4740_s26  ;;  %2269 = vmatpush.msrb.mxu2 %v5977_v23  ;;  %v6454_v54 = vpop.permute.xlu2 %4412  ;;  %v4190_v23 = vunpack.i.h.bf16 %v8124_v8 }
 0x1ab   : > { %2284 = vmatpush.msrb.mxu3 %v5826_v62  ;;  %v6449_v45 = vsel %vm293_vm3, %v8150_v24, %v4264_v51  ;;  %2304 = vmatpush.msra.mxu0 %v5764_v30  ;;  %8151 = vst [vmem:[#allocation21_spill] sm:$0xff] %v6454_v54  ;;  %v7920_v62 = vunpack.i.h.bf16 %v6383_v3  ;;  %v6469_v30 = vsel %vm332_vm0, %v4279_v49, %v7919_v2  ;;  %v6472_v24 = vpop.permute.xlu0 %4282  ;;  %v8156_v49 = vld [vmem:[#allocation43_spill] sm:$0xff]  ;;  %v8161_v54 = vld [vmem:[#allocation45_spill] sm:$0xff] }
 0x1ac   : > { %2353 = vmatpush.msra.mxu1 %v6449_v45  ;;  %2270 = vmatpush.msrb.mxu2 %v5991_v21  ;;  %8152 = vst [vmem:[#allocation55_spill] sm:$0xff] %v6472_v24  ;;  %v8169_v24 = vld [vmem:[#allocation19_spill] sm:$0xff] }
 0x1ad   : > { %2285 = vmatpush.msrb.mxu3 %v5851_v22  ;;  %2305 = vmatpush.msra.mxu0 %v5778_v9  ;;  %v8153_v22 = vld [vmem:[#allocation40_spill] sm:$0xff]  ;;  %v8154_v9 = vunpack.i.h.bf16 %v6341_v47  ;;  %v6490_v8 = vsel %vm319_vm1, %v4274_v29, %v7920_v62  ;;  %v4270_v29 = vunpack.i.h.bf16 %v6389_v61  ;;  %v8159_v62 = vld [vmem:[#allocation27_spill] sm:$0xff] }
 0x1ae   : > { %2354 = vmatpush.msra.mxu1 %v6462_v38  ;;  %2271 = vmatpush.msrb.mxu2 %v6013_v14  ;;  %v4290_v14 = vunpack.i.h.bf16 %v6441_v12  ;;  %v8170_v12 = vunpack.i.h.bf16 %v6285_v7 }
 0x1af   : > { %2286 = vmatpush.msrb.mxu3 %v8153_v22  ;;  %v6482_v21 = vsel %vm277_vm4, %v8154_v9, %v7918_v53  ;;  %2306 = vmatpush.msra.mxu0 %v8155_v18  ;;  %v8157_v22 = vunpack.i.h.bf16 %v6345_v46  ;;  %v7927_v53 = vunpack.i.l.bf16 %v6400_v32  ;;  %v8162_v18 = vld [vmem:[#allocation23_spill] sm:$0xff]  ;;  %v6515_v2 = vsel %vm306_vm2, %v4269_v19, %v4270_v29  ;;  %v8168_v19 = vld [vmem:[#allocation24_spill] sm:$0xff] }
 0x1b0   : > { %2355 = vmatpush.msra.mxu1 %v6482_v21  ;;  %2370 = vmatpush.msra.mxu2 %v6469_v30  ;;  %8163 = vst [vmem:[#allocation38_spill] sm:$0xff] %v6515_v2  ;;  %v6517_v61 = vpop.permute.xlu1 %4302 }
 0x1b1   : > { %2287 = vmatpush.msrb.mxu3 %v8156_v49  ;;  %v6499_v9 = vsel %vm264_vm5, %v8157_v22, %v4190_v23  ;;  %2307 = vmatpush.msra.mxu0 %v8159_v62  ;;  %v8160_v49 = vld [vmem:[#allocation37_spill] sm:$0xff]  ;;  %v8164_v62 = vld [vmem:[#allocation44_spill] sm:$0xff] }
 0x1b2   : > { %8158 = vst [vmem:[#allocation40_spill] sm:$0xff] %v6499_v9  ;;  %2356 = vmatpush.msra.mxu1 %v6499_v9  ;;  %2371 = vmatpush.msra.mxu2 %v6490_v8  ;;  %v4170_v22 = vunpack.i.h.bf16 %v8160_v49  ;;  %v6525_v49 = vsel %vm238_vm7, %v7927_v53, %v4290_v14  ;;  %v6545_v53 = vsel %vm293_vm3, %v4264_v51, %v8172_v15  ;;  %v6560_v51 = vld [vmem:[%s4906_s12 + $0x80] sm:$0xff] }
 0x1b3   : > { %4482 = vrot.lane.b32.xlu0 %v6161_v0, %s4743_s29  ;;  %2288 = vmatpush.msrb.mxu3 %v8161_v54  ;;  %8165 = vst [vmem:[#allocation43_spill] sm:$0xff] %v6525_v49  ;;  %v8166_v54 = vunpack.i.h.bf16 %v6400_v32  ;;  %v6547_v49 = vpop.permute.xlu2 %4427  ;;  %v8177_v15 = vld [vmem:[#allocation48_spill] sm:$0xff] }
 0x1b4   : > { %2308 = vmatpush.msra.mxu0 %v8162_v18  ;;  %2357 = vmatpush.msra.mxu1 %v8164_v62  ;;  %v6539_v27 = vsel %vm238_vm7, %v8170_v12, %v4170_v22  ;;  %8173 = vst [vmem:[#allocation45_spill] sm:$0xff] %v6547_v49  ;;  %v4259_v12 = vunpack.i.l.bf16 %v6341_v47 }
 0x1b5   : > { %2372 = vmatpush.msra.mxu2 %v6515_v2  ;;  %v6531_v18 = vsel %vm238_vm7, %v4290_v14, %v8166_v54  ;;  %2289 = vmatpush.msrb.mxu3 %v8168_v19  ;;  %8171 = vst [vmem:[#allocation37_spill] sm:$0xff] %v6539_v27  ;;  %v6555_v14 = vpop.permute.xlu0 %4297  ;;  %v4254_v54 = vunpack.i.l.bf16 %v6345_v46  ;;  %v8178_v19 = vld [vmem:[#allocation41_spill] sm:$0xff] }
 0x1b6   : > { %8167 = vst [vmem:[#allocation27_spill] sm:$0xff] %v6531_v18  ;;  %2309 = vmatpush.msra.mxu0 %v8169_v24  ;;  %2358 = vmatpush.msra.mxu1 %v6539_v27  ;;  %v8174_v24 = vld [vmem:[#allocation26_spill] sm:$0xff] }
 0x1b7   : > { %2373 = vmatpush.msra.mxu2 %v6545_v53  ;;  %3743 = vmatmul.msk.f32.vlgmr.msrb.gmra.mxu1 %vm1362_vm8, %v6304_v4  ;;  %8176 = vst [vmem:[#allocation23_spill] sm:$0xff] %v6560_v51 }
 0x1b8   : > { %2290 = vmatpush.msrb.mxu3 %v8174_v24  ;;  %2496 = vmatpush.msrb.mxu1 %v6469_v30  ;;  %v8179_v24 = vunpack.i.h.bf16 %v6046_v16  ;;  %v4244_v16 = vunpack.i.l.bf16 %v6285_v7 }
 0x1b9   : > { %2310 = vmatpush.msra.mxu0 %v8175_v58  ;;  %2374 = vmatpush.msra.mxu2 %v6560_v51  ;;  %v8180_v58 = vunpack.i.h.bf16 %v8144_v6  ;;  %v6591_v6 = vpop.permute.xlu1 %4317 }
 0x1ba   : > { %2291 = vmatpush.msrb.mxu3 %v8177_v15  ;;  %2497 = vmatpush.msrb.mxu1 %v6490_v8  ;;  %v8181_v15 = vunpack.i.h.bf16 %v5945_v48  ;;  %v6598_v48 = vsel %vm264_vm5, %v4190_v23, %v4254_v54  ;;  %v4320_v18 = vunpack.i.h.bf16 %v6591_v6  ;;  %v6631_v32 = vsel %vm238_vm7, %v4170_v22, %v4244_v16  ;;  %v6650_v22 = vld [vmem:[#allocation6 + $0x10] sm:$0xff] }
 0x1bb   : > { %2311 = vmatpush.msra.mxu0 %v8178_v19  ;;  %3741 = vmatmul.msk.f32.vlgmr.msra.gmra.mxu3 %vm1362_vm8, %v6304_v4  ;;  %v6577_v49 = vsel %vm332_vm0, %v8180_v58, %v8179_v24  ;;  %v8182_v24 = vunpack.i.h.bf16 %v6066_v50  ;;  %v8183_v58 = vunpack.i.h.bf16 %v6383_v3  ;;  %v6613_v23 = vpop.permute.xlu2 %4442  ;;  %v8185_v50 = vunpack.i.h.bf16 %v5704_v40  ;;  %v8187_v40 = vld [vmem:[#allocation29_spill] sm:$0xff] }
 0x1bc   : > { %3742 = vmatmul.msk.f32.vlgmr.msrb.gmra.mxu0 %vm1362_vm8, %v6304_v4  ;;  %3744 = vmatmul.msk.f32.vlgmr.msrb.gmra.mxu2 %vm1362_vm8, %v6407_v10  ;;  %v6585_v19 = vsel %vm277_vm4, %v8181_v15, %v4259_v12  ;;  %8184 = vst [vmem:[#allocation24_spill] sm:$0xff] %v6613_v23 }
 0x1bd   : > { %2390 = vmatpush.msra.mxu3 %v6577_v49  ;;  %2375 = vmatpush.msra.mxu2 %v6585_v19  ;;  %v6606_v15 = vsel %vm319_vm1, %v8183_v58, %v8182_v24  ;;  %v6621_v3 = vsel %vm306_vm2, %v4270_v29, %v8185_v50  ;;  %v8186_v24 = vld [vmem:[#allocation46_spill] sm:$0xff]  ;;  %v6625_v58 = vpop.permute.xlu0 %4312  ;;  %v8189_v50 = vunpack.i.h.bf16 %v6358_v39 }
 0x1be   : > { %2476 = vmatpush.msrb.mxu0 %v6398_v35  ;;  %2498 = vmatpush.msrb.mxu1 %v6515_v2  ;;  %v7936_v2 = vunpack.i.l.bf16 %v6358_v39  ;;  %v6657_v39 = vld [vmem:[%s4906_s12 + $0x88] sm:$0xff] }
 0x1bf   : > { %4487 = vrot.lane.b32.xlu1 %v6161_v0, %s4741_s27  ;;  %2376 = vmatpush.msra.mxu2 %v6598_v48  ;;  %v6645_v23 = vsel %vm277_vm4, %v4320_v18, %v8189_v50  ;;  %8192 = vst [vmem:[#allocation39_spill] sm:$0xff] %v6657_v39  ;;  %v8193_v50 = vunpack.i.h.bf16 %v6341_v47  ;;  %s3508_s27 = scalar_lea.sflag [#allocation5], %s219_s6 }
 0x1c0   : > { %2391 = vmatpush.msra.mxu3 %v6606_v15  ;;  %2477 = vmatpush.msrb.mxu0 %v6416_v63  ;;  %v6639_v29 = vsel %vm277_vm4, %v7936_v2, %v4320_v18  ;;  %8190 = vst [vmem:[#allocation26_spill] sm:$0xff] %v6645_v23 }
 0x1c1   : > { %2499 = vmatpush.msrb.mxu1 %v6545_v53  ;;  %2377 = vmatpush.msra.mxu2 %v8186_v24  ;;  %8188 = vst [vmem:[#allocation19_spill] sm:$0xff] %v6639_v29  ;;  %v7942_v29 = vunpack.i.h.bf16 %v6300_v28  ;;  %v6669_v23 = vsel %vm277_vm4, %v4259_v12, %v8193_v50  ;;  %v8199_v50 = vunpack.i.l.bf16 %v6300_v28  ;;  %v8235_v28 = vld [vmem:[#allocation55_spill] sm:$0xff] }
 0x1c2   : > { %2392 = vmatpush.msra.mxu3 %v6621_v3  ;;  %2478 = vmatpush.msrb.mxu0 %v6431_v57  ;;  %8194 = vst [vmem:[#allocation48_spill] sm:$0xff] %v6669_v23 }
 0x1c3   : > { %2500 = vmatpush.msrb.mxu1 %v6560_v51  ;;  %2378 = vmatpush.msra.mxu2 %v6631_v32  ;;  %v8191_v51 = vld [vmem:[#allocation49_spill] sm:$0xff] }
 0x1c4   : > { %2393 = vmatpush.msra.mxu3 %v8187_v40  ;;  %2479 = vmatpush.msrb.mxu0 %v6449_v45  ;;  %v4340_v2 = vunpack.i.h.bf16 %v8191_v51 }
 0x1c5   : > { %2501 = vmatpush.msrb.mxu1 %v6585_v19  ;;  %2516 = vmatpush.msrb.mxu2 %v6577_v49 }
 0x1c6   : > { %3747 = vmatmul.msk.f32.vlgmr.msra.gmra.mxu1 %vm1362_vm8, %v6650_v22  ;;  %2394 = vmatpush.msra.mxu3 %v6657_v39  ;;  %v6675_v18 = vpop.permute.xlu2 %4457  ;;  %v6690_v12 = vsel %vm319_vm1, %v7942_v29, %v4340_v2 }
 0x1c7   : > { %2480 = vmatpush.msrb.mxu0 %v6462_v38  ;;  %2502 = vmatpush.msrb.mxu1 %v6598_v48  ;;  %8195 = vst [vmem:[#allocation41_spill] sm:$0xff] %v6675_v18  ;;  %v6698_v18 = vsel %vm319_vm1, %v4340_v2, %v8199_v50  ;;  %v8206_v2 = vunpack.i.h.bf16 %v6285_v7  ;;  %v6734_v7 = vpop.f32.mrf.mxu1 }
 0x1c8   : > { %4497 = vrot.lane.b32.xlu0 %v6161_v0, %s4738_s21  ;;  %2517 = vmatpush.msrb.mxu2 %v6606_v15  ;;  %v8196_v0 = vunpack.i.h.bf16 %v6345_v46  ;;  %8198 = vst [vmem:[#allocation29_spill] sm:$0xff] %v6690_v12  ;;  %v6700_v46 = vpop.permute.xlu0 %4327 }
 0x1c9   : > { %2395 = vmatpush.msra.mxu3 %v6669_v23  ;;  %2481 = vmatpush.msrb.mxu0 %v6482_v21  ;;  %8200 = vst [vmem:[#allocation49_spill] sm:$0xff] %v6698_v18  ;;  %v6720_v50 = vsel %vm238_vm7, %v4244_v16, %v8206_v2  ;;  %v8208_v18 = vld [vmem:[#allocation50_spill] sm:$0xff] }
 0x1ca   : > { %2503 = vmatpush.msrb.mxu1 %v8186_v24  ;;  %3745 = vmatmul.msk.f32.vlgmr.msrb.gmra.mxu3 %vm1362_vm8, %v6407_v10  ;;  %v6684_v47 = vsel %vm264_vm5, %v4254_v54, %v8196_v0  ;;  %v8201_v54 = vld [vmem:[#allocation36_spill] sm:$0xff]  ;;  %v8209_v16 = vld [vmem:[#allocation30_spill] sm:$0xff] }
 0x1cb   : > { %2518 = vmatpush.msrb.mxu2 %v6621_v3  ;;  %8197 = vst [vmem:[#allocation46_spill] sm:$0xff] %v6684_v47  ;;  %2396 = vmatpush.msra.mxu3 %v6684_v47  ;;  %v8202_v0 = vunpack.i.h.bf16 %v8201_v54  ;;  %v8203_v29 = vunpack.i.l.bf16 %v8201_v54 }
 0x1cc   : > { %2482 = vmatpush.msrb.mxu0 %v6499_v9  ;;  %2504 = vmatpush.msrb.mxu1 %v6631_v32  ;;  %v8205_v9 = vld [vmem:[#allocation25_spill] sm:$0xff] }
 0x1cd   : > { %2519 = vmatpush.msrb.mxu2 %v8187_v40  ;;  %v6710_v12 = vsel %vm251_vm6, %v8203_v29, %v8202_v0  ;;  %8207 = vst [vmem:[#allocation25_spill] sm:$0xff] %v6720_v50  ;;  %3746 = vmatmul.msk.f32.vlgmr.msra.gmra.mxu0 %vm1362_vm8, %v6407_v10  ;;  %v7951_v29 = vunpack.i.h.bf16 %v8209_v16  ;;  %v6743_v0 = vpop.permute.xlu1 %4332 }
 0x1ce   : > { %8204 = vst [vmem:[#allocation36_spill] sm:$0xff] %v6710_v12  ;;  %2576 = vmatpush.msra.mxu1 %v8205_v9  ;;  %2397 = vmatpush.msra.mxu3 %v6710_v12  ;;  %v6730_v9 = vpop.f32.mrf.mxu0 }
 0x1cf   : > { %2483 = vmatpush.msrb.mxu0 %v8164_v62  ;;  %2520 = vmatpush.msrb.mxu2 %v6657_v39  ;;  %v6741_v54 = vpop.permute.xlu2 %4467  ;;  %v4285_v39 = vunpack.i.h.bf16 %v8235_v28  ;;  %v8254_v62 = vld [vmem:[#allocation32_spill] sm:$0xff] }
 0x1d0   : > { %2577 = vmatpush.msra.mxu1 %v8208_v18  ;;  %2398 = vmatpush.msra.mxu3 %v6720_v50  ;;  %8210 = vst [vmem:[#allocation50_spill] sm:$0xff] %v6741_v54 }
 0x1d1   : > { %2484 = vmatpush.msrb.mxu0 %v6539_v27  ;;  %3748 = vmatmul.msk.f32.vlgmr.msra.gmra.mxu2 %vm1362_vm8, %v6650_v22  ;;  %v8236_v27 = vunpack.i.l.bf16 %v6517_v61 }
 0x1d2   : > { %2521 = vmatpush.msrb.mxu2 %v6669_v23  ;;  %2536 = vmatpush.msrb.mxu3 %v6117_v25  ;;  %v7949_v25 = vunpack.i.l.bf16 %v6743_v0 }
 0x1d3   : > { %2556 = vmatpush.msra.mxu0 %v6089_v33  ;;  %2578 = vmatpush.msra.mxu1 %v6247_v56  ;;  %v7950_v33 = vunpack.i.h.bf16 %v6743_v0  ;;  %v6751_v56 = vpop.permute.xlu0 %4342 }
 0x1d4   : > { %3749 = vmatmul.msk.f32.vlgmr.msra.gmra.mxu3 %vm1362_vm8, %v6650_v22  ;;  %2522 = vmatpush.msrb.mxu2 %v6684_v47  ;;  %v7948_v2 = vunpack.i.h.bf16 %v6751_v56 }
 0x1d5   : > { %2537 = vmatpush.msrb.mxu3 %v6138_v43  ;;  %2557 = vmatpush.msra.mxu0 %v6105_v5  ;;  %v8211_v5 = vunpack.i.l.bf16 %v8209_v16 }
 0x1d6   : > { %2579 = vmatpush.msra.mxu1 %v6273_v34  ;;  %2523 = vmatpush.msrb.mxu2 %v6710_v12  ;;  %v6767_v34 = vpop.f32.mrf.mxu2  ;;  %v8234_v12 = vld [vmem:[#allocation42_spill] sm:$0xff] }
 0x1d7   : > { %2538 = vmatpush.msrb.mxu3 %v6157_v37  ;;  %2558 = vmatpush.msra.mxu0 %v6123_v59  ;;  %v6765_v43 = vsel %vm332_vm0, %v8211_v5, %v7951_v29  ;;  %v8213_v37 = vld [vmem:[#allocation31_spill] sm:$0xff]  ;;  %v6797_v5 = vpop.f32.mrf.mxu0  ;;  %v8224_v29 = vld [vmem:[#allocation34_spill] sm:$0xff] }
 0x1d8   : > { %2580 = vmatpush.msra.mxu1 %v6290_v41  ;;  %8212 = vst [vmem:[#allocation30_spill] sm:$0xff] %v6765_v43  ;;  %2524 = vmatpush.msrb.mxu2 %v6720_v50  ;;  %v7947_v18 = vunpack.i.h.bf16 %v8213_v37  ;;  %v7946_v59 = vunpack.i.l.bf16 %v8213_v37  ;;  %v6781_v41 = vsel %vm319_vm1, %v7949_v25, %v7950_v33  ;;  %v4339_v25 = vunpack.i.l.bf16 %v8191_v51  ;;  %v6837_v33 = vpop.permute.xlu1 %4347 }
 0x1d9   : > { %2539 = vmatpush.msrb.mxu3 %v6183_v55  ;;  %2559 = vmatpush.msra.mxu0 %v6132_v13  ;;  %8214 = vst [vmem:[#allocation31_spill] sm:$0xff] %v6781_v41  ;;  %v6785_v55 = vpop.f32.mrf.mxu3  ;;  %v8215_v13 = vunpack.i.l.bf16 %v6751_v56  ;;  %v8231_v50 = vunpack.i.h.bf16 %v8209_v16 }
 0x1da   : > { %2581 = vmatpush.msra.mxu1 %v6314_v44  ;;  %2623 = vmatpush.msra.mxu2 %v6765_v43 }
 0x1db   : > { %2540 = vmatpush.msrb.mxu3 %v6223_v36  ;;  %2560 = vmatpush.msra.mxu0 %v6173_v42  ;;  %v6795_v44 = vsel %vm306_vm2, %v8215_v13, %v7948_v2  ;;  %v6801_v36 = vpop.f32.mrf.mxu1  ;;  %v6811_v42 = vsel %vm293_vm3, %v7946_v59, %v7947_v18  ;;  %v4329_v13 = vunpack.i.l.bf16 %v6700_v46  ;;  %v8227_v59 = vld [vmem:[#allocation33_spill] sm:$0xff] }
 0x1dc   : > { %2582 = vmatpush.msra.mxu1 %v6324_v17  ;;  %8216 = vst [vmem:[#allocation56_spill] sm:$0xff] %v6795_v44  ;;  %2624 = vmatpush.msra.mxu2 %v6781_v41  ;;  %v6813_v17 = vpop.permute.xlu2 %4477 }
 0x1dd   : > { %2541 = vmatpush.msrb.mxu3 %v6233_v11  ;;  %2561 = vmatpush.msra.mxu0 %v6200_v20  ;;  %8217 = vst [vmem:[#allocation57_spill] sm:$0xff] %v6811_v42  ;;  %v7957_v11 = vunpack.i.l.bf16 %v6591_v6  ;;  %v7958_v20 = vunpack.i.l.bf16 %v6625_v58 }
 0x1de   : > { %2583 = vmatpush.msra.mxu1 %v6336_v31  ;;  %8218 = vst [vmem:[#allocation58_spill] sm:$0xff] %v6813_v17  ;;  %2625 = vmatpush.msra.mxu2 %v6795_v44  ;;  %v8219_v31 = vld [vmem:[#allocation53_spill] sm:$0xff]  ;;  %v6829_v2 = vpop.f32.mrf.mxu2  ;;  %v8228_v17 = vld [vmem:[#allocation47_spill] sm:$0xff] }
 0x1df   : > { %2542 = vmatpush.msrb.mxu3 %v6258_v52  ;;  %2562 = vmatpush.msra.mxu0 %v6217_v60  ;;  %v8220_v52 = vld [vmem:[#allocation28_spill] sm:$0xff]  ;;  %v8221_v60 = vld [vmem:[#allocation51_spill] sm:$0xff]  ;;  %v6880_v23 = vpop.f32.mrf.mxu0 }
 0x1e0   : > { %2584 = vmatpush.msra.mxu1 %v8219_v31  ;;  %2626 = vmatpush.msra.mxu2 %v6811_v42  ;;  %v6833_v31 = vld [vmem:[%s4906_s12 + $0x90] sm:$0xff]  ;;  %8223 = vst [vmem:[#allocation28_spill] sm:$0xff] %v6837_v33 }
 0x1e1   : > { %3751 = vmatmul.msk.f32.vlgmr.msrb.gmra.mxu1 %vm1362_vm8, %v6304_v4  ;;  %2543 = vmatpush.msrb.mxu3 %v6283_v1  ;;  %8222 = vst [vmem:[#allocation53_spill] sm:$0xff] %v6833_v31  ;;  %v6847_v1 = vsel %vm277_vm4, %v7957_v11, %v7958_v20  ;;  %v6862_v11 = vsel %vm332_vm0, %v8231_v50, %v4329_v13  ;;  %v6867_v54 = vpop.f32.mrf.mxu3  ;;  %v8240_v50 = vunpack.i.l.bf16 %v6743_v0 }
 0x1e2   : > { %2749 = vmatpush.msrb.mxu1 %v6765_v43  ;;  %2563 = vmatpush.msra.mxu0 %v8221_v60  ;;  %8225 = vst [vmem:[#allocation51_spill] sm:$0xff] %v6847_v1  ;;  %v8226_v60 = vld [vmem:[#allocation22_spill] sm:$0xff]  ;;  %v4349_v43 = vunpack.i.l.bf16 %v6837_v33  ;;  %v8255_v33 = vunpack.i.l.bf16 %v6591_v6 }
 0x1e3   : > { %2627 = vmatpush.msra.mxu2 %v6833_v31  ;;  %2544 = vmatpush.msrb.mxu3 %v8224_v29  ;;  %v4501_v18 = vpack.i.bf16 %v8227_v59, %v8226_v60  ;;  %v8230_v29 = vld [vmem:[#allocation52_spill] sm:$0xff]  ;;  %8232 = vst [vmem:[#allocation22_spill] sm:$0xff] %v6862_v11  ;;  %v6864_v20 = vpop.f32.mrf.mxu1  ;;  %v6904_v47 = vsel %vm319_vm1, %v4339_v25, %v8240_v50  ;;  %v8246_v50 = vunpack.i.l.bf16 %v6751_v56 }
 0x1e4   : > { %2750 = vmatpush.msrb.mxu1 %v6781_v41  ;;  %v6854_v41 = vpop.permute.xlu0 %4357  ;;  %2564 = vmatpush.msra.mxu0 %v8230_v29  ;;  %v8233_v29 = vunpack.i.l.bf16 %v8209_v16 }
 0x1e5   : > { %8229 = vst [vmem:[#allocation34_spill] sm:$0xff] %v6854_v41  ;;  %2628 = vmatpush.msra.mxu2 %v6847_v1  ;;  %v4359_v60 = vunpack.i.l.bf16 %v6854_v41  ;;  %3750 = vmatmul.msk.f32.vlgmr.msrb.gmra.mxu0 %vm1362_vm8, %v6304_v4  ;;  %v8237_v41 = vunpack.i.l.bf16 %v8220_v52 }
 0x1e6   : > { %2643 = vmatpush.msra.mxu3 %v6862_v11  ;;  %v6876_v51 = vsel %vm332_vm0, %v4329_v13, %v8233_v29  ;;  %2751 = vmatpush.msrb.mxu1 %v6795_v44  ;;  %v8238_v13 = vunpack.i.h.bf16 %v6743_v0  ;;  %v6906_v44 = vpop.permute.xlu2 %4492  ;;  %v8244_v0 = vunpack.i.h.bf16 %v6751_v56  ;;  %v8250_v56 = vunpack.i.l.bf16 %v8235_v28 }
 0x1e7   : > { %2663 = vmatpush.msrb.mxu0 %v6876_v51  ;;  %v6890_v16 = vsel %vm264_vm5, %v8237_v41, %v8236_v27  ;;  %4502 = vrot.lane.b32.xlu1 %v4501_v18, %s4739_s25  ;;  %8241 = vst [vmem:[#allocation47_spill] sm:$0xff] %v6906_v44  ;;  %v8242_v27 = vunpack.i.l.bf16 %v8228_v17  ;;  %v8243_v18 = vunpack.i.l.bf16 %v6555_v14  ;;  %v8247_v44 = vunpack.i.h.bf16 %v8213_v37 }
 0x1e8   : > { %2629 = vmatpush.msra.mxu2 %v6890_v16  ;;  %v6898_v29 = vsel %vm319_vm1, %v8238_v13, %v4339_v25  ;;  %v6922_v25 = vsel %vm306_vm2, %v8244_v0, %v4349_v43  ;;  %2752 = vmatpush.msrb.mxu1 %v6811_v42  ;;  %v6930_v13 = vsel %vm306_vm2, %v4349_v43, %v8246_v50  ;;  %v8251_v43 = vunpack.i.l.bf16 %v8234_v12  ;;  %v6975_v42 = vld [vmem:[%s4906_s12 + $0xa0] sm:$0xff] }
 0x1e9   : > { %8239 = vst [vmem:[#allocation33_spill] sm:$0xff] %v6898_v29  ;;  %2644 = vmatpush.msra.mxu3 %v6898_v29  ;;  %2664 = vmatpush.msrb.mxu0 %v6904_v47  ;;  %v6916_v41 = vsel %vm251_vm6, %v8243_v18, %v8242_v27  ;;  %v6936_v27 = vsel %vm293_vm3, %v8247_v44, %v4359_v60  ;;  %v8249_v18 = vunpack.i.l.bf16 %v8213_v37  ;;  %v6955_v44 = vld [vmem:[%s4906_s12 + $0xd8] sm:$0xff] }
 0x1ea   : > { %8245 = vst [vmem:[#allocation52_spill] sm:$0xff] %v6922_v25  ;;  %2630 = vmatpush.msra.mxu2 %v6916_v41  ;;  %v6952_v50 = vsel %vm238_vm7, %v8251_v43, %v8250_v56  ;;  %v4506_v37 = vpack.i.bf16 %v8227_v59, %v6955_v44  ;;  %2753 = vmatpush.msrb.mxu1 %v6833_v31  ;;  %v1707_v56 = vpop.f32.mrf.mxu3  ;;  %v1727_v59 = vpop.f32.mrf.mxu0  ;;  %v6971_v31 = vld [vmem:[%s4906_s12 + $0x98] sm:$0xff] }
 0x1eb   : > { %8248 = vst [vmem:[#allocation42_spill] sm:$0xff] %v6936_v27  ;;  %v6942_v0 = vsel %vm293_vm3, %v4359_v60, %v8249_v18  ;;  %2645 = vmatpush.msra.mxu3 %v6922_v25  ;;  %2665 = vmatpush.msrb.mxu0 %v6930_v13  ;;  %v1687_v60 = vpop.f32.mrf.mxu2  ;;  %v4315_v18 = vunpack.i.h.bf16 %v6625_v58  ;;  %v1747_v43 = vpop.f32.mrf.mxu1 }
 0x1ec   : > { %8252 = vst [vmem:[#allocation55_spill] sm:$0xff] %v6955_v44  ;;  %2631 = vmatpush.msra.mxu2 %v6952_v50  ;;  %2754 = vmatpush.msrb.mxu1 %v6847_v1  ;;  %v4305_v44 = vunpack.i.h.bf16 %v6517_v61  ;;  %v4295_v1 = vunpack.i.h.bf16 %v8228_v17 }
 0x1ed   : > { %2646 = vmatpush.msra.mxu3 %v6936_v27  ;;  %2666 = vmatpush.msrb.mxu0 %v6942_v0 }
 0x1ee   : > { %3752 = vmatmul.msk.f32.vlgmr.msrb.gmra.mxu2 %vm1362_vm8, %v6304_v4  ;;  %4507 = vrot.lane.b32.xlu0 %v4506_v37, %s4740_s26 }
 0x1ef   : > { %2769 = vmatpush.msrb.mxu2 %v6862_v11  ;;  %2647 = vmatpush.msra.mxu3 %v6971_v31  ;;  %v8253_v11 = vunpack.i.l.bf16 %v6625_v58 }
 0x1f0   : > { %2667 = vmatpush.msrb.mxu0 %v6975_v42  ;;  %2755 = vmatpush.msrb.mxu1 %v6890_v16 }
 0x1f1   : > { %2770 = vmatpush.msrb.mxu2 %v6898_v29  ;;  %v6984_v37 = vsel %vm277_vm4, %v8253_v11, %v4315_v18  ;;  %1206 = vrot.lane.b32.xlu1 %v8254_v62, %s4740_s26  ;;  %v6995_v29 = vsel %vm277_vm4, %v4315_v18, %v8255_v33  ;;  %v6997_v58 = vpop.permute.xlu2 %1219  ;;  %v8257_v62 = vunpack.i.l.bf16 %v6517_v61  ;;  %v8258_v33 = vunpack.i.l.bf16 %v8220_v52 }
 0x1f2   : > { %2648 = vmatpush.msra.mxu3 %v6984_v37  ;;  %8256 = vst [vmem:[#allocation32_spill] sm:$0xff] %v6997_v58  ;;  %2668 = vmatpush.msrb.mxu0 %v6995_v29  ;;  %v8259_v61 = vunpack.i.l.bf16 %v8228_v17  ;;  %v8260_v58 = vunpack.i.l.bf16 %v6555_v14  ;;  %v1467_v17 = vadd.f32 %v6797_v5, %v6734_v7  ;;  %v8262_v7 = vunpack.i.l.bf16 %v8234_v12  ;;  %v1834_v5 = vpop.f32.mrf.mxu0 }
 0x1f3   : > { %2756 = vmatpush.msrb.mxu1 %v6916_v41  ;;  %3753 = vmatmul.msk.f32.vlgmr.msrb.gmra.mxu3 %vm1362_vm8, %v6407_v10  ;;  %v7008_v6 = vsel %vm264_vm5, %v8257_v62, %v4305_v44  ;;  %v7014_v11 = vsel %vm264_vm5, %v4305_v44, %v8258_v33  ;;  %v1767_v18 = vpop.f32.mrf.mxu2  ;;  %v8261_v33 = vunpack.i.l.bf16 %v8235_v28  ;;  %v1728_v28 = vadd.f32 %v1727_v59, %v6864_v20  ;;  %v7081_v59 = vpop.permute.xlu1 %4362 }
 0x1f4   : > { %2771 = vmatpush.msrb.mxu2 %v6922_v25  ;;  %2649 = vmatpush.msra.mxu3 %v7008_v6  ;;  %v7024_v62 = vsel %vm251_vm6, %v8259_v61, %v4295_v1  ;;  %v7030_v44 = vsel %vm251_vm6, %v4295_v1, %v8260_v58  ;;  %v1487_v61 = vadd.f32 %v6801_v36, %v6767_v34  ;;  %v1814_v1 = vpop.f32.mrf.mxu3  ;;  %v1854_v36 = vpop.f32.mrf.mxu1 }
 0x1f5   : > { %2669 = vmatpush.msrb.mxu0 %v7014_v11  ;;  %2757 = vmatpush.msrb.mxu1 %v6952_v50  ;;  %v7036_v25 = vsel %vm238_vm7, %v8261_v33, %v4285_v39  ;;  %v7057_v34 = vsel %vm238_vm7, %v4285_v39, %v8262_v7  ;;  %v1580_v20 = vadd.f32 %v6867_v54, %v1467_v17  ;;  %v8263_v54 = vld [vmem:[#allocation38_spill] sm:$0xff] }
 0x1f6   : > { %2772 = vmatpush.msrb.mxu2 %v6936_v27  ;;  %v1447_v27 = vadd.f32 %v6785_v55, %v6730_v9  ;;  %3755 = vmatmul.msk.f32.vlgmr.msra.gmra.mxu1 %vm1362_vm8, %v6407_v10  ;;  %v1748_v9 = vadd.f32 %v1747_v43, %v1687_v60  ;;  %v1768_v55 = vadd.f32 %v1767_v18, %v1707_v56  ;;  %v8269_v7 = vld [vmem:[#allocation34_spill] sm:$0xff] }
 0x1f7   : > { %2650 = vmatpush.msra.mxu3 %v7024_v62  ;;  %2829 = vmatpush.msra.mxu1 %v6469_v30  ;;  %v1581_v60 = vadd.f32 %v6880_v23, %v1487_v61  ;;  %v1857_v39 = vadd.f32 %v1814_v1, %v1728_v28  ;;  %v7093_v28 = vpop.permute.xlu0 %4372 }
 0x1f8   : > { %2670 = vmatpush.msrb.mxu0 %v7030_v44  ;;  %2773 = vmatpush.msrb.mxu2 %v6971_v31  ;;  %v1579_v30 = vadd.f32 %v6829_v2, %v1447_v27  ;;  %v1859_v12 = vadd.f32 %v1854_v36, %v1768_v55  ;;  %v8268_v55 = vld [vmem:[#allocation39_spill] sm:$0xff]  ;;  %v8270_v36 = vld [vmem:[#allocation29_spill] sm:$0xff] }
 0x1f9   : > { %2651 = vmatpush.msra.mxu3 %v7036_v25  ;;  %2830 = vmatpush.msra.mxu1 %v6490_v8  ;;  %v1858_v8 = vadd.f32 %v1834_v5, %v1748_v9  ;;  %v8264_v9 = vld [vmem:[#allocation23_spill] sm:$0xff] }
 0x1fa   : > { %2671 = vmatpush.msrb.mxu0 %v7057_v34  ;;  %3756 = vmatmul.msk.f32.vlgmr.msra.gmra.mxu2 %vm1362_vm8, %v6650_v22 }
 0x1fb   : > { %3754 = vmatmul.msk.f32.vlgmr.msra.gmra.mxu0 %vm1362_vm8, %v6407_v10  ;;  %2774 = vmatpush.msrb.mxu2 %v6984_v37 }
 0x1fc   : > { %2789 = vmatpush.msrb.mxu3 %v6876_v51  ;;  %v7074_v56 = vpop.permute.xlu2 %1584  ;;  %2809 = vmatpush.msra.mxu0 %v6398_v35 }
 0x1fd   : > { %2831 = vmatpush.msra.mxu1 %v8263_v54  ;;  %v1587_v23 = vadd.f32 %v7074_v56, %v1579_v30  ;;  %v1588_v2 = vadd.f32 %v7074_v56, %v1580_v20  ;;  %v1589_v27 = vadd.f32 %v7074_v56, %v1581_v60  ;;  %3757 = vmatmul.msk.f32.vlgmr.msra.gmra.mxu3 %vm1362_vm8, %v6650_v22  ;;  %v4374_v20 = vunpack.i.l.bf16 %v7093_v28  ;;  %v8271_v60 = vld [vmem:[#allocation37_spill] sm:$0xff] }
 0x1fe   : > { %2775 = vmatpush.msrb.mxu2 %v7008_v6  ;;  %v1860_v43 = vadd.f32 %v1857_v39, %v7074_v56  ;;  %v1861_v35 = vadd.f32 %v1858_v8, %v7074_v56  ;;  %v1862_v58 = vadd.f32 %v1859_v12, %v7074_v56  ;;  %2790 = vmatpush.msrb.mxu3 %v6904_v47  ;;  %v8272_v39 = vld [vmem:[#allocation48_spill] sm:$0xff] }
 0x1ff   : > { %2810 = vmatpush.msra.mxu0 %v6416_v63  ;;  %v1590_v18 = vmax.f32 %v1587_v23, 0.0  ;;  %v1591_v33 = vmax.f32 %v1588_v2, 0.0  ;;  %v1592_v17 = vmax.f32 %v1589_v27, 0.0  ;;  %2832 = vmatpush.msra.mxu1 %v6545_v53  ;;  %v8274_v2 = vld [vmem:[#allocation46_spill] sm:$0xff]  ;;  %v8275_v27 = vld [vmem:[#allocation35_spill] sm:$0xff] }
 0x200   : > { %2776 = vmatpush.msrb.mxu2 %v7024_v62  ;;  %v1863_v61 = vmax.f32 %v1860_v43, 0.0  ;;  %2791 = vmatpush.msrb.mxu3 %v6930_v13  ;;  %v1864_v63 = vmax.f32 %v1861_v35, 0.0  ;;  %v1865_v53 = vmax.f32 %v1862_v58, 0.0  ;;  %v8277_v43 = vunpack.i.l.bf16 %v8275_v27 }
 0x201   : > { %2811 = vmatpush.msra.mxu0 %v6431_v57  ;;  %1593 = vst [vmem:[%s7098_s8] sm:$0xff] %v1590_v18  ;;  %2833 = vmatpush.msra.mxu1 %v8264_v9  ;;  %v4330_v57 = vunpack.i.h.bf16 %v6700_v46  ;;  %v7128_v46 = vpop.permute.xlu0 %4387 }
 0x202   : > { %2777 = vmatpush.msrb.mxu2 %v7036_v25  ;;  %1594 = vst [vmem:[%s7098_s8 + $0x8] sm:$0xff] %v1591_v33  ;;  %2792 = vmatpush.msrb.mxu3 %v6942_v0  ;;  %v8278_v33 = vld [vmem:[#allocation49_spill] sm:$0xff] }
 0x203   : > { %2812 = vmatpush.msra.mxu0 %v6449_v45  ;;  %1595 = vst [vmem:[%s7098_s8 + $0x10] sm:$0xff] %v1592_v17  ;;  %2834 = vmatpush.msra.mxu1 %v6585_v19  ;;  %v4365_v45 = vunpack.i.h.bf16 %v7081_v59  ;;  %v8265_v19 = vld [vmem:[#allocation40_spill] sm:$0xff] }
 0x204   : > { %2849 = vmatpush.msra.mxu2 %v6577_v49  ;;  %1866 = vst [vmem:[%s7098_s8 + $0x18] sm:$0xff] %v1863_v61  ;;  %3758 = vmatmul.msk.f32.vlgmr.msrb.gmra.mxu0 %vm1362_vm8, %v6650_v22  ;;  %v4378_v49 = vpop.permute.xlu1 %4377 }
 0x205   : > { %2793 = vmatpush.msrb.mxu3 %v6975_v42  ;;  %1867 = vst [vmem:[%s7098_s8 + $0x20] sm:$0xff] %v1864_v63  ;;  %2813 = vmatpush.msra.mxu0 %v6462_v38  ;;  %v1940_v38 = vpop.f32.mrf.mxu2  ;;  %v4380_v5 = vunpack.i.h.bf16 %v4378_v49  ;;  %v4379_v23 = vunpack.i.l.bf16 %v4378_v49  ;;  %v8280_v63 = vld [vmem:[#allocation36_spill] sm:$0xff]  ;;  %v4389_v49 = vunpack.i.l.bf16 %v7128_v46 }
 0x206   : > { %2835 = vmatpush.msra.mxu1 %v6598_v48  ;;  %1868 = vst [vmem:[%s7098_s8 + $0x28] sm:$0xff] %v1865_v53  ;;  %2850 = vmatpush.msra.mxu2 %v6606_v15  ;;  %v4364_v48 = vunpack.i.l.bf16 %v7081_v59  ;;  %v8266_v15 = vld [vmem:[#allocation28_spill] sm:$0xff]  ;;  %v8276_v59 = vunpack.i.h.bf16 %v8275_v27  ;;  %v4310_v27 = vunpack.i.h.bf16 %v8220_v52 }
 0x207   : > { %2794 = vmatpush.msrb.mxu3 %v6995_v29  ;;  %2814 = vmatpush.msra.mxu0 %v6482_v21  ;;  %v7135_v21 = vsel %vm332_vm0, %v4365_v45, %v4330_v57  ;;  %v2000_v30 = vpop.f32.mrf.mxu1  ;;  %v7197_v53 = vsel %vm293_vm3, %v4379_v23, %v4380_v5 }
 0x208   : > { %2836 = vmatpush.msra.mxu1 %v8186_v24  ;;  %2851 = vmatpush.msra.mxu2 %v6621_v3  ;;  %v4350_v3 = vunpack.i.h.bf16 %v8266_v15  ;;  %v4375_v24 = vunpack.i.h.bf16 %v7093_v28  ;;  %v7153_v8 = vsel %vm332_vm0, %v4330_v57, %v4364_v48  ;;  %v7157_v12 = vsel %vm332_vm0, %v4364_v48, %v4365_v45  ;;  %8281 = vst [vmem:[#allocation40_spill] sm:$0xff] %v7197_v53 }
 0x209   : > { %2795 = vmatpush.msrb.mxu3 %v7014_v11  ;;  %2815 = vmatpush.msra.mxu0 %v8265_v19  ;;  %v7173_v35 = vsel %vm319_vm1, %v8277_v43, %v8276_v59  ;;  %v7187_v28 = vpop.permute.xlu0 %4402  ;;  %v4390_v45 = vunpack.i.h.bf16 %v7128_v46  ;;  %v8282_v19 = vld [vmem:[#allocation54_spill] sm:$0xff]  ;;  %v8291_v59 = vld [vmem:[#allocation19_spill] sm:$0xff] }
 0x20a   : > { %2837 = vmatpush.msra.mxu1 %v6631_v32  ;;  %2852 = vmatpush.msra.mxu2 %v8187_v40  ;;  %v8267_v32 = vld [vmem:[#allocation44_spill] sm:$0xff]  ;;  %v4360_v40 = vunpack.i.h.bf16 %v8269_v7  ;;  %v7163_v54 = vsel %vm306_vm2, %v4375_v24, %v4350_v3  ;;  %v7177_v58 = vsel %vm306_vm2, %v4374_v20, %v4375_v24  ;;  %v7193_v9 = vsel %vm306_vm2, %v4350_v3, %v4374_v20 }
 0x20b   : > { %3759 = vmatmul.msk.f32.vlgmr.msrb.gmra.mxu1 %vm1362_vm8, %v6304_v4  ;;  %2796 = vmatpush.msrb.mxu3 %v7030_v44  ;;  %8273 = vst [vmem:[#allocation38_spill] sm:$0xff] %v7163_v54  ;;  %v8283_v48 = vunpack.i.l.bf16 %v8282_v19  ;;  %v8284_v15 = vunpack.i.h.bf16 %v8282_v19  ;;  %v2001_v24 = vadd.f32 %v2000_v30, %v1940_v38  ;;  %v7226_v38 = vsel %vm264_vm5, %v4390_v45, %v4389_v49  ;;  %v7233_v30 = vld [vmem:[%s4906_s12 + $0xa8] sm:$0xff] }
 0x20c   : > { %2936 = vmatpush.msrb.mxu1 %v7135_v21  ;;  %2816 = vmatpush.msra.mxu0 %v8267_v32  ;;  %v7143_v1 = vpop.f32.mrf.mxu0  ;;  %v7179_v18 = vpop.permute.xlu1 %4392  ;;  %v7185_v17 = vsel %vm293_vm3, %v4380_v5, %v4360_v40  ;;  %v7212_v32 = vld [vmem:[%s4906_s12 + $0xb8] sm:$0xff]  ;;  %v7218_v46 = vsel %vm293_vm3, %v4360_v40, %v4379_v23  ;;  %8288 = vst [vmem:[#allocation39_spill] sm:$0xff] %v7226_v38 }
 0x20d   : > { %2853 = vmatpush.msra.mxu2 %v8268_v55  ;;  %2797 = vmatpush.msrb.mxu3 %v7057_v34  ;;  %8279 = vst [vmem:[#allocation23_spill] sm:$0xff] %v7185_v17  ;;  %v7209_v3 = vsel %vm277_vm4, %v8284_v15, %v8283_v48  ;;  %v8287_v55 = vld [vmem:[#allocation25_spill] sm:$0xff]  ;;  %v4395_v5 = vunpack.i.h.bf16 %v7179_v18  ;;  %v4394_v20 = vunpack.i.l.bf16 %v7179_v18  ;;  %v4300_v15 = vunpack.i.h.bf16 %v6555_v14 }
 0x20e   : > { %2937 = vmatpush.msrb.mxu1 %v8270_v36  ;;  %2817 = vmatpush.msra.mxu0 %v8271_v60  ;;  %8285 = vst [vmem:[#allocation28_spill] sm:$0xff] %v7209_v3 }
 0x20f   : > { %2854 = vmatpush.msra.mxu2 %v8272_v39  ;;  %2896 = vmatpush.msra.mxu3 %v7153_v8  ;;  %8286 = vst [vmem:[#allocation44_spill] sm:$0xff] %v7212_v32  ;;  %v7238_v60 = vsel %vm251_vm6, %v4395_v5, %v4394_v20 }
 0x210   : > { %2916 = vmatpush.msrb.mxu0 %v7157_v12  ;;  %2938 = vmatpush.msrb.mxu1 %v7163_v54  ;;  %8289 = vst [vmem:[#allocation34_spill] sm:$0xff] %v7238_v60 }
 0x211   : > { %2855 = vmatpush.msra.mxu2 %v8274_v2  ;;  %2897 = vmatpush.msra.mxu3 %v8278_v33  ;;  %v1960_v61 = vpop.f32.mrf.mxu3  ;;  %v7241_v2 = vld [vmem:[%s4906_s12 + $0xb0] sm:$0xff] }
 0x212   : > { %2917 = vmatpush.msrb.mxu0 %v7173_v35  ;;  %2939 = vmatpush.msrb.mxu1 %v7185_v17  ;;  %v2020_v57 = vpop.f32.mrf.mxu2  ;;  %8290 = vst [vmem:[#allocation29_spill] sm:$0xff] %v7241_v2 }
 0x213   : > { %2856 = vmatpush.msra.mxu2 %v8280_v63  ;;  %2898 = vmatpush.msra.mxu3 %v7193_v9  ;;  %v2021_v7 = vadd.f32 %v2020_v57, %v1960_v61  ;;  %v8292_v61 = vld [vmem:[#allocation26_spill] sm:$0xff]  ;;  %v8293_v63 = vld [vmem:[#allocation20_spill] sm:$0xff] }
 0x214   : > { %2918 = vmatpush.msrb.mxu0 %v7177_v58  ;;  %2940 = vmatpush.msrb.mxu1 %v7212_v32  ;;  %v7249_v18 = vpop.permute.xlu1 %4407  ;;  %v8294_v57 = vunpack.i.l.bf16 %v8293_v63  ;;  %v8295_v19 = vunpack.i.h.bf16 %v8293_v63 }
 0x215   : > { %2857 = vmatpush.msra.mxu2 %v8287_v55  ;;  %2899 = vmatpush.msra.mxu3 %v7218_v46  ;;  %v7270_v55 = vsel %vm264_vm5, %v4389_v49, %v4310_v27  ;;  %v7284_v49 = vsel %vm251_vm6, %v4394_v20, %v4300_v15  ;;  %v8301_v20 = vld [vmem:[#allocation31_spill] sm:$0xff] }
 0x216   : > { %2919 = vmatpush.msrb.mxu0 %v7197_v53  ;;  %2941 = vmatpush.msrb.mxu1 %v7209_v3  ;;  %v7259_v48 = vsel %vm238_vm7, %v8295_v19, %v8294_v57 }
 0x217   : > { %3760 = vmatmul.msk.f32.vlgmr.msrb.gmra.mxu2 %vm1362_vm8, %v6304_v4  ;;  %v2087_v40 = vpop.f32.mrf.mxu0  ;;  %2900 = vmatpush.msra.mxu3 %v7233_v30  ;;  %v2107_v23 = vpop.f32.mrf.mxu1  ;;  %8296 = vst [vmem:[#allocation37_spill] sm:$0xff] %v7259_v48 }
 0x218   : > { %3022 = vmatpush.msrb.mxu2 %v7153_v8  ;;  %v2130_v39 = vadd.f32 %v2087_v40, %v2001_v24  ;;  %2920 = vmatpush.msrb.mxu0 %v7241_v2  ;;  %v2131_v4 = vadd.f32 %v2107_v23, %v2021_v7  ;;  %v7263_v24 = vld [vmem:[#allocation6 + $0x8] sm:$0xff]  ;;  %v7274_v7 = vsel %vm264_vm5, %v4310_v27, %v4390_v45  ;;  %v8299_v23 = vld [vmem:[#allocation30_spill] sm:$0xff]  ;;  %v8302_v27 = vld [vmem:[#allocation27_spill] sm:$0xff] }
 0x219   : > { %2942 = vmatpush.msrb.mxu1 %v7226_v38  ;;  %2901 = vmatpush.msra.mxu3 %v8291_v59  ;;  %8297 = vst [vmem:[#allocation48_spill] sm:$0xff] %v7274_v7  ;;  %v7292_v45 = vsel %vm251_vm6, %v4300_v15, %v4395_v5 }
 0x21a   : > { %3023 = vmatpush.msrb.mxu2 %v8278_v33  ;;  %v2133_v43 = vadd.f32 %v2130_v39, %v7074_v56  ;;  %2921 = vmatpush.msrb.mxu0 %v8292_v61  ;;  %v2134_v52 = vadd.f32 %v2131_v4, %v7074_v56  ;;  %v7276_v39 = vpop.permute.xlu0 %4417  ;;  %8298 = vst [vmem:[#allocation46_spill] sm:$0xff] %v7292_v45  ;;  %v8300_v4 = vld [vmem:[#allocation43_spill] sm:$0xff] }
 0x21b   : > { %2943 = vmatpush.msrb.mxu1 %v7238_v60  ;;  %3761 = vmatmul.msk.f32.vlgmr.msrb.gmra.mxu3 %vm1362_vm8, %v7263_v24 }
 0x21c   : > { %3024 = vmatpush.msrb.mxu2 %v7193_v9  ;;  %v2136_v40 = vmax.f32 %v2133_v43, 0.0  ;;  %2902 = vmatpush.msra.mxu3 %v7270_v55  ;;  %v2137_v14 = vmax.f32 %v2134_v52, 0.0  ;;  %v7307_v5 = vpop.permute.xlu1 %4422  ;;  %v8303_v43 = vld [vmem:[#allocation56_spill] sm:$0xff]  ;;  %v8305_v52 = vld [vmem:[#allocation53_spill] sm:$0xff] }
 0x21d   : > { %2922 = vmatpush.msrb.mxu0 %v7274_v7  ;;  %2944 = vmatpush.msrb.mxu1 %v7259_v48 }
 0x21e   : > { %3025 = vmatpush.msrb.mxu2 %v7218_v46  ;;  %2139 = vst [vmem:[%s7098_s8 + $0x30] sm:$0xff] %v2136_v40  ;;  %3763 = vmatmul.msk.f32.vlgmr.msra.gmra.mxu1 %vm1362_vm8, %v6407_v10 }
 0x21f   : > { %2903 = vmatpush.msra.mxu3 %v7284_v49  ;;  %2140 = vst [vmem:[%s7098_s8 + $0x38] sm:$0xff] %v2137_v14  ;;  %3082 = vmatpush.msra.mxu1 %v8299_v23  ;;  %v8306_v14 = vld [vmem:[#allocation51_spill] sm:$0xff]  ;;  %v8307_v23 = vld [vmem:[#allocation22_spill] sm:$0xff] }
 0x220   : > { %2923 = vmatpush.msrb.mxu0 %v7292_v45  ;;  %3026 = vmatpush.msrb.mxu2 %v7233_v30 }
 0x221   : > { %2904 = vmatpush.msra.mxu3 %v8300_v4  ;;  %3083 = vmatpush.msra.mxu1 %v8301_v20  ;;  %v7980_v20 = vunpack.i.l.bf16 %v7249_v18 }
 0x222   : > { %2924 = vmatpush.msrb.mxu0 %v8302_v27  ;;  %3764 = vmatmul.msk.f32.vlgmr.msra.gmra.mxu2 %vm1362_vm8, %v6407_v10  ;;  %v7314_v63 = vpop.permute.xlu0 %4432 }
 0x223   : > { %3762 = vmatmul.msk.f32.vlgmr.msra.gmra.mxu0 %vm1362_vm8, %v6407_v10  ;;  %3027 = vmatpush.msrb.mxu2 %v8291_v59  ;;  %v8304_v10 = vld [vmem:[#allocation57_spill] sm:$0xff] }
 0x224   : > { %3042 = vmatpush.msrb.mxu3 %v7157_v12  ;;  %3062 = vmatpush.msra.mxu0 %v7135_v21 }
 0x225   : > { %3084 = vmatpush.msra.mxu1 %v8303_v43  ;;  %3765 = vmatmul.msk.f32.vlgmr.msra.gmra.mxu3 %vm1362_vm8, %v6650_v22  ;;  %v4405_v43 = vunpack.i.h.bf16 %v7187_v28 }
 0x226   : > { %3028 = vmatpush.msrb.mxu2 %v7270_v55  ;;  %3043 = vmatpush.msrb.mxu3 %v7173_v35 }
 0x227   : > { %3063 = vmatpush.msra.mxu0 %v8270_v36  ;;  %3085 = vmatpush.msra.mxu1 %v8304_v10  ;;  %v2040_v57 = vpop.f32.mrf.mxu3  ;;  %v8308_v10 = vld [vmem:[#allocation21_spill] sm:$0xff] }
 0x228   : > { %3029 = vmatpush.msrb.mxu2 %v7284_v49  ;;  %3044 = vmatpush.msrb.mxu3 %v7177_v58  ;;  %v2041_v19 = vadd.f32 %v2040_v57, %v7143_v1  ;;  %v4415_v57 = vunpack.i.h.bf16 %v8308_v10 }
 0x229   : > { %3064 = vmatpush.msra.mxu0 %v7163_v54  ;;  %3086 = vmatpush.msra.mxu1 %v8305_v52  ;;  %v7340_v52 = vpop.permute.xlu1 %4437  ;;  %v7523_v54 = vld [vmem:[#allocation6] sm:$0xff] }
 0x22a   : > { %3030 = vmatpush.msrb.mxu2 %v8300_v4  ;;  %v2127_v15 = vpop.f32.mrf.mxu2  ;;  %3045 = vmatpush.msrb.mxu3 %v7197_v53 }
 0x22b   : > { %3065 = vmatpush.msra.mxu0 %v7185_v17  ;;  %v2132_v40 = vadd.f32 %v2127_v15, %v2041_v19  ;;  %3087 = vmatpush.msra.mxu1 %v8306_v14  ;;  %v8309_v15 = vld [vmem:[#allocation33_spill] sm:$0xff]  ;;  %v7983_v19 = vunpack.i.l.bf16 %v8308_v10  ;;  %v7481_v17 = vld [vmem:[%s4906_s12 + $0xc0] sm:$0xff] }
 0x22c   : > { %3102 = vmatpush.msra.mxu2 %v8307_v23  ;;  %3766 = vmatmul.msk.f32.vlgmr.msrb.gmra.mxu0 %vm1362_vm8, %v6650_v22  ;;  %v7354_v23 = vsel %vm332_vm0, %v4405_v43, %v7980_v20  ;;  %v8313_v20 = vunpack.i.l.bf16 %v7276_v39 }
 0x22d   : > { %3767 = vmatmul.msk.f32.vlgmr.msrb.gmra.mxu1 %vm1362_vm8, %v6650_v22  ;;  %v2135_v1 = vadd.f32 %v2132_v40, %v7074_v56  ;;  %3046 = vmatpush.msrb.mxu3 %v7241_v2  ;;  %v7346_v22 = vpop.permute.xlu0 %4447  ;;  %v8310_v40 = vld [vmem:[#allocation52_spill] sm:$0xff] }
 0x22e   : > { %3066 = vmatpush.msra.mxu0 %v7212_v32  ;;  %3088 = vmatpush.msra.mxu1 %v6890_v16  ;;  %v8311_v16 = vld [vmem:[#allocation45_spill] sm:$0xff] }
 0x22f   : > { %3103 = vmatpush.msra.mxu2 %v8309_v15  ;;  %v2138_v14 = vmax.f32 %v2135_v1, 0.0  ;;  %3047 = vmatpush.msrb.mxu3 %v8292_v61  ;;  %v4425_v1 = vunpack.i.h.bf16 %v7307_v5  ;;  %v8315_v15 = vld [vmem:[#allocation24_spill] sm:$0xff] }
 0x230   : > { %3067 = vmatpush.msra.mxu0 %v7209_v3  ;;  %3089 = vmatpush.msra.mxu1 %v6916_v41  ;;  %v4404_v41 = vunpack.i.l.bf16 %v7187_v28 }
 0x231   : > { %3104 = vmatpush.msra.mxu2 %v8310_v40  ;;  %2141 = vst [vmem:[%s7098_s8 + $0x40] sm:$0xff] %v2138_v14  ;;  %3048 = vmatpush.msrb.mxu3 %v7274_v7  ;;  %v8312_v40 = vld [vmem:[#allocation42_spill] sm:$0xff]  ;;  %v7369_v14 = vsel %vm319_vm1, %v4415_v57, %v8313_v20  ;;  %v4435_v7 = vunpack.i.h.bf16 %v7314_v63 }
 0x232   : > { %3068 = vmatpush.msra.mxu0 %v7226_v38  ;;  %3090 = vmatpush.msra.mxu1 %v6952_v50  ;;  %v8314_v50 = vunpack.i.l.bf16 %v8311_v16  ;;  %v7391_v28 = vsel %vm332_vm0, %v4404_v41, %v4405_v43 }
 0x233   : > { %3105 = vmatpush.msra.mxu2 %v8312_v40  ;;  %3049 = vmatpush.msrb.mxu3 %v7292_v45  ;;  %v7409_v40 = vpop.permute.xlu1 %4452  ;;  %v7447_v45 = vld [vmem:[%s4906_s12 + $0xc8] sm:$0xff] }
 0x234   : > { %3189 = vmatpush.msrb.mxu1 %v7354_v23  ;;  %3069 = vmatpush.msra.mxu0 %v7238_v60  ;;  %v7384_v20 = vsel %vm306_vm2, %v4425_v1, %v8314_v50  ;;  %v4444_v50 = vunpack.i.l.bf16 %v8315_v15  ;;  %v8319_v60 = vunpack.i.h.bf16 %v8315_v15 }
 0x235   : > { %3106 = vmatpush.msra.mxu2 %v6971_v31  ;;  %3050 = vmatpush.msrb.mxu3 %v8302_v27  ;;  %v7397_v31 = vsel %vm319_vm1, %v7983_v19, %v4415_v57  ;;  %v8317_v57 = vunpack.i.l.bf16 %v7307_v5  ;;  %v8321_v27 = vld [vmem:[#allocation50_spill] sm:$0xff] }
 0x236   : > { %3190 = vmatpush.msrb.mxu1 %v7369_v14  ;;  %3070 = vmatpush.msra.mxu0 %v7259_v48  ;;  %v7425_v48 = vpop.permute.xlu0 %4462  ;;  %v8327_v53 = vunpack.i.h.bf16 %v8321_v27 }
 0x237   : > { %3107 = vmatpush.msra.mxu2 %v6984_v37  ;;  %3122 = vmatpush.msra.mxu3 %v6876_v51  ;;  %v8316_v37 = vunpack.i.l.bf16 %v7340_v52  ;;  %v7417_v19 = vsel %vm306_vm2, %v8317_v57, %v4425_v1  ;;  %v7419_v51 = vpop.f32.mrf.mxu1  ;;  %v4449_v57 = vunpack.i.l.bf16 %v7346_v22 }
 0x238   : > { %3169 = vmatpush.msrb.mxu0 %v7391_v28  ;;  %3191 = vmatpush.msrb.mxu1 %v7384_v20 }
 0x239   : > { %v7407_v43 = vsel %vm293_vm3, %v4435_v7, %v8316_v37  ;;  %3108 = vmatpush.msra.mxu2 %v7008_v6  ;;  %v4454_v37 = vunpack.i.l.bf16 %v7409_v40  ;;  %3123 = vmatpush.msra.mxu3 %v6904_v47  ;;  %v8318_v6 = vunpack.i.l.bf16 %v7314_v63  ;;  %v4464_v47 = vunpack.i.l.bf16 %v7425_v48 }
 0x23a   : > { %3170 = vmatpush.msrb.mxu0 %v7397_v31  ;;  %3192 = vmatpush.msrb.mxu1 %v7407_v43 }
 0x23b   : > { %3109 = vmatpush.msra.mxu2 %v7024_v62  ;;  %v7433_v1 = vsel %vm293_vm3, %v8318_v6, %v4435_v7  ;;  %3124 = vmatpush.msra.mxu3 %v6930_v13  ;;  %v7444_v62 = vsel %vm277_vm4, %v4444_v50, %v8319_v60  ;;  %v8320_v7 = vld [vmem:[#allocation41_spill] sm:$0xff]  ;;  %v4469_v13 = vunpack.i.l.bf16 %v8321_v27  ;;  %v8322_v60 = vunpack.i.h.bf16 %v7409_v40 }
 0x23c   : > { %3171 = vmatpush.msrb.mxu0 %v7417_v19  ;;  %3193 = vmatpush.msrb.mxu1 %v7447_v45  ;;  %v4459_v6 = vunpack.i.l.bf16 %v8320_v7 }
 0x23d   : > { %3110 = vmatpush.msra.mxu2 %v7036_v25  ;;  %3125 = vmatpush.msra.mxu3 %v6942_v0  ;;  %v7460_v3 = vsel %vm264_vm5, %v4454_v37, %v8322_v60  ;;  %v8323_v25 = vunpack.i.l.bf16 %v7249_v18  ;;  %v7472_v0 = vsel %vm277_vm4, %v4449_v57, %v4444_v50  ;;  %v8324_v60 = vunpack.i.h.bf16 %v7425_v48 }
 0x23e   : > { %3172 = vmatpush.msrb.mxu0 %v7433_v1  ;;  %3194 = vmatpush.msrb.mxu1 %v7444_v62  ;;  %v2213_v61 = vpop.f32.mrf.mxu3  ;;  %v7500_v4 = vsel %vm238_vm7, %v4469_v13, %v8327_v53  ;;  %v8330_v53 = vunpack.i.l.bf16 %v7314_v63 }
 0x23f   : > { %3768 = vmatmul.msk.f32.vlgmr.msrb.gmra.mxu2 %vm1362_vm8, %v7263_v24  ;;  %v1191_v38 = vsel %vm332_vm0, %v8323_v25, %v4404_v41  ;;  %3126 = vmatpush.msra.mxu3 %v6975_v42  ;;  %v7478_v32 = vsel %vm251_vm6, %v4464_v47, %v8324_v60  ;;  %v2273_v2 = vpop.f32.mrf.mxu2  ;;  %v8325_v41 = vunpack.i.l.bf16 %v8308_v10  ;;  %v8326_v42 = vunpack.i.l.bf16 %v7276_v39 }
 0x240   : > { %3209 = vmatpush.msrb.mxu2 %v1191_v38  ;;  %3173 = vmatpush.msrb.mxu0 %v7481_v17  ;;  %v2274_v25 = vadd.f32 %v2273_v2, %v2213_v61  ;;  %v7494_v60 = vsel %vm264_vm5, %v4459_v6, %v4454_v37  ;;  %v8328_v10 = vunpack.i.l.bf16 %v7307_v5  ;;  %v8329_v2 = vunpack.i.l.bf16 %v8311_v16  ;;  %v1113_v37 = vpop.permute.xlu1 %1112 }
 0x241   : > { %3195 = vmatpush.msrb.mxu1 %v7460_v3  ;;  %v1179_v50 = vsel %vm319_vm1, %v8326_v42, %v8325_v41  ;;  %3127 = vmatpush.msra.mxu3 %v6995_v29  ;;  %v8331_v5 = vunpack.i.l.bf16 %v7340_v52 }
 0x242   : > { %3210 = vmatpush.msrb.mxu2 %v1179_v50  ;;  %3174 = vmatpush.msrb.mxu0 %v7472_v0  ;;  %v1167_v29 = vsel %vm306_vm2, %v8329_v2, %v8328_v10  ;;  %v7521_v10 = vsel %vm251_vm6, %v1113_v37, %v4464_v47  ;;  %v1100_v2 = vpop.permute.xlu0 %1099  ;;  %v4541_v47 = vld [vmem:[%s4906_s12 + $0xd0] sm:$0xff] }
 0x243   : > { %3196 = vmatpush.msrb.mxu1 %v7478_v32  ;;  %v2360_v61 = vpop.f32.mrf.mxu1  ;;  %3128 = vmatpush.msra.mxu3 %v7014_v11  ;;  %v1155_v42 = vsel %vm293_vm3, %v8331_v5, %v8330_v53  ;;  %v7531_v63 = vsel %vm238_vm7, %v1100_v2, %v4469_v13  ;;  %v8332_v53 = vunpack.i.h.bf16 %v8315_v15  ;;  %v8334_v15 = vunpack.i.h.bf16 %v7425_v48 }
 0x244   : > { %3211 = vmatpush.msrb.mxu2 %v1167_v29  ;;  %v2403_v41 = vadd.f32 %v2360_v61, %v2274_v25  ;;  %3175 = vmatpush.msrb.mxu0 %v7494_v60  ;;  %v2233_v25 = vpop.f32.mrf.mxu0 }
 0x245   : > { %3197 = vmatpush.msrb.mxu1 %v7500_v4  ;;  %3129 = vmatpush.msra.mxu3 %v7030_v44  ;;  %v8333_v44 = vunpack.i.h.bf16 %v7409_v40  ;;  %v8335_v40 = vunpack.i.h.bf16 %v8321_v27  ;;  %v7571_v27 = vld [vmem:[#allocation6 + $0x10] sm:$0xff] }
 0x246   : > { %3771 = vmatmul.msk.f32.vlgmr.msra.gmra.mxu1 %vm1362_vm8, %v7523_v54  ;;  %3212 = vmatpush.msrb.mxu2 %v1155_v42  ;;  %v2406_v11 = vadd.f32 %v2403_v41, %v7074_v56  ;;  %v4440_v41 = vunpack.i.h.bf16 %v7340_v52 }
 0x247   : > { %3335 = vmatpush.msra.mxu1 %v1191_v38  ;;  %3176 = vmatpush.msrb.mxu0 %v7521_v10  ;;  %v1138_v38 = vsel %vm277_vm4, %v8332_v53, %v4449_v57  ;;  %v1114_v57 = vsel %vm251_vm6, %v8334_v15, %v1113_v37  ;;  %v8345_v15 = vld [vmem:[#allocation26_spill] sm:$0xff] }
 0x248   : > { %3213 = vmatpush.msrb.mxu2 %v4541_v47  ;;  %v2409_v61 = vmax.f32 %v2406_v11, 0.0  ;;  %3130 = vmatpush.msra.mxu3 %v7057_v34  ;;  %v1126_v34 = vsel %vm264_vm5, %v8333_v44, %v4459_v6  ;;  %v8336_v6 = vld [vmem:[#allocation58_spill] sm:$0xff]  ;;  %v8344_v44 = vld [vmem:[#allocation44_spill] sm:$0xff] }
 0x249   : > { %3336 = vmatpush.msra.mxu1 %v1179_v50  ;;  %3177 = vmatpush.msrb.mxu0 %v7531_v63  ;;  %v4479_v50 = vunpack.i.l.bf16 %v8336_v6 }
 0x24a   : > { %3769 = vmatmul.msk.f32.vlgmr.msrb.gmra.mxu3 %vm1362_vm8, %v7263_v24  ;;  %2412 = vst [vmem:[%s7098_s8 + $0x48] sm:$0xff] %v2409_v61  ;;  %3770 = vmatmul.msk.f32.vlgmr.msra.gmra.mxu0 %vm1362_vm8, %v7263_v24  ;;  %v7588_v37 = vpop.permute.xlu0 %4482  ;;  %v8343_v61 = vld [vmem:[#allocation29_spill] sm:$0xff] }
 0x24b   : > { %3772 = vmatmul.msk.f32.vlgmr.msra.gmra.mxu2 %vm1362_vm8, %v7523_v54  ;;  %3295 = vmatpush.msrb.mxu3 %v7391_v28  ;;  %v1101_v28 = vsel %vm238_vm7, %v8335_v40, %v1100_v2 }
 0x24c   : > { %3214 = vmatpush.msrb.mxu2 %v1138_v38  ;;  %3315 = vmatpush.msra.mxu0 %v7354_v23  ;;  %v2313_v23 = vpop.f32.mrf.mxu0 }
 0x24d   : > { %3337 = vmatpush.msra.mxu1 %v1167_v29  ;;  %3296 = vmatpush.msrb.mxu3 %v7397_v31  ;;  %v2293_v13 = vpop.f32.mrf.mxu3  ;;  %v7567_v31 = vpop.permute.xlu1 %4472  ;;  %v4420_v29 = vunpack.i.h.bf16 %v7276_v39 }
 0x24e   : > { %3215 = vmatpush.msrb.mxu2 %v1126_v34  ;;  %3316 = vmatpush.msra.mxu0 %v7369_v14  ;;  %v2294_v48 = vadd.f32 %v2293_v13, %v2233_v25  ;;  %v8342_v25 = vld [vmem:[#allocation23_spill] sm:$0xff] }
 0x24f   : > { %3338 = vmatpush.msra.mxu1 %v1155_v42  ;;  %3297 = vmatpush.msrb.mxu3 %v7417_v19  ;;  %v2314_v19 = vadd.f32 %v2313_v23, %v7419_v51  ;;  %v8337_v42 = vld [vmem:[#allocation47_spill] sm:$0xff] }
 0x250   : > { %3216 = vmatpush.msrb.mxu2 %v1114_v57  ;;  %3317 = vmatpush.msra.mxu0 %v7384_v20  ;;  %v4494_v23 = vunpack.i.l.bf16 %v8337_v42 }
 0x251   : > { %3339 = vmatpush.msra.mxu1 %v4541_v47  ;;  %3298 = vmatpush.msrb.mxu3 %v7433_v1  ;;  %v4410_v1 = vunpack.i.h.bf16 %v7249_v18 }
 0x252   : > { %3217 = vmatpush.msrb.mxu2 %v1101_v28  ;;  %3318 = vmatpush.msra.mxu0 %v7407_v43  ;;  %v4474_v43 = vunpack.i.l.bf16 %v7567_v31 }
 0x253   : > { %3340 = vmatpush.msra.mxu1 %v1138_v38  ;;  %3774 = vmatmul.msk.f32.vlgmr.msrb.gmra.mxu0 %vm1362_vm8, %v7571_v27 }
 0x254   : > { %3355 = vmatpush.msra.mxu2 %v7153_v8  ;;  %v2380_v14 = vpop.f32.mrf.mxu2  ;;  %3775 = vmatmul.msk.f32.vlgmr.msrb.gmra.mxu1 %vm1362_vm8, %v7571_v27 }
 0x255   : > { %3299 = vmatpush.msrb.mxu3 %v7481_v17  ;;  %v2404_v20 = vadd.f32 %v2380_v14, %v2294_v48  ;;  %3319 = vmatpush.msra.mxu0 %v7447_v45  ;;  %v1297_v45 = vsel %vm332_vm0, %v4410_v1, %v4474_v43  ;;  %v8347_v48 = vld [vmem:[#allocation48_spill] sm:$0xff] }
 0x256   : > { %3341 = vmatpush.msra.mxu1 %v1126_v34  ;;  %3356 = vmatpush.msra.mxu2 %v8278_v33 }
 0x257   : > { %3300 = vmatpush.msrb.mxu3 %v7472_v0  ;;  %v2407_v8 = vadd.f32 %v2404_v20, %v7074_v56  ;;  %v2400_v51 = vpop.f32.mrf.mxu3  ;;  %3320 = vmatpush.msra.mxu0 %v7444_v62  ;;  %v7598_v0 = vpop.permute.xlu1 %4487 }
 0x258   : > { %3342 = vmatpush.msra.mxu1 %v1114_v57  ;;  %v2405_v17 = vadd.f32 %v2400_v51, %v2314_v19  ;;  %3357 = vmatpush.msra.mxu2 %v7193_v9  ;;  %v4430_v9 = vunpack.i.h.bf16 %v8311_v16  ;;  %v4489_v5 = vunpack.i.l.bf16 %v7598_v0  ;;  %v4490_v38 = vunpack.i.h.bf16 %v7598_v0  ;;  %v8346_v57 = vld [vmem:[#allocation28_spill] sm:$0xff]  ;;  %v8349_v19 = vld [vmem:[#allocation46_spill] sm:$0xff] }
 0x259   : > { %3301 = vmatpush.msrb.mxu3 %v7494_v60  ;;  %v2410_v33 = vmax.f32 %v2407_v8, 0.0  ;;  %3321 = vmatpush.msra.mxu0 %v7460_v3  ;;  %v4484_v60 = vunpack.i.l.bf16 %v7588_v37  ;;  %v8350_v51 = vld [vmem:[#allocation34_spill] sm:$0xff] }
 0x25a   : > { %3343 = vmatpush.msra.mxu1 %v1101_v28  ;;  %v2408_v62 = vadd.f32 %v2405_v17, %v7074_v56  ;;  %3358 = vmatpush.msra.mxu2 %v7218_v46  ;;  %v1285_v46 = vsel %vm319_vm1, %v4420_v29, %v4479_v50  ;;  %v1260_v13 = vsel %vm293_vm3, %v4489_v5, %v4490_v38 }
 0x25b   : > { %2413 = vst [vmem:[%s7098_s8 + $0x50] sm:$0xff] %v2410_v33  ;;  %3302 = vmatpush.msrb.mxu3 %v7521_v10  ;;  %3322 = vmatpush.msra.mxu0 %v7478_v32  ;;  %v1273_v32 = vsel %vm306_vm2, %v4430_v9, %v4484_v60  ;;  %v4495_v10 = vunpack.i.h.bf16 %v8337_v42  ;;  %v8352_v33 = vld [vmem:[#allocation27_spill] sm:$0xff] }
 0x25c   : > { %3442 = vmatpush.msrb.mxu1 %v1297_v45  ;;  %v2411_v3 = vmax.f32 %v2408_v62, 0.0  ;;  %3773 = vmatmul.msk.f32.vlgmr.msra.gmra.mxu3 %vm1362_vm8, %v7523_v54  ;;  %v8353_v62 = vld [vmem:[#allocation37_spill] sm:$0xff] }
 0x25d   : > { %3359 = vmatpush.msra.mxu2 %v7233_v30  ;;  %3303 = vmatpush.msrb.mxu3 %v7531_v63  ;;  %v7626_v30 = vpop.permute.xlu0 %4497  ;;  %v1245_v52 = vsel %vm277_vm4, %v4494_v23, %v4495_v10 }
 0x25e   : > { %3443 = vmatpush.msrb.mxu1 %v1285_v46  ;;  %2414 = vst [vmem:[%s7098_s8 + $0x58] sm:$0xff] %v2411_v3  ;;  %3323 = vmatpush.msra.mxu0 %v7500_v4  ;;  %v4450_v4 = vunpack.i.h.bf16 %v7346_v22  ;;  %v4500_v2 = vunpack.i.h.bf16 %v7626_v30  ;;  %v8339_v22 = vld [vmem:[#allocation55_spill] sm:$0xff]  ;;  %v2506_v46 = vpop.f32.mrf.mxu1 }
 0x25f   : > { %3776 = vmatmul.msk.f32.vlgmr.msrb.gmra.mxu2 %vm1362_vm8, %v7571_v27  ;;  %3375 = vmatpush.msra.mxu3 %v7157_v12  ;;  %v1261_v12 = vsel %vm293_vm3, %v4440_v41, %v4489_v5  ;;  %v7648_v63 = vpop.permute.xlu1 %4502 }
 0x260   : > { %3360 = vmatpush.msra.mxu2 %v8291_v59  ;;  %3395 = vmatpush.msrb.mxu0 %v7135_v21  ;;  %v4475_v59 = vunpack.i.h.bf16 %v7567_v31  ;;  %v4460_v21 = vunpack.i.h.bf16 %v8320_v7  ;;  %v8341_v7 = vld [vmem:[#allocation40_spill] sm:$0xff]  ;;  %v4504_v40 = vunpack.i.l.bf16 %v7648_v63  ;;  %v8348_v31 = vld [vmem:[#allocation39_spill] sm:$0xff]  ;;  %v4505_v8 = vunpack.i.h.bf16 %v7648_v63 }
 0x261   : > { %3444 = vmatpush.msrb.mxu1 %v1273_v32  ;;  %3376 = vmatpush.msra.mxu3 %v7173_v35  ;;  %v4480_v35 = vunpack.i.h.bf16 %v8336_v6  ;;  %v8351_v6 = vld [vmem:[#allocation32_spill] sm:$0xff]  ;;  %v1246_v0 = vsel %vm277_vm4, %v4450_v4, %v4494_v23 }
 0x262   : > { %3361 = vmatpush.msra.mxu2 %v7270_v55  ;;  %3396 = vmatpush.msrb.mxu0 %v8270_v36  ;;  %v8338_v55 = vld [vmem:[#allocation38_spill] sm:$0xff]  ;;  %v1296_v11 = vsel %vm332_vm0, %v4474_v43, %v4475_v59  ;;  %v8340_v36 = vld [vmem:[#allocation43_spill] sm:$0xff]  ;;  %v1235_v53 = vsel %vm264_vm5, %v4500_v2, %v4460_v21  ;;  %v2486_v20 = vpop.f32.mrf.mxu0  ;;  %v4499_v43 = vunpack.i.l.bf16 %v7626_v30  ;;  %v1298_v45 = vsel %vm332_vm0, %v4475_v59, %v4410_v1 }
 0x263   : > { %3445 = vmatpush.msrb.mxu1 %v1261_v12  ;;  %3377 = vmatpush.msra.mxu3 %v7177_v58  ;;  %v1247_v58 = vsel %vm277_vm4, %v4495_v10, %v4450_v4  ;;  %v1284_v47 = vsel %vm319_vm1, %v4479_v50, %v4480_v35  ;;  %v1223_v50 = vsel %vm251_vm6, %v8351_v6, %v4504_v40  ;;  %v4544_v12 = vld [vmem:[%s4906_s12 + $0xe8] sm:$0xff] }
 0x264   : > { %3362 = vmatpush.msra.mxu2 %v7284_v49  ;;  %3397 = vmatpush.msrb.mxu0 %v8338_v55  ;;  %v4485_v49 = vunpack.i.h.bf16 %v7588_v37  ;;  %v4543_v37 = vld [vmem:[%s4906_s12 + $0xe0] sm:$0xff]  ;;  %v1286_v3 = vsel %vm319_vm1, %v4480_v35, %v4420_v29  ;;  %v1234_v1 = vsel %vm264_vm5, %v4460_v21, %v4499_v43  ;;  %v1222_v5 = vsel %vm251_vm6, %v4504_v40, %v4505_v8  ;;  %s8355_s12 = sld [smem:[#allocation60_spill]] }
 0x265   : > { %3446 = vmatpush.msrb.mxu1 %v8339_v22  ;;  %3378 = vmatpush.msra.mxu3 %v8341_v7  ;;  %v4508_v28 = vpop.permute.xlu0 %4507  ;;  %v1233_v59 = vsel %vm264_vm5, %v4499_v43, %v4500_v2  ;;  %v1221_v35 = vsel %vm251_vm6, %v4505_v8, %v8351_v6 }
 0x266   : > { %3363 = vmatpush.msra.mxu2 %v8340_v36  ;;  %3398 = vmatpush.msrb.mxu0 %v8342_v25  ;;  %v1272_v34 = vsel %vm306_vm2, %v4484_v60, %v4485_v49  ;;  %v4509_v14 = vunpack.i.l.bf16 %v4508_v28  ;;  %v4510_v60 = vunpack.i.h.bf16 %v4508_v28  ;;  %v1274_v39 = vsel %vm306_vm2, %v4485_v49, %v4430_v9 }
 0x267   : > { %3447 = vmatpush.msrb.mxu1 %v1247_v58  ;;  %3379 = vmatpush.msra.mxu3 %v8343_v61  ;;  %v1207_v17 = vpop.permute.xlu1 %1206  ;;  %v8354_v9 = vmov 0  }
 0x268   : > { %3462 = vmatpush.msrb.mxu2 %v1296_v11  ;;  %3399 = vmatpush.msrb.mxu0 %v8344_v44  ;;  %v1210_v18 = vsel %vm238_vm7, %v1207_v17, %v4509_v14  ;;  %v1209_v32 = vsel %vm238_vm7, %v4509_v14, %v4510_v60  ;;  %v1208_v42 = vsel %vm238_vm7, %v4510_v60, %v1207_v17 }
 0x269   : > { %3448 = vmatpush.msrb.mxu1 %v1235_v53  ;;  %3380 = vmatpush.msra.mxu3 %v8345_v15 }
 0x26a   : > { %3463 = vmatpush.msrb.mxu2 %v1284_v47  ;;  %3400 = vmatpush.msrb.mxu0 %v8346_v57  ;;  %s8356_s25 = smov %s8355_s12  ;;  %s3521_s26 = scalar_lea.hbm %s8355_s12, %s3786_s10 }
 0x26b   : > { %3777 = vmatmul.msk.f32.vlgmr.msrb.gmra.mxu3 %vm1362_vm8, %v7263_v24  ;;  %3779 = vmatmul.msk.f32.vlgmr.msra.gmra.mxu1 %vm1362_vm8, %v7263_v24  ;;  %s3525_s19 = sshll.u32 %s3521_s26, 4  ;;  %s4625_s4 = scalar_lea.hbm %s8356_s25, 768  ;;  %s3526_s19 = int_to_ptr.hbm [resolvable:$true] %s3525_s19 }
 0x26c   : > { %3464 = vmatpush.msrb.mxu2 %v1272_v34  ;;  %3381 = vmatpush.msra.mxu3 %v8347_v48  ;;  %s4619_s28 = sshra.s32 %s3526_s19, 4  ;;  %s4620_s28 = int_to_ptr.hbm [resolvable:$true] %s4619_s28 }
 0x26d   : > { %3401 = vmatpush.msrb.mxu0 %v8348_v31  ;;  %3780 = vmatmul.msk.f32.vlgmr.msra.gmra.mxu2 %vm1362_vm8, %v7523_v54  ;;  %s4621_s29 = scalar_lea.hbm %s4620_s28, 192  ;;  %p4626_p0 = scmp.lt.s32.totalorder %s4620_s28, %s8356_s25 }
 0x26e   : > { %3465 = vmatpush.msrb.mxu2 %v1260_v13  ;;  %3382 = vmatpush.msra.mxu3 %v8349_v19  ;;  %p4622_p1 = scmp.ne.s32.totalorder %s4620_s28, %s4621_s29  ;;  %p4627_p2 = scmp.lt.s32.totalorder %s4625_s4, %s4621_s29 }
 0x26f   : > { %3402 = vmatpush.msrb.mxu0 %v8350_v51  ;;  %3449 = vmatpush.msrb.mxu1 %v1223_v50 }
 0x270   : > { %3466 = vmatpush.msrb.mxu2 %v4543_v37  ;;  %3383 = vmatpush.msra.mxu3 %v8352_v33  ;;  %p4623_p4 = pnand %p4622_p1, %p4837_p6  ;;  %p4628_p3 = por %p4627_p2, %p4626_p0 }
 0x271   : > { %3403 = vmatpush.msrb.mxu0 %v8353_v62  ;;  %v2526_v29 = vpop.f32.mrf.mxu2  ;;  %3450 = vmatpush.msrb.mxu1 %v1210_v18 }
 0x272   : > { %3482 = vmatpush.msrb.mxu3 %v1298_v45  ;;  %3467 = vmatpush.msrb.mxu2 %v1246_v0  ;;  %p4624_p11 = pneg %p4623_p4 }
 0x273   : > { %3778 = vmatmul.msk.f32.vlgmr.msra.gmra.mxu0 %vm1362_vm8, %v7263_v24  ;;  %3781 = vmatmul.msk.f32.vlgmr.msra.gmra.mxu3 %vm1362_vm8, %v7523_v54  ;;  %v1262_v24 = vsel %vm293_vm3, %v4490_v38, %v4440_v41  ;;  %v2586_v21 = vpop.f32.mrf.mxu1 }
 0x274   : > { %3483 = vmatpush.msrb.mxu3 %v1286_v3  ;;  %3468 = vmatpush.msrb.mxu2 %v1234_v1  ;;  %p4629_p5 = pnand %p4628_p3, %p4624_p11 }
 0x275   : > { %3783 = vmatmul.msk.f32.vlgmr.msrb.gmra.mxu1 %vm1362_vm8, %v7571_v27  ;;  %4512 = vset.pattern.permute.xlu0 %v8354_v9 }
 0x276   : > { %3484 = vmatpush.msrb.mxu3 %v1274_v39  ;;  %3469 = vmatpush.msrb.mxu2 %v1222_v5  ;;  %v2546_v16 = vpop.f32.mrf.mxu3 }
 0x277   : > { %v2547_v41 = vadd.f32 %v2546_v16, %v2486_v20 }
 0x278   : > { %3485 = vmatpush.msrb.mxu3 %v1262_v24  ;;  %3470 = vmatpush.msrb.mxu2 %v1209_v32  ;;  %v2566_v4 = vpop.f32.mrf.mxu0 }
 0x279   : > { %3784 = vmatmul.msk.f32.vlgmr.msrb.gmra.mxu2 %vm1362_vm8, %v7571_v27  ;;  %v2567_v10 = vadd.f32 %v2566_v4, %v2506_v46 }
 0x27a   : > { %3486 = vmatpush.msrb.mxu3 %v4544_v12 }
 0x27b   : > { %3782 = vmatmul.msk.f32.vlgmr.msrb.gmra.mxu0 %vm1362_vm8, %v7523_v54  ;;  %v2587_v54 = vadd.f32 %v2586_v21, %v2526_v29 }
 0x27c   : > { %3487 = vmatpush.msrb.mxu3 %v1245_v52 }
 0x27d   : > { %v2633_v55 = vpop.f32.mrf.mxu2 }
 0x27e   : > { %3488 = vmatpush.msrb.mxu3 %v1233_v59  ;;  %v2676_v30 = vadd.f32 %v2633_v55, %v2547_v41 }
 0x280   : > { %3489 = vmatpush.msrb.mxu3 %v1221_v35  ;;  %v2679_v2 = vadd.f32 %v2676_v30, %v7074_v56  ;;  %v2653_v22 = vpop.f32.mrf.mxu3 }
 0x281   : > { %v2677_v11 = vadd.f32 %v2653_v22, %v2567_v10  ;;  %v2673_v63 = vpop.f32.mrf.mxu0 }
 0x282   : > { %3490 = vmatpush.msrb.mxu3 %v1208_v42  ;;  %v2682_v36 = vmax.f32 %v2679_v2, 0.0  ;;  %v2678_v26 = vadd.f32 %v2673_v63, %v2587_v54 }
 0x283   : > { %3785 = vmatmul.msk.f32.vlgmr.msrb.gmra.mxu3 %vm1362_vm8, %v7571_v27  ;;  %v2680_v7 = vadd.f32 %v2677_v11, %v7074_v56 }
 0x284   : > { %2685 = vst [vmem:[%s7098_s8 + $0x60] sm:$0xff] %v2682_v36  ;;  %v2681_v58 = vadd.f32 %v2678_v26, %v7074_v56 }
 0x285   : > { %v2683_v49 = vmax.f32 %v2680_v7, 0.0 }
 0x286   : > { %v2684_v25 = vmax.f32 %v2681_v58, 0.0 }
 0x287   : > { %2686 = vst [vmem:[%s7098_s8 + $0x68] sm:$0xff] %v2683_v49 }
 0x288   : > { %2687 = vst [vmem:[%s7098_s8 + $0x70] sm:$0xff] %v2684_v25  ;;  %v2759_v47 = vpop.f32.mrf.mxu1 }
 0x29a   : > { %v2779_v61 = vpop.f32.mrf.mxu2 }
 0x29b   : > { %v2839_v44 = vpop.f32.mrf.mxu1 }
 0x29c   : > { %v2840_v15 = vadd.f32 %v2839_v44, %v2779_v61 }
 0x29e   : > { %v2799_v53 = vpop.f32.mrf.mxu3 }
 0x2a0   : > { %v2819_v38 = vpop.f32.mrf.mxu0 }
 0x2a1   : > { %v2820_v34 = vadd.f32 %v2819_v38, %v2759_v47 }
 0x2a5   : > { %v2859_v27 = vpop.f32.mrf.mxu2 }
 0x2a6   : > { %v2860_v57 = vadd.f32 %v2859_v27, %v2799_v53 }
 0x2a8   : > { %v2906_v13 = vpop.f32.mrf.mxu3 }
 0x2a9   : > { %v2949_v40 = vadd.f32 %v2906_v13, %v2820_v34  ;;  %v2926_v28 = vpop.f32.mrf.mxu0 }
 0x2aa   : > { %v2946_v48 = vpop.f32.mrf.mxu1  ;;  %v2950_v23 = vadd.f32 %v2926_v28, %v2840_v15 }
 0x2ab   : > { %v2951_v31 = vadd.f32 %v2946_v48, %v2860_v57  ;;  %v2952_v19 = vadd.f32 %v2949_v40, %v7074_v56 }
 0x2ac   : > { %v2953_v14 = vadd.f32 %v2950_v23, %v7074_v56 }
 0x2ad   : > { %v2954_v20 = vadd.f32 %v2951_v31, %v7074_v56  ;;  %v2955_v43 = vmax.f32 %v2952_v19, 0.0 }
 0x2ae   : > { %v2956_v8 = vmax.f32 %v2953_v14, 0.0 }
 0x2af   : > { %v2957_v51 = vmax.f32 %v2954_v20, 0.0  ;;  %2958 = vst [vmem:[%s7098_s8 + $0x78] sm:$0xff] %v2955_v43 }
 0x2b0   : > { %2959 = vst [vmem:[%s7098_s8 + $0x80] sm:$0xff] %v2956_v8 }
 0x2b1   : > { %2960 = vst [vmem:[%s7098_s8 + $0x88] sm:$0xff] %v2957_v51 }
 0x2c2   : > { %v3032_v17 = vpop.f32.mrf.mxu2 }
 0x2c3   : > { %v3092_v50 = vpop.f32.mrf.mxu1 }
 0x2c4   : > { %v3093_v33 = vadd.f32 %v3092_v50, %v3032_v17 }
 0x2c7   : > { %v3072_v6 = vpop.f32.mrf.mxu0 }
 0x2cd   : > { %v3052_v37 = vpop.f32.mrf.mxu3 }
 0x2ce   : > { %v3112_v45 = vpop.f32.mrf.mxu2 }
 0x2cf   : > { %v3113_v62 = vadd.f32 %v3112_v45, %v3052_v37 }
 0x2d0   : > { %v3179_v0 = vpop.f32.mrf.mxu0 }
 0x2d1   : > { %v3222_v60 = vadd.f32 %v3179_v0, %v3093_v33  ;;  %v3199_v3 = vpop.f32.mrf.mxu1 }
 0x2d2   : > { %v3223_v18 = vadd.f32 %v3199_v3, %v3113_v62 }
 0x2d3   : > { %v3225_v46 = vadd.f32 %v3222_v60, %v7074_v56 }
 0x2d4   : > { %v3226_v1 = vadd.f32 %v3223_v18, %v7074_v56 }
 0x2d5   : > { %v3228_v5 = vmax.f32 %v3225_v46, 0.0 }
 0x2d6   : > { %v3229_v39 = vmax.f32 %v3226_v1, 0.0 }
 0x2d7   : > { %3231 = vst [vmem:[%s7098_s8 + $0x90] sm:$0xff] %v3228_v5 }
 0x2d8   : > { %3232 = vst [vmem:[%s7098_s8 + $0x98] sm:$0xff] %v3229_v39 }
 0x2df   : > { %v3132_v29 = vpop.f32.mrf.mxu3 }
 0x2e0   : > { %v3133_v32 = vadd.f32 %v3132_v29, %v3072_v6 }
 0x2e2   : > { %v3219_v24 = vpop.f32.mrf.mxu2 }
 0x2e3   : > { %v3224_v16 = vadd.f32 %v3219_v24, %v3133_v32 }
 0x2e5   : > { %v3227_v9 = vadd.f32 %v3224_v16, %v7074_v56 }
 0x2e7   : > { %v3230_v4 = vmax.f32 %v3227_v9, 0.0 }
 0x2e8   : > { %v3345_v12 = vpop.f32.mrf.mxu1 }
 0x2e9   : > { %3233 = vst [vmem:[%s7098_s8 + $0xa0] sm:$0xff] %v3230_v4 }
 0x2ee   : > { %v3305_v52 = vpop.f32.mrf.mxu3 }
 0x2f0   : > { %v3365_v41 = vpop.f32.mrf.mxu2  ;;  %v3325_v42 = vpop.f32.mrf.mxu0 }
 0x2f1   : > { %v3366_v59 = vadd.f32 %v3365_v41, %v3305_v52 }
 0x2f2   : > { %v3452_v21 = vpop.f32.mrf.mxu1 }
 0x2f3   : > { %v3495_v35 = vadd.f32 %v3452_v21, %v3366_v59 }
 0x2f5   : > { %v3498_v10 = vadd.f32 %v3495_v35, %v7074_v56 }
 0x2f6   : > { %v3385_v55 = vpop.f32.mrf.mxu3 }
 0x2f7   : > { %v3501_v54 = vmax.f32 %v3498_v10, 0.0  ;;  %v3386_v30 = vadd.f32 %v3385_v55, %v3325_v42 }
 0x2f8   : > { %v3405_v63 = vpop.f32.mrf.mxu0 }
 0x2f9   : > { %3504 = vst [vmem:[%s7098_s8 + $0xa8] sm:$0xff] %v3501_v54  ;;  %v3406_v26 = vadd.f32 %v3405_v63, %v3345_v12 }
 0x2fc   : > { %v3472_v2 = vpop.f32.mrf.mxu2 }
 0x2fd   : > { %v3496_v22 = vadd.f32 %v3472_v2, %v3386_v30 }
 0x2ff   : > { %v3499_v11 = vadd.f32 %v3496_v22, %v7074_v56 }
 0x301   : > { %v3502_v36 = vmax.f32 %v3499_v11, 0.0 }
 0x303   : > { %3505 = vst [vmem:[%s7098_s8 + $0xb0] sm:$0xff] %v3502_v36 }
 0x306   : > { %v3492_v7 = vpop.f32.mrf.mxu3 }
 0x307   : > { %v3497_v58 = vadd.f32 %v3492_v7, %v3406_v26 }
 0x309   : > { %v3500_v49 = vadd.f32 %v3497_v58, %v7074_v56 }
 0x30b   : > { %v3503_v25 = vmax.f32 %v3500_v49, 0.0 }
 0x30d   : > { %3506 = vst [vmem:[%s7098_s8 + $0xb8] sm:$0xff] %v3503_v25 }
 0x30e   : > { %4632 = shalt.err (!%p4629_p5)
}
 0x30f   : > { %3801 = dma.vmem_to_hbm [thread:$0]  (%p4837_p6), %s3524_s18, 3072, %s3526_s19, %s3508_s27  }
 0x310 PF: > { %s8358_s6 = sld [smem:[#allocation12_spill]]  ;;  %p3818_p7 = scmp.ge.s32.totalorder %s4731_s22, 2 }
 0x312   : > { %p3812_p8 = pnand %p3818_p7, %p4843_p10 }
 0x314   : > { %p3813_p9 = pneg %p3812_p8 }
 0x316   : > { %s3537_s24 = sand.u32 1, %s8358_s6  }
 0x317   : > { %s3538_s15 = scalar_lea.sflag [#allocation5], %s3537_s24 }
 0x318   : > { %4686 = dma.done.wait (%p3813_p9), %s3538_s15, 3072  }
 0x319   : > { %4688 = vsyncadd (%p3813_p9), %s3538_s15, 4294964224  ;;  %s20_s22 = sadd.s32 1, %s4731_s22   ;;  %s8360_s18 = sld [smem:[#allocation13_spill]] }
 0x31a   : > { %p17_p12 = scmp.ge.s32.totalorder %s20_s22, 6   ;;  %s8361_s19 = sld [smem:[#allocation14_spill]] }
 0x31b   : > { %s8362_s20 = sld [smem:[#allocation17_spill]]  ;;  %s8364_s12 = smov %s4695_s13 }
 0x31c   : > { %s8363_s21 = sld [smem:[#allocation18_spill]]  ;;  %s8365_s13 = smov %s4699_s14 }
 0x31d   : > { %s8366_s14 = smov %s4885_s1  ;;  %s8367_s15 = smov %s4707_s16 }
 0x31e   : > { %s8368_s16 = smov %s4711_s17  ;;  %s8369_s17 = smov %s4882_s9 }
 0x31f   :  { %19 = sbr.rel (!%p17_p12) target bundleno = 13 (0xd), region = 102 }
 0x324   :  { %3544 = vsyncpa [#allocation4], 1 }
 0x325   :  { %3546 = vsyncpa [#allocation4 + $0x1], 1 }
 0x326   :  { %3547 = vsyncpa [#allocation7], 1 }
 0x327   :  { %3548 = vsyncpa [#allocation5], 1 }
 0x328   :  { %3550 = vsyncpa [#allocation5 + $0x1], 1 }

</bundles_post_ra>
